<compile_context>
chip_gen: v6e
topology: v6e:2x2x1
jax: 0.10.0
libtpu: 0.0.40
codegen_flags: <defaults>
</compile_context>

<pallas_src>
import functools

import jax
import jax.numpy as jnp
from jax.experimental import pallas as pl
from jax.experimental.pallas import tpu as pltpu

TOKEN_SELF_ATTN_VALUE = -50000.0


# ----------------------------------------------------------------------------
# Per-generation VMEM budgets (v5e/v6e: 128 MiB physical, v7x: 64 MiB)
# ----------------------------------------------------------------------------
def _vmem_capacity_bytes():
    try:
        info = pltpu.get_tpu_info()
    except Exception:
        return None
    for name in ("vmem_capacity_bytes", "vmem_bytes", "vmem_size_bytes"):
        v = getattr(info, name, None)
        if isinstance(v, int) and v > 0:
            return v
    return None


def _vmem_budgets():
    """(tile budget bytes, vmem_limit_bytes) chosen per TPU generation."""
    cap = _vmem_capacity_bytes()
    if cap is not None and cap >= 100 * 1024 * 1024:      # v5e / v6e (128 MiB)
        return 48 * 1024 * 1024, 96 * 1024 * 1024
    return 20 * 1024 * 1024, 44 * 1024 * 1024             # v7x (64 MiB) / unknown


# ----------------------------------------------------------------------------
# Tiled linear (bf16 MXU operands, f32 accumulation)
# ----------------------------------------------------------------------------
def _linear_kernel_noacc(x_ref, w_ref, o_ref):
    o_ref[...] = jnp.dot(x_ref[...], w_ref[...],
                         preferred_element_type=jnp.float32).astype(o_ref.dtype)


def _linear_bias_kernel_noacc(x_ref, w_ref, b_ref, o_ref):
    acc = jnp.dot(x_ref[...], w_ref[...], preferred_element_type=jnp.float32)
    o_ref[...] = (acc + b_ref[...]).astype(o_ref.dtype)


def _linear_kernel_acc(x_ref, w_ref, o_ref, acc_ref):
    @pl.when(pl.program_id(2) == 0)
    def _():
        acc_ref[...] = jnp.zeros_like(acc_ref)

    acc_ref[...] += jnp.dot(x_ref[...], w_ref[...],
                            preferred_element_type=jnp.float32)

    @pl.when(pl.program_id(2) == pl.num_programs(2) - 1)
    def _():
        o_ref[...] = acc_ref[...].astype(o_ref.dtype)


def _linear_bias_kernel_acc(x_ref, w_ref, b_ref, o_ref, acc_ref):
    @pl.when(pl.program_id(2) == 0)
    def _():
        acc_ref[...] = jnp.zeros_like(acc_ref)

    acc_ref[...] += jnp.dot(x_ref[...], w_ref[...],
                            preferred_element_type=jnp.float32)

    @pl.when(pl.program_id(2) == pl.num_programs(2) - 1)
    def _():
        o_ref[...] = (acc_ref[...] + b_ref[...]).astype(o_ref.dtype)


def _pick_tile(dim, cap, align):
    """Largest tile <= cap dividing dim and multiple of `align` (falls back to
    the full dim, which is always layout-legal)."""
    if dim <= cap:
        return dim
    t = (cap // align) * align
    while t >= align:
        if dim % t == 0:
            return t
        t -= align
    return dim


def linear_pallas(x, w, b=None, *, out_dtype=None,
                  tm_cap=512, tn_cap=512, tk_cap=512):
    """y = x @ w (+ b) with bf16 MXU operands and f32 accumulation.

    Weight-resident path (when the full-K blocks fit the VMEM budget): grid is
    (N-tiles, M-tiles) with M fastest, so the weight column block is DMAed once
    per column and reused across every row tile -> the weight streams from HBM
    exactly once.  Falls back to a K-tiled accumulator matmul otherwise.
    """
    M, K = x.shape
    _, N = w.shape
    out_dtype = x.dtype if out_dtype is None else out_dtype
    xb = x.astype(jnp.bfloat16)
    wb = w.astype(jnp.bfloat16)
    bias = None if b is None else b.reshape(1, N).astype(jnp.float32)

    budget, vmem_limit = _vmem_budgets()
    tm = _pick_tile(M, tm_cap, 16)     # bf16 sublane packing
    tn = _pick_tile(N, tn_cap, 128)

    # double-buffered x/w blocks (bf16) + output block (out dtype, assume 4B)
    resident_bytes = 2 * 2 * (tm * K + K * tn) + 2 * 4 * tm * tn
    if resident_bytes <= budget:
        grid = (N // tn, M // tm)      # M fastest => weight block reused across i
        in_specs = [pl.BlockSpec((tm, K), lambda j, i: (i, 0)),
                    pl.BlockSpec((K, tn), lambda j, i: (0, j))]
        if bias is None:
            kernel = _linear_kernel_noacc
            args = (xb, wb)
        else:
            kernel = _linear_bias_kernel_noacc
            in_specs.append(pl.BlockSpec((1, tn), lambda j, i: (0, j)))
            args = (xb, wb, bias)
        return pl.pallas_call(
            kernel,
            out_shape=jax.ShapeDtypeStruct((M, N), out_dtype),
            grid_spec=pltpu.PrefetchScalarGridSpec(
                num_scalar_prefetch=0,
                grid=grid,
                in_specs=in_specs,
                out_specs=pl.BlockSpec((tm, tn), lambda j, i: (i, j)),
            ),
            compiler_params=pltpu.CompilerParams(
                dimension_semantics=("parallel", "parallel"),
                vmem_limit_bytes=vmem_limit,
            ),
        )(*args)

    # fallback: K-tiled accumulator matmul
    tk = _pick_tile(K, tk_cap, 128)
    grid = (M // tm, N // tn, K // tk)
    in_specs = [pl.BlockSpec((tm, tk), lambda i, j, k: (i, k)),
                pl.BlockSpec((tk, tn), lambda i, j, k: (k, j))]
    if bias is None:
        kernel = _linear_kernel_acc
        args = (xb, wb)
    else:
        kernel = _linear_bias_kernel_acc
        in_specs.append(pl.BlockSpec((1, tn), lambda i, j, k: (0, j)))
        args = (xb, wb, bias)
    return pl.pallas_call(
        kernel,
        out_shape=jax.ShapeDtypeStruct((M, N), out_dtype),
        grid_spec=pltpu.PrefetchScalarGridSpec(
            num_scalar_prefetch=0,
            grid=grid,
            in_specs=in_specs,
            out_specs=pl.BlockSpec((tm, tn), lambda i, j, k: (i, j)),
            scratch_shapes=[pltpu.VMEM((tm, tn), jnp.float32)],
        ),
        compiler_params=pltpu.CompilerParams(
            dimension_semantics=("parallel", "parallel", "arbitrary"),
            vmem_limit_bytes=vmem_limit,
        ),
    )(*args)


# ----------------------------------------------------------------------------
# LSH bucketed attention kernel (chunk-tiled, look-one-back via index_map)
# ----------------------------------------------------------------------------
def _pack_lanes(x, lanes=128):
    """(..., R, Dm) -> (..., R*Dm//lanes, lanes) preserving row-major order.
    Built from static size-1 row slices + lane/sublane concats (no generic
    trailing-dims reshape), so the stores downstream are unmasked 128-lane vst
    and the HBM rows are contiguous."""
    *_, R, Dm = x.shape
    r = lanes // Dm
    rows = []
    for p in range(R // r):
        rows.append(jnp.concatenate(
            [x[..., p * r + k:p * r + k + 1, :] for k in range(r)], axis=-1))
    return rows[0] if len(rows) == 1 else jnp.concatenate(rows, axis=-2)


def _lsh_chunk_attn_kernel(bq_ref, kp_ref, bv_ref, vp_ref, qt_ref, kpt_ref,
                           bo_ref, lse_ref, *, bo_packed, lse_packed):
    bq = bq_ref[...]          # (Ct, I, D) bf16: queries == un-normalized shared QK
    kp = kp_ref[...]          # (I, D)     bf16: last chunk of the previous tile
    bv = bv_ref[...]          # (Ct, I, D) bf16
    vp = vp_ref[...]          # (I, D)     bf16
    q_t = qt_ref[...]         # (Ct, I) int32 original token positions
    kp_t = kpt_ref[...]       # (1, I)  int32 positions of the previous chunk

    Ct, I, D = bq.shape
    f32 = jnp.float32

    # F.normalize(keys, p=2, dim=-1): f32 sum-of-squares, rsqrt on the EUP.
    def l2norm(v):
        vf = v.astype(f32)
        ss = jnp.sum(vf * vf, axis=-1, keepdims=True)
        return (vf * jax.lax.rsqrt(jnp.maximum(ss, 1e-24))).astype(v.dtype)

    k_cur = l2norm(bq)                                     # (Ct, I, D)
    kp_n = l2norm(kp)

    # look_one_back: chunk j also attends to chunk j-1; chunk 0 of this tile
    # wraps to the last chunk of the previous tile (fetched via prev BlockSpec).
    if Ct > 1:
        k_back = jnp.concatenate([kp_n[None], k_cur[:-1]], axis=0)   # (Ct, I, D)
        v_back = jnp.concatenate([vp[None], bv[:-1]], axis=0)
        t_back = jnp.concatenate([kp_t, q_t[:-1]], axis=0)           # (Ct, I)
    else:
        k_back = kp_n[None]
        v_back = vp[None]
        t_back = kp_t

    # fold 1/sqrt(D) into the (smaller) query tensor instead of the logits
    bqs = bq * jnp.asarray(float(D) ** -0.5, dtype=bq.dtype)

    # two half-width logit blocks instead of a (Ct, 2I, D) K concat in VMEM
    dots_cur = jnp.einsum("cie,cje->cij", bqs, k_cur,
                          preferred_element_type=f32)      # (Ct, I, I)
    dots_bk = jnp.einsum("cie,cje->cij", bqs, k_back,
                         preferred_element_type=f32)       # (Ct, I, I)

    # a token never attends to itself in shared-QK LSH attention
    dots_cur = jnp.where(q_t[:, :, None] == q_t[:, None, :],
                         TOKEN_SELF_ATTN_VALUE, dots_cur)
    dots_bk = jnp.where(q_t[:, :, None] == t_back[:, None, :],
                        TOKEN_SELF_ATTN_VALUE, dots_bk)

    # stable softmax + logsumexp over both halves (f32); exact reciprocal so p
    # stays consistent with lse (used for the cross-hash recombination)
    m = jnp.maximum(jnp.max(dots_cur, axis=-1, keepdims=True),
                    jnp.max(dots_bk, axis=-1, keepdims=True))
    e_cur = jnp.exp(dots_cur - m)
    e_bk = jnp.exp(dots_bk - m)
    s = (jnp.sum(e_cur, axis=-1, keepdims=True)
         + jnp.sum(e_bk, axis=-1, keepdims=True))
    lse = m + jnp.log(s)
    inv_s = 1.0 / s
    p_cur = (e_cur * inv_s).astype(bv.dtype)
    p_bk = (e_bk * inv_s).astype(bv.dtype)

    bo = (jnp.einsum("cij,cje->cie", p_cur, bv, preferred_element_type=f32)
          + jnp.einsum("cij,cje->cie", p_bk, v_back, preferred_element_type=f32))
    bo = bo.astype(bo_ref.dtype)
    if bo_packed:
        bo_ref[...] = _pack_lanes(bo)          # lane-dense (rows of 128)
    else:
        bo_ref[...] = bo

    lse2 = lse[..., 0]                         # (Ct, I)
    if lse_packed:
        lse_ref[...] = _pack_lanes(lse2)
    else:
        lse_ref[...] = lse2


def _pick_chunk_tile(C, I, D, budget_bytes):
    """Largest Ct dividing C with Ct==C or Ct%8==0 that fits the VMEM budget."""
    def est_bytes(ct):
        # double-buffered pipeline blocks: bf16 bq/bv/bo + prev chunk, int32
        # positions, f32 lse
        io = 2 * (2 * (3 * ct * I * D + 2 * I * D) + 4 * (2 * ct * I + I))
        # in-kernel temporaries: k_cur/k_back/v_back/bqs (bf16), bo (f32),
        # dots/e/p for both halves (f32)
        scratch = ct * I * (2 * 4 * D + 4 * D + 4 * 6 * I)
        return io + scratch

    candidates = [d for d in range(C, 0, -1)
                  if C % d == 0 and (d == C or d % 8 == 0)]
    for ct in candidates:
        if est_bytes(ct) <= budget_bytes:
            return ct
    return candidates[-1]


def lsh_chunk_attention_pallas(sqk, sv, st, chunk_tile=None):
    """sqk/sv: (BH, C, I, D) sorted shared-QK / values (cast to bf16 here).
    st: (BH, C, I) int32 original token positions.
    Returns (bo:(BH,C,I,D) bf16, lse:(BH,C,I) f32)."""
    BH, C, I, D = sqk.shape
    sqk = sqk.astype(jnp.bfloat16)
    sv = sv.astype(jnp.bfloat16)

    budget, vmem_limit = _vmem_budgets()
    Ct = _pick_chunk_tile(C, I, D, budget) if chunk_tile is None else int(chunk_tile)
    assert C % Ct == 0 and (Ct == C or Ct % 8 == 0), (C, Ct)
    nC = C // Ct

    st4 = st.reshape(BH, C, 1, I).astype(jnp.int32)

    def cur_map(b, c):
        return (b, c, 0, 0)

    def prev_map(b, c):
        # chunk index preceding the first chunk of tile c (wraps around)
        return (b, (c * Ct + C - 1) % C, 0, 0)

    # lane-dense bo: pack (I, D) rows into 128-lane rows when D < 128
    bo_packed = (D < 128) and (128 % D == 0) and (I % (128 // D) == 0) and I <= 256
    if bo_packed:
        bo_shape = (BH, C, (I * D) // 128, 128)
        bo_block = (None, Ct, (I * D) // 128, 128)
    else:
        bo_shape = (BH, C, I, D)
        bo_block = (None, Ct, I, D)

    # lane-dense lse: pack a tile's (Ct, I) logits into 128-lane rows
    lse_packed = ((I < 128) and (128 % I == 0) and (Ct % (128 // I) == 0)
                  and Ct <= 256)
    if lse_packed:
        lse_shape = (BH, nC, (Ct * I) // 128, 128)
        lse_block = (None, None, (Ct * I) // 128, 128)
        lse_map = lambda b, c: (b, c, 0, 0)
    else:
        lse_shape = (BH, C, I)
        lse_block = (None, Ct, I)
        lse_map = lambda b, c: (b, c, 0)

    kernel = functools.partial(_lsh_chunk_attn_kernel,
                               bo_packed=bo_packed, lse_packed=lse_packed)

    bo, lse = pl.pallas_call(
        kernel,
        out_shape=(
            jax.ShapeDtypeStruct(bo_shape, jnp.bfloat16),
            jax.ShapeDtypeStruct(lse_shape, jnp.float32),
        ),
        grid_spec=pltpu.PrefetchScalarGridSpec(
            num_scalar_prefetch=0,
            grid=(BH, nC),   # both independent -> megacore-shardable on v7x
            in_specs=[
                pl.BlockSpec((None, Ct, I, D), cur_map),       # queries / cur keys
                pl.BlockSpec((None, None, I, D), prev_map),    # prev-chunk keys
                pl.BlockSpec((None, Ct, I, D), cur_map),       # cur values
                pl.BlockSpec((None, None, I, D), prev_map),    # prev-chunk values
                pl.BlockSpec((None, Ct, None, I), cur_map),    # cur positions
                pl.BlockSpec((None, None, 1, I), prev_map),    # prev positions
            ],
            out_specs=[
                pl.BlockSpec(bo_block, cur_map),
                pl.BlockSpec(lse_block, lse_map),
            ],
        ),
        compiler_params=pltpu.CompilerParams(
            dimension_semantics=("parallel", "parallel"),
            vmem_limit_bytes=vmem_limit,
        ),
    )(sqk, sqk, sv, sv, st4, st4)

    bo = bo.reshape(BH, C, I, D)      # free in HBM (row-major contiguous)
    lse = lse.reshape(BH, C, I)
    return bo, lse


# ----------------------------------------------------------------------------
# Pure-JAX references (mirror the kernels' bf16-operand numerics)
# ----------------------------------------------------------------------------
def linear_jnp(x, w, b=None, *, out_dtype=None):
    out_dtype = x.dtype if out_dtype is None else out_dtype
    y = jnp.dot(x.astype(jnp.bfloat16), w.astype(jnp.bfloat16),
                preferred_element_type=jnp.float32)
    if b is not None:
        y = y + b.astype(jnp.float32)
    return y.astype(out_dtype)


def lsh_chunk_attention_jnp(sqk, sv, st, chunk_tile=None):
    del chunk_tile
    sqk = sqk.astype(jnp.bfloat16).astype(jnp.float32)
    sv = sv.astype(jnp.bfloat16).astype(jnp.float32)
    ss = jnp.sum(sqk * sqk, axis=-1, keepdims=True)
    bk_n = sqk * jax.lax.rsqrt(jnp.maximum(ss, 1e-24))

    def look_one_back(a):
        a_extra = jnp.concatenate([a[:, -1:, ...], a[:, :-1, ...]], axis=1)
        return jnp.concatenate([a, a_extra], axis=2)

    bq = sqk
    bk = look_one_back(bk_n)
    bv = look_one_back(sv)
    bkv_t = look_one_back(st)
    scale = float(sqk.shape[-1]) ** -0.5
    dots = jnp.einsum("bcie,bcje->bcij", bq, bk) * scale
    self_mask = st[:, :, :, None] == bkv_t[:, :, None, :]
    dots = jnp.where(self_mask, TOKEN_SELF_ATTN_VALUE, dots)
    m = jnp.max(dots, axis=-1, keepdims=True)
    e = jnp.exp(dots - m)
    s = jnp.sum(e, axis=-1, keepdims=True)
    lse = m + jnp.log(s)
    p = e / s
    bo = jnp.einsum("bcij,bcje->bcie", p, bv)
    return bo.astype(jnp.bfloat16), lse[..., 0]


# ----------------------------------------------------------------------------
# LSHSelfAttention forward (defaults: no mem_kv, no context keys, no masks,
# causal=False, attend_across_buckets=True, allow_duplicate_attention=True,
# n_local_attn_heads=0, all dropout rates = 0)
# ----------------------------------------------------------------------------
def lsh_self_attention_forward(params, x, *, heads, dim_head, bucket_size,
                               n_hashes, rot_key, use_pallas=True,
                               attn_chunk_tile=None):
    lin = linear_pallas if use_pallas else linear_jnp
    attn = lsh_chunk_attention_pallas if use_pallas else lsh_chunk_attention_jnp

    b, t, e = x.shape
    h, dh = heads, dim_head
    BH = b * h
    seqlen = t
    assert seqlen % (bucket_size * 2) == 0
    n_buckets = seqlen // bucket_size
    C = n_hashes * n_buckets           # number of chunks
    I = bucket_size                    # tokens per chunk

    # ---- projections (bf16 MXU matmuls, f32 accumulation) ----
    x2 = x.reshape(b * t, e)
    qk = lin(x2, params["w_qk"])                          # f32 (used for hashing)
    v = lin(x2, params["w_v"], out_dtype=jnp.bfloat16)    # bias=False
    qk = qk.reshape(b, t, h, dh).transpose(0, 2, 1, 3).reshape(BH, t, dh)
    v = v.reshape(b, t, h, dh).transpose(0, 2, 1, 3).reshape(BH, t, dh)
    # TODO(synk): fold this head-split transpose into the projection out_specs
    # (write (b, h, t, dh) directly) to save two HBM round trips.

    # ---- hash_vectors (glue; data-dependent argsort/gather stays in JAX) ----
    rot = jax.random.normal(rot_key, (dh, n_hashes, n_buckets // 2), jnp.float32)
    rotated = jnp.einsum("btf,fhi->bhti", qk, rot)
    rotated = jnp.concatenate([rotated, -rotated], axis=-1)
    buckets = jnp.argmax(rotated, axis=-1)                        # (BH, nh, t)
    offsets = (jnp.arange(n_hashes) * n_buckets).reshape(1, -1, 1)
    buckets = (buckets + offsets).reshape(BH, -1)                 # (BH, nh*t)

    # ---- stable sort by bucket ----
    ticker = jnp.broadcast_to(jnp.arange(n_hashes * seqlen)[None, :],
                              buckets.shape)
    buckets_and_t = seqlen * buckets + (ticker % seqlen)
    sticker = jnp.argsort(buckets_and_t, axis=-1)
    undo_sort = jnp.argsort(sticker, axis=-1)
    st = sticker % seqlen

    # gather sorted qk/v in bf16 (halves gather + attention-kernel HBM traffic)
    # TODO(synk): gathering inside the kernel via scalar-prefetched st + row DMA
    # would also avoid materializing the sorted copies (needs profiling).
    qk16 = qk.astype(jnp.bfloat16)
    sqk = jnp.take_along_axis(qk16, st[:, :, None], axis=1)
    sv = jnp.take_along_axis(v, st[:, :, None], axis=1)

    sqk4 = sqk.reshape(BH, C, I, dh)
    sv4 = sv.reshape(BH, C, I, dh)
    st3 = st.reshape(BH, C, I).astype(jnp.int32)

    bo, lse = attn(sqk4, sv4, st3, chunk_tile=attn_chunk_tile)

    so = bo.reshape(BH, -1, dh)
    slogits = lse.reshape(BH, -1)
    o = jnp.take_along_axis(so, undo_sort[:, :, None], axis=1)
    logits = jnp.take_along_axis(slogits, undo_sort, axis=1)
    o = o.reshape(BH, n_hashes, seqlen, dh).astype(jnp.float32)
    logits = logits.reshape(BH, n_hashes, seqlen, 1)

    # combine the n_hashes rounds (logsumexp over the hash axis)
    mx = jnp.max(logits, axis=1, keepdims=True)
    lse_h = mx + jnp.log(jnp.sum(jnp.exp(logits - mx), axis=1, keepdims=True))
    probs = jnp.exp(logits - lse_h)
    out = jnp.sum(o * probs, axis=1)                              # (BH, t, dh)

    out = out.reshape(b, h, t, dh).transpose(0, 2, 1, 3).reshape(b * t, h * dh)
    out = lin(out, params["w_out"], params["b_out"])
    return out.reshape(b, t, e)


# ----------------------------------------------------------------------------
if __name__ == "__main__":
    # Small LSH-path shapes: kv_len(64) > full_attn_thres(=bucket_size=8).
    b, t, dim = 2, 64, 32
    heads, dim_head = 4, 16
    bucket_size, n_hashes = 8, 2        # -> C = 16 chunks, I = 8 tokens/chunk

    key = jax.random.PRNGKey(0)
    kx, kqk, kv, ko, kb, krot, ka = jax.random.split(key, 7)
    x = jax.random.normal(kx, (b, t, dim), jnp.float32)

    params = {
        "w_qk": 0.05 * jax.random.normal(kqk, (dim, heads * dim_head), jnp.float32),
        "w_v": 0.05 * jax.random.normal(kv, (dim, heads * dim_head), jnp.float32),
        "w_out": 0.05 * jax.random.normal(ko, (heads * dim_head, dim), jnp.float32),
        "b_out": 0.01 * jax.random.normal(kb, (dim,), jnp.float32),
    }

    # --- kernel-level checks on identical sorted inputs ----------------------
    BH = b * heads
    C = n_hashes * (t // bucket_size)
    I = bucket_size
    k1, k2, k3 = jax.random.split(ka, 3)
    sqk_t = jax.random.normal(k1, (BH, C, I, dim_head), jnp.float32)
    sv_t = jax.random.normal(k2, (BH, C, I, dim_head), jnp.float32)
    perm = jax.random.permutation(k3, t)
    st_t = jnp.tile(perm, (BH, n_hashes)).reshape(BH, C, I).astype(jnp.int32)

    bo_j, lse_j = lsh_chunk_attention_jnp(sqk_t, sv_t, st_t)
    for ct in (None, 8):   # auto tile and forced Ct=8 (cross-tile look-one-back)
        bo_p, lse_p = lsh_chunk_attention_pallas(sqk_t, sv_t, st_t, chunk_tile=ct)
        jax.block_until_ready((bo_p, lse_p))
        assert bool(jnp.allclose(bo_p.astype(jnp.float32), bo_j.astype(jnp.float32),
                                 atol=3e-2, rtol=3e-2)), f"attention mismatch Ct={ct}"
        assert bool(jnp.allclose(lse_p, lse_j, atol=2e-2, rtol=2e-2)), \
            f"lse mismatch Ct={ct}"

    # --- linear kernel check --------------------------------------------------
    x2 = x.reshape(b * t, dim)
    y_p = linear_pallas(x2, params["w_qk"])
    y_r = linear_jnp(x2, params["w_qk"])
    assert bool(jnp.allclose(y_p, y_r, atol=1e-2, rtol=1e-2)), "linear mismatch"

    # --- end-to-end forward ---------------------------------------------------
    run = functools.partial(
        lsh_self_attention_forward, params, x,
        heads=heads, dim_head=dim_head,
        bucket_size=bucket_size, n_hashes=n_hashes, rot_key=krot)

    out_auto = jax.block_until_ready(run(use_pallas=True))
    out_tiled = jax.block_until_ready(run(use_pallas=True, attn_chunk_tile=8))
    ref = jax.block_until_ready(run(use_pallas=False))

    assert out_auto.shape == (b, t, dim)
    assert out_tiled.shape == (b, t, dim)
    assert bool(jnp.all(jnp.isfinite(out_auto)))
    assert bool(jnp.all(jnp.isfinite(out_tiled)))
    # bf16 operands in projections + attention (mirrored by the jnp reference)
    assert bool(jnp.allclose(out_auto, ref, atol=2e-2, rtol=2e-2))
    assert bool(jnp.allclose(out_tiled, ref, atol=2e-2, rtol=2e-2))
    print("KERNEL_OK")
</pallas_src>

<mosaic_0001>
module attributes {stable_mosaic.version = 11 : i64} {
  func.func @_lsh_chunk_attn_kernel(%arg0: i32, %arg1: i32, %arg2: memref<1x16x8x16xbf16, #tpu.memory_space<vmem>>, %arg3: memref<1x1x8x16xbf16, #tpu.memory_space<vmem>>, %arg4: memref<1x16x8x16xbf16, #tpu.memory_space<vmem>>, %arg5: memref<1x1x8x16xbf16, #tpu.memory_space<vmem>>, %arg6: memref<1x16x1x8xi32, #tpu.memory_space<vmem>>, %arg7: memref<1x1x1x8xi32, #tpu.memory_space<vmem>>, %arg8: memref<1x16x1x128xbf16, #tpu.memory_space<vmem>>, %arg9: memref<1x1x1x128xf32, #tpu.memory_space<vmem>>) attributes {dimension_semantics = [#tpu.dimension_semantics<parallel>, #tpu.dimension_semantics<parallel>], iteration_bounds = array<i64: 8, 1>, scalar_prefetch = 0 : i64, scratch_operands = 0 : i64, tpu.core_type = #tpu.core_type<tc>, window_params = [{transform_indices = @transform_0, window_bounds = array<i64: 1, 16, 8, 16>}, {transform_indices = @transform_1, window_bounds = array<i64: 1, 1, 8, 16>}, {transform_indices = @transform_2, window_bounds = array<i64: 1, 16, 8, 16>}, {transform_indices = @transform_3, window_bounds = array<i64: 1, 1, 8, 16>}, {transform_indices = @transform_4, window_bounds = array<i64: 1, 16, 1, 8>}, {transform_indices = @transform_5, window_bounds = array<i64: 1, 1, 1, 8>}, {transform_indices = @transform_6, window_bounds = array<i64: 1, 16, 1, 128>}, {transform_indices = @transform_7, window_bounds = array<i64: 1, 1, 1, 128>}]} {
    %c0 = arith.constant 0 : index
    %c0_0 = arith.constant 0 : index
    %c0_1 = arith.constant 0 : index
    %c0_2 = arith.constant 0 : index
    %0 = vector.load %arg2[%c0, %c0_0, %c0_1, %c0_2] : memref<1x16x8x16xbf16, #tpu.memory_space<vmem>>, vector<1x16x8x16xbf16>
    %1 = vector.shape_cast %0 : vector<1x16x8x16xbf16> to vector<16x8x16xbf16>
    %c0_3 = arith.constant 0 : index
    %c0_4 = arith.constant 0 : index
    %c0_5 = arith.constant 0 : index
    %c0_6 = arith.constant 0 : index
    %2 = vector.load %arg3[%c0_3, %c0_4, %c0_5, %c0_6] : memref<1x1x8x16xbf16, #tpu.memory_space<vmem>>, vector<1x1x8x16xbf16>
    %3 = vector.shape_cast %2 : vector<1x1x8x16xbf16> to vector<8x16xbf16>
    %c0_7 = arith.constant 0 : index
    %c0_8 = arith.constant 0 : index
    %c0_9 = arith.constant 0 : index
    %c0_10 = arith.constant 0 : index
    %4 = vector.load %arg4[%c0_7, %c0_8, %c0_9, %c0_10] : memref<1x16x8x16xbf16, #tpu.memory_space<vmem>>, vector<1x16x8x16xbf16>
    %5 = vector.shape_cast %4 : vector<1x16x8x16xbf16> to vector<16x8x16xbf16>
    %c0_11 = arith.constant 0 : index
    %c0_12 = arith.constant 0 : index
    %c0_13 = arith.constant 0 : index
    %c0_14 = arith.constant 0 : index
    %6 = vector.load %arg5[%c0_11, %c0_12, %c0_13, %c0_14] : memref<1x1x8x16xbf16, #tpu.memory_space<vmem>>, vector<1x1x8x16xbf16>
    %7 = vector.shape_cast %6 : vector<1x1x8x16xbf16> to vector<8x16xbf16>
    %c0_15 = arith.constant 0 : index
    %c0_16 = arith.constant 0 : index
    %c0_17 = arith.constant 0 : index
    %c0_18 = arith.constant 0 : index
    %8 = vector.load %arg6[%c0_15, %c0_16, %c0_17, %c0_18] : memref<1x16x1x8xi32, #tpu.memory_space<vmem>>, vector<1x16x1x8xi32>
    %9 = vector.shape_cast %8 : vector<1x16x1x8xi32> to vector<16x8xi32>
    %c0_19 = arith.constant 0 : index
    %c0_20 = arith.constant 0 : index
    %c0_21 = arith.constant 0 : index
    %c0_22 = arith.constant 0 : index
    %10 = vector.load %arg7[%c0_19, %c0_20, %c0_21, %c0_22] : memref<1x1x1x8xi32, #tpu.memory_space<vmem>>, vector<1x1x1x8xi32>
    %11 = vector.shape_cast %10 : vector<1x1x1x8xi32> to vector<1x8xi32>
    %12 = arith.extf %1 : vector<16x8x16xbf16> to vector<16x8x16xf32>
    %13 = arith.mulf %12, %12 : vector<16x8x16xf32>
    %cst = arith.constant dense<0.000000e+00> : vector<16x8xf32>
    %14 = vector.multi_reduction <add>, %13, %cst [2] : vector<16x8x16xf32> to vector<16x8xf32>
    %15 = vector.shape_cast %14 : vector<16x8xf32> to vector<16x8x1xf32>
    %cst_23 = arith.constant 1.000000e-24 : f32
    %16 = vector.broadcast %cst_23 : f32 to vector<16x8x1xf32>
    %17 = arith.maximumf %15, %16 : vector<16x8x1xf32>
    %18 = math.rsqrt %17 : vector<16x8x1xf32>
    %19 = vector.broadcast %18 : vector<16x8x1xf32> to vector<16x8x16xf32>
    %20 = arith.mulf %12, %19 : vector<16x8x16xf32>
    %21 = arith.truncf %20 : vector<16x8x16xf32> to vector<16x8x16xbf16>
    %22 = arith.extf %3 : vector<8x16xbf16> to vector<8x16xf32>
    %23 = arith.mulf %22, %22 : vector<8x16xf32>
    %cst_24 = arith.constant dense<0.000000e+00> : vector<8xf32>
    %24 = vector.multi_reduction <add>, %23, %cst_24 [1] : vector<8x16xf32> to vector<8xf32>
    %25 = vector.shape_cast %24 : vector<8xf32> to vector<8x1xf32>
    %cst_25 = arith.constant 1.000000e-24 : f32
    %26 = vector.broadcast %cst_25 : f32 to vector<8x1xf32>
    %27 = arith.maximumf %25, %26 : vector<8x1xf32>
    %28 = math.rsqrt %27 : vector<8x1xf32>
    %29 = vector.broadcast %28 : vector<8x1xf32> to vector<8x16xf32>
    %30 = arith.mulf %22, %29 : vector<8x16xf32>
    %31 = arith.truncf %30 : vector<8x16xf32> to vector<8x16xbf16>
    %32 = vector.shape_cast %31 : vector<8x16xbf16> to vector<1x8x16xbf16>
    %33 = vector.extract_strided_slice %21 {offsets = [0, 0, 0], sizes = [15, 8, 16], strides = [1, 1, 1]} : vector<16x8x16xbf16> to vector<15x8x16xbf16>
    %34 = tpu.concatenate %32, %33 in 0 : vector<1x8x16xbf16>, vector<15x8x16xbf16> -> vector<16x8x16xbf16>
    %35 = vector.shape_cast %7 : vector<8x16xbf16> to vector<1x8x16xbf16>
    %36 = vector.extract_strided_slice %5 {offsets = [0, 0, 0], sizes = [15, 8, 16], strides = [1, 1, 1]} : vector<16x8x16xbf16> to vector<15x8x16xbf16>
    %37 = tpu.concatenate %35, %36 in 0 : vector<1x8x16xbf16>, vector<15x8x16xbf16> -> vector<16x8x16xbf16>
    %38 = vector.extract_strided_slice %9 {offsets = [0, 0], sizes = [15, 8], strides = [1, 1]} : vector<16x8xi32> to vector<15x8xi32>
    %39 = tpu.concatenate %11, %38 in 0 : vector<1x8xi32>, vector<15x8xi32> -> vector<16x8xi32>
    %cst_26 = arith.constant 2.500000e-01 : bf16
    %40 = vector.broadcast %cst_26 : bf16 to vector<16x8x16xbf16>
    %41 = arith.mulf %1, %40 : vector<16x8x16xbf16>
    "tpu.trace_start"() <{level = 10 : i32, message = "cie,cje->cij"}> : () -> ()
    %cst_27 = arith.constant dense<0.000000e+00> : vector<16x8x8xf32>
    %42 = tpu.matmul %41, %21, %cst_27 {dimension_numbers = #tpu.dot_dimension_numbers<[2], [2], [1], [1], [0, 0, 0, 1, 1, 1], [0], [0]>} : vector<16x8x16xbf16>, vector<16x8x16xbf16>, vector<16x8x8xf32> -> vector<16x8x8xf32>
    %cst_28 = arith.constant dense<0.000000e+00> : vector<16x8x8xf32>
    %43 = tpu.matmul %41, %34, %cst_28 {dimension_numbers = #tpu.dot_dimension_numbers<[2], [2], [1], [1], [0, 0, 0, 1, 1, 1], [0], [0]>} : vector<16x8x16xbf16>, vector<16x8x16xbf16>, vector<16x8x8xf32> -> vector<16x8x8xf32>
    "tpu.trace_stop"() : () -> ()
    %44 = vector.shape_cast %9 : vector<16x8xi32> to vector<16x8x1xi32>
    %45 = vector.shape_cast %9 : vector<16x8xi32> to vector<16x1x8xi32>
    %46 = vector.broadcast %44 : vector<16x8x1xi32> to vector<16x8x8xi32>
    %47 = vector.broadcast %45 : vector<16x1x8xi32> to vector<16x8x8xi32>
    %48 = arith.cmpi eq, %46, %47 : vector<16x8x8xi32>
    %cst_29 = arith.constant -5.000000e+04 : f32
    %49 = vector.broadcast %cst_29 : f32 to vector<16x8x8xf32>
    %50 = arith.select %48, %49, %42 : vector<16x8x8xi1>, vector<16x8x8xf32>
    %51 = vector.shape_cast %9 : vector<16x8xi32> to vector<16x8x1xi32>
    %52 = vector.shape_cast %39 : vector<16x8xi32> to vector<16x1x8xi32>
    %53 = vector.broadcast %51 : vector<16x8x1xi32> to vector<16x8x8xi32>
    %54 = vector.broadcast %52 : vector<16x1x8xi32> to vector<16x8x8xi32>
    %55 = arith.cmpi eq, %53, %54 : vector<16x8x8xi32>
    %cst_30 = arith.constant -5.000000e+04 : f32
    %56 = vector.broadcast %cst_30 : f32 to vector<16x8x8xf32>
    %57 = arith.select %55, %56, %43 : vector<16x8x8xi1>, vector<16x8x8xf32>
    %cst_31 = arith.constant dense<0xFF800000> : vector<16x8xf32>
    %58 = vector.multi_reduction <maximumf>, %50, %cst_31 [2] : vector<16x8x8xf32> to vector<16x8xf32>
    %59 = vector.shape_cast %58 : vector<16x8xf32> to vector<16x8x1xf32>
    %cst_32 = arith.constant dense<0xFF800000> : vector<16x8xf32>
    %60 = vector.multi_reduction <maximumf>, %57, %cst_32 [2] : vector<16x8x8xf32> to vector<16x8xf32>
    %61 = vector.shape_cast %60 : vector<16x8xf32> to vector<16x8x1xf32>
    %62 = arith.maximumf %59, %61 : vector<16x8x1xf32>
    %63 = vector.broadcast %62 : vector<16x8x1xf32> to vector<16x8x8xf32>
    %64 = arith.subf %50, %63 : vector<16x8x8xf32>
    %65 = math.exp %64 : vector<16x8x8xf32>
    %66 = vector.broadcast %62 : vector<16x8x1xf32> to vector<16x8x8xf32>
    %67 = arith.subf %57, %66 : vector<16x8x8xf32>
    %68 = math.exp %67 : vector<16x8x8xf32>
    %cst_33 = arith.constant dense<0.000000e+00> : vector<16x8xf32>
    %69 = vector.multi_reduction <add>, %65, %cst_33 [2] : vector<16x8x8xf32> to vector<16x8xf32>
    %70 = vector.shape_cast %69 : vector<16x8xf32> to vector<16x8x1xf32>
    %cst_34 = arith.constant dense<0.000000e+00> : vector<16x8xf32>
    %71 = vector.multi_reduction <add>, %68, %cst_34 [2] : vector<16x8x8xf32> to vector<16x8xf32>
    %72 = vector.shape_cast %71 : vector<16x8xf32> to vector<16x8x1xf32>
    %73 = arith.addf %70, %72 : vector<16x8x1xf32>
    %74 = math.log %73 : vector<16x8x1xf32>
    %75 = arith.addf %62, %74 : vector<16x8x1xf32>
    %cst_35 = arith.constant 1.000000e+00 : f32
    %76 = vector.broadcast %cst_35 : f32 to vector<16x8x1xf32>
    %77 = arith.divf %76, %73 : vector<16x8x1xf32>
    %78 = vector.broadcast %77 : vector<16x8x1xf32> to vector<16x8x8xf32>
    %79 = arith.mulf %65, %78 : vector<16x8x8xf32>
    %80 = arith.truncf %79 : vector<16x8x8xf32> to vector<16x8x8xbf16>
    %81 = vector.broadcast %77 : vector<16x8x1xf32> to vector<16x8x8xf32>
    %82 = arith.mulf %68, %81 : vector<16x8x8xf32>
    %83 = arith.truncf %82 : vector<16x8x8xf32> to vector<16x8x8xbf16>
    "tpu.trace_start"() <{level = 10 : i32, message = "cij,cje->cie"}> : () -> ()
    %cst_36 = arith.constant dense<0.000000e+00> : vector<16x8x16xf32>
    %84 = tpu.matmul %80, %5, %cst_36 {dimension_numbers = #tpu.dot_dimension_numbers<[2], [1], [1], [2], [0, 0, 0, 1, 1, 2], [0], [0]>} : vector<16x8x8xbf16>, vector<16x8x16xbf16>, vector<16x8x16xf32> -> vector<16x8x16xf32>
    %cst_37 = arith.constant dense<0.000000e+00> : vector<16x8x16xf32>
    %85 = tpu.matmul %83, %37, %cst_37 {dimension_numbers = #tpu.dot_dimension_numbers<[2], [1], [1], [2], [0, 0, 0, 1, 1, 2], [0], [0]>} : vector<16x8x8xbf16>, vector<16x8x16xbf16>, vector<16x8x16xf32> -> vector<16x8x16xf32>
    "tpu.trace_stop"() : () -> ()
    %86 = arith.addf %84, %85 : vector<16x8x16xf32>
    %87 = arith.truncf %86 : vector<16x8x16xf32> to vector<16x8x16xbf16>
    %88 = vector.extract_strided_slice %87 {offsets = [0, 0, 0], sizes = [16, 1, 16], strides = [1, 1, 1]} : vector<16x8x16xbf16> to vector<16x1x16xbf16>
    %89 = vector.extract_strided_slice %87 {offsets = [0, 1, 0], sizes = [16, 1, 16], strides = [1, 1, 1]} : vector<16x8x16xbf16> to vector<16x1x16xbf16>
    %90 = vector.extract_strided_slice %87 {offsets = [0, 2, 0], sizes = [16, 1, 16], strides = [1, 1, 1]} : vector<16x8x16xbf16> to vector<16x1x16xbf16>
    %91 = vector.extract_strided_slice %87 {offsets = [0, 3, 0], sizes = [16, 1, 16], strides = [1, 1, 1]} : vector<16x8x16xbf16> to vector<16x1x16xbf16>
    %92 = vector.extract_strided_slice %87 {offsets = [0, 4, 0], sizes = [16, 1, 16], strides = [1, 1, 1]} : vector<16x8x16xbf16> to vector<16x1x16xbf16>
    %93 = vector.extract_strided_slice %87 {offsets = [0, 5, 0], sizes = [16, 1, 16], strides = [1, 1, 1]} : vector<16x8x16xbf16> to vector<16x1x16xbf16>
    %94 = vector.extract_strided_slice %87 {offsets = [0, 6, 0], sizes = [16, 1, 16], strides = [1, 1, 1]} : vector<16x8x16xbf16> to vector<16x1x16xbf16>
    %95 = vector.extract_strided_slice %87 {offsets = [0, 7, 0], sizes = [16, 1, 16], strides = [1, 1, 1]} : vector<16x8x16xbf16> to vector<16x1x16xbf16>
    %96 = tpu.concatenate %88, %89, %90, %91, %92, %93, %94, %95 in 2 : vector<16x1x16xbf16>, vector<16x1x16xbf16>, vector<16x1x16xbf16>, vector<16x1x16xbf16>, vector<16x1x16xbf16>, vector<16x1x16xbf16>, vector<16x1x16xbf16>, vector<16x1x16xbf16> -> vector<16x1x128xbf16>
    %c0_38 = arith.constant 0 : index
    %c0_39 = arith.constant 0 : index
    %c0_40 = arith.constant 0 : index
    %c0_41 = arith.constant 0 : index
    %97 = vector.load %arg8[%c0_38, %c0_39, %c0_40, %c0_41] : memref<1x16x1x128xbf16, #tpu.memory_space<vmem>>, vector<1x16x1x128xbf16>
    %98 = vector.shape_cast %97 : vector<1x16x1x128xbf16> to vector<16x1x128xbf16>
    %99 = vector.shape_cast %96 : vector<16x1x128xbf16> to vector<1x16x1x128xbf16>
    tpu.vector_store %arg8[%c0_38, %c0_39, %c0_40, %c0_41], %99 {strides = array<i32>} : memref<1x16x1x128xbf16, #tpu.memory_space<vmem>>, vector<1x16x1x128xbf16>,
    %100 = vector.shape_cast %75 : vector<16x8x1xf32> to vector<16x8xf32>
    %101 = vector.extract_strided_slice %100 {offsets = [0, 0], sizes = [1, 8], strides = [1, 1]} : vector<16x8xf32> to vector<1x8xf32>
    %102 = vector.extract_strided_slice %100 {offsets = [1, 0], sizes = [1, 8], strides = [1, 1]} : vector<16x8xf32> to vector<1x8xf32>
    %103 = vector.extract_strided_slice %100 {offsets = [2, 0], sizes = [1, 8], strides = [1, 1]} : vector<16x8xf32> to vector<1x8xf32>
    %104 = vector.extract_strided_slice %100 {offsets = [3, 0], sizes = [1, 8], strides = [1, 1]} : vector<16x8xf32> to vector<1x8xf32>
    %105 = vector.extract_strided_slice %100 {offsets = [4, 0], sizes = [1, 8], strides = [1, 1]} : vector<16x8xf32> to vector<1x8xf32>
    %106 = vector.extract_strided_slice %100 {offsets = [5, 0], sizes = [1, 8], strides = [1, 1]} : vector<16x8xf32> to vector<1x8xf32>
    %107 = vector.extract_strided_slice %100 {offsets = [6, 0], sizes = [1, 8], strides = [1, 1]} : vector<16x8xf32> to vector<1x8xf32>
    %108 = vector.extract_strided_slice %100 {offsets = [7, 0], sizes = [1, 8], strides = [1, 1]} : vector<16x8xf32> to vector<1x8xf32>
    %109 = vector.extract_strided_slice %100 {offsets = [8, 0], sizes = [1, 8], strides = [1, 1]} : vector<16x8xf32> to vector<1x8xf32>
    %110 = vector.extract_strided_slice %100 {offsets = [9, 0], sizes = [1, 8], strides = [1, 1]} : vector<16x8xf32> to vector<1x8xf32>
    %111 = vector.extract_strided_slice %100 {offsets = [10, 0], sizes = [1, 8], strides = [1, 1]} : vector<16x8xf32> to vector<1x8xf32>
    %112 = vector.extract_strided_slice %100 {offsets = [11, 0], sizes = [1, 8], strides = [1, 1]} : vector<16x8xf32> to vector<1x8xf32>
    %113 = vector.extract_strided_slice %100 {offsets = [12, 0], sizes = [1, 8], strides = [1, 1]} : vector<16x8xf32> to vector<1x8xf32>
    %114 = vector.extract_strided_slice %100 {offsets = [13, 0], sizes = [1, 8], strides = [1, 1]} : vector<16x8xf32> to vector<1x8xf32>
    %115 = vector.extract_strided_slice %100 {offsets = [14, 0], sizes = [1, 8], strides = [1, 1]} : vector<16x8xf32> to vector<1x8xf32>
    %116 = vector.extract_strided_slice %100 {offsets = [15, 0], sizes = [1, 8], strides = [1, 1]} : vector<16x8xf32> to vector<1x8xf32>
    %117 = tpu.concatenate %101, %102, %103, %104, %105, %106, %107, %108, %109, %110, %111, %112, %113, %114, %115, %116 in 1 : vector<1x8xf32>, vector<1x8xf32>, vector<1x8xf32>, vector<1x8xf32>, vector<1x8xf32>, vector<1x8xf32>, vector<1x8xf32>, vector<1x8xf32>, vector<1x8xf32>, vector<1x8xf32>, vector<1x8xf32>, vector<1x8xf32>, vector<1x8xf32>, vector<1x8xf32>, vector<1x8xf32>, vector<1x8xf32> -> vector<1x128xf32>
    %c0_42 = arith.constant 0 : index
    %c0_43 = arith.constant 0 : index
    %c0_44 = arith.constant 0 : index
    %c0_45 = arith.constant 0 : index
    %118 = vector.load %arg9[%c0_42, %c0_43, %c0_44, %c0_45] : memref<1x1x1x128xf32, #tpu.memory_space<vmem>>, vector<1x1x1x128xf32>
    %119 = vector.shape_cast %118 : vector<1x1x1x128xf32> to vector<1x128xf32>
    %120 = vector.shape_cast %117 : vector<1x128xf32> to vector<1x1x1x128xf32>
    tpu.vector_store %arg9[%c0_42, %c0_43, %c0_44, %c0_45], %120 {strides = array<i32>} : memref<1x1x1x128xf32, #tpu.memory_space<vmem>>, vector<1x1x1x128xf32>,
    return
  }
  func.func @transform_0(%arg0: i32, %arg1: i32) -> (i32, i32, i32, i32) {
    %c0_i32 = arith.constant 0 : i32
    %c0_i32_0 = arith.constant 0 : i32
    %c0_i32_1 = arith.constant 0 : i32
    return %arg0, %arg1, %c0_i32, %c0_i32_0 : i32, i32, i32, i32
  }
  func.func @transform_1(%arg0: i32, %arg1: i32) -> (i32, i32, i32, i32) {
    %c16_i32 = arith.constant 16 : i32
    %0 = arith.muli %arg1, %c16_i32 : i32
    %c16_i32_0 = arith.constant 16 : i32
    %1 = arith.addi %0, %c16_i32_0 : i32
    %c1_i32 = arith.constant 1 : i32
    %2 = arith.subi %1, %c1_i32 : i32
    %c16_i32_1 = arith.constant 16 : i32
    %c0_i32 = arith.constant 0 : i32
    %3 = arith.cmpi eq, %c16_i32_1, %c0_i32 : i32
    %c1_i32_2 = arith.constant 1 : i32
    %4 = arith.select %3, %c1_i32_2, %c16_i32_1 : i32
    %5 = arith.remsi %2, %4 : i32
    %c0_i32_3 = arith.constant 0 : i32
    %6 = arith.cmpi ne, %5, %c0_i32_3 : i32
    %c0_i32_4 = arith.constant 0 : i32
    %7 = arith.cmpi slt, %5, %c0_i32_4 : i32
    %c0_i32_5 = arith.constant 0 : i32
    %8 = arith.cmpi slt, %4, %c0_i32_5 : i32
    %9 = arith.xori %7, %8 : i1
    %10 = arith.andi %9, %6 : i1
    %11 = arith.addi %5, %4 : i32
    %12 = arith.select %10, %11, %5 : i32
    %c0_i32_6 = arith.constant 0 : i32
    %c0_i32_7 = arith.constant 0 : i32
    %c0_i32_8 = arith.constant 0 : i32
    return %arg0, %12, %c0_i32_6, %c0_i32_7 : i32, i32, i32, i32
  }
  func.func @transform_2(%arg0: i32, %arg1: i32) -> (i32, i32, i32, i32) {
    %c0_i32 = arith.constant 0 : i32
    %c0_i32_0 = arith.constant 0 : i32
    %c0_i32_1 = arith.constant 0 : i32
    return %arg0, %arg1, %c0_i32, %c0_i32_0 : i32, i32, i32, i32
  }
  func.func @transform_3(%arg0: i32, %arg1: i32) -> (i32, i32, i32, i32) {
    %c16_i32 = arith.constant 16 : i32
    %0 = arith.muli %arg1, %c16_i32 : i32
    %c16_i32_0 = arith.constant 16 : i32
    %1 = arith.addi %0, %c16_i32_0 : i32
    %c1_i32 = arith.constant 1 : i32
    %2 = arith.subi %1, %c1_i32 : i32
    %c16_i32_1 = arith.constant 16 : i32
    %c0_i32 = arith.constant 0 : i32
    %3 = arith.cmpi eq, %c16_i32_1, %c0_i32 : i32
    %c1_i32_2 = arith.constant 1 : i32
    %4 = arith.select %3, %c1_i32_2, %c16_i32_1 : i32
    %5 = arith.remsi %2, %4 : i32
    %c0_i32_3 = arith.constant 0 : i32
    %6 = arith.cmpi ne, %5, %c0_i32_3 : i32
    %c0_i32_4 = arith.constant 0 : i32
    %7 = arith.cmpi slt, %5, %c0_i32_4 : i32
    %c0_i32_5 = arith.constant 0 : i32
    %8 = arith.cmpi slt, %4, %c0_i32_5 : i32
    %9 = arith.xori %7, %8 : i1
    %10 = arith.andi %9, %6 : i1
    %11 = arith.addi %5, %4 : i32
    %12 = arith.select %10, %11, %5 : i32
    %c0_i32_6 = arith.constant 0 : i32
    %c0_i32_7 = arith.constant 0 : i32
    %c0_i32_8 = arith.constant 0 : i32
    return %arg0, %12, %c0_i32_6, %c0_i32_7 : i32, i32, i32, i32
  }
  func.func @transform_4(%arg0: i32, %arg1: i32) -> (i32, i32, i32, i32) {
    %c0_i32 = arith.constant 0 : i32
    %c0_i32_0 = arith.constant 0 : i32
    %c0_i32_1 = arith.constant 0 : i32
    return %arg0, %arg1, %c0_i32, %c0_i32_0 : i32, i32, i32, i32
  }
  func.func @transform_5(%arg0: i32, %arg1: i32) -> (i32, i32, i32, i32) {
    %c16_i32 = arith.constant 16 : i32
    %0 = arith.muli %arg1, %c16_i32 : i32
    %c16_i32_0 = arith.constant 16 : i32
    %1 = arith.addi %0, %c16_i32_0 : i32
    %c1_i32 = arith.constant 1 : i32
    %2 = arith.subi %1, %c1_i32 : i32
    %c16_i32_1 = arith.constant 16 : i32
    %c0_i32 = arith.constant 0 : i32
    %3 = arith.cmpi eq, %c16_i32_1, %c0_i32 : i32
    %c1_i32_2 = arith.constant 1 : i32
    %4 = arith.select %3, %c1_i32_2, %c16_i32_1 : i32
    %5 = arith.remsi %2, %4 : i32
    %c0_i32_3 = arith.constant 0 : i32
    %6 = arith.cmpi ne, %5, %c0_i32_3 : i32
    %c0_i32_4 = arith.constant 0 : i32
    %7 = arith.cmpi slt, %5, %c0_i32_4 : i32
    %c0_i32_5 = arith.constant 0 : i32
    %8 = arith.cmpi slt, %4, %c0_i32_5 : i32
    %9 = arith.xori %7, %8 : i1
    %10 = arith.andi %9, %6 : i1
    %11 = arith.addi %5, %4 : i32
    %12 = arith.select %10, %11, %5 : i32
    %c0_i32_6 = arith.constant 0 : i32
    %c0_i32_7 = arith.constant 0 : i32
    %c0_i32_8 = arith.constant 0 : i32
    return %arg0, %12, %c0_i32_6, %c0_i32_7 : i32, i32, i32, i32
  }
  func.func @transform_6(%arg0: i32, %arg1: i32) -> (i32, i32, i32, i32) {
    %c0_i32 = arith.constant 0 : i32
    %c0_i32_0 = arith.constant 0 : i32
    %c0_i32_1 = arith.constant 0 : i32
    return %arg0, %arg1, %c0_i32, %c0_i32_0 : i32, i32, i32, i32
  }
  func.func @transform_7(%arg0: i32, %arg1: i32) -> (i32, i32, i32, i32) {
    %c0_i32 = arith.constant 0 : i32
    %c0_i32_0 = arith.constant 0 : i32
    %c0_i32_1 = arith.constant 0 : i32
    return %arg0, %arg1, %c0_i32, %c0_i32_0 : i32, i32, i32, i32
  }
}

</mosaic_0001>

<bundles_post_ra>
// kernel: tpu_custom_call.1
= control target key start
LH: loop header
LB: loop body
LE: loop exit
PB: predicated region body
PF: predicated region fallthrough
CT: control target
= control target key end

     0   :  { %s9175_s0 = inlined_call_operand.hbm [shape: bf16[8,16,8,16], index: 0, kind: input, shape index: {}]   ;;  %s9176_s1 = inlined_call_operand.hbm [shape: bf16[8,16,8,16], index: 1, kind: input, shape index: {}]   ;;  %s9177_s2 = inlined_call_operand.hbm [shape: bf16[8,16,8,16], index: 2, kind: input, shape index: {}]   ;;  %s9178_s3 = inlined_call_operand.hbm [shape: bf16[8,16,8,16], index: 3, kind: input, shape index: {}]   ;;  %s9179_s4 = inlined_call_operand.vmem [shape: s32[8,16,1,8], index: 4, kind: input, shape index: {}]   ;;  %s9180_s5 = inlined_call_operand.vmem [shape: s32[8,16,1,8], index: 5, kind: input, shape index: {}]   ;;  %s9181_s6 = inlined_call_operand.vmem [shape: bf16[8,16,1,128], index: 6, kind: output, shape index: {0}]   ;;  %s9182_s7 = inlined_call_operand.hbm [shape: f32[8,1,1,128], index: 7, kind: output, shape index: {1}]  }
   0x1   :  { %9243 = sst [smem:[#allocation59_spill]] %s9175_s0 }
   0x2   :  { %9244 = sst [smem:[#allocation60_spill]] %s9176_s1 }
   0x3   :  { %13 = vsyncpa [#allocation3], 0 }
   0x4   :  { %15 = vsyncpa [#allocation3 + $0x1], 0 }
   0x5   :  { %16 = vsyncpa [#allocation6], 0 }
   0x6   :  { %18 = vsyncpa [#allocation6 + $0x1], 0 }
   0x7   :  { %19 = vsyncpa [#allocation9], 0 }
   0x8   :  { %21 = vsyncpa [#allocation9 + $0x1], 0 }
   0x9   :  { %22 = vsyncpa [#allocation4], 0 }
   0xa   :  { %24 = vsyncpa [#allocation4 + $0x1], 0  ;;  %s6861_s24 = smov 0   ;;  %s6863_s25 = smov 0  }
   0xb   :  { %s6865_s26 = smov 0   ;;  %s6867_s27 = smov 0  }
   0xc   :  { %s6869_s28 = smov 0   ;;  %s6871_s29 = smov 0  }
   0xd LB: > { %9245 = sst [smem:[#allocation15_spill]] %s6782_s24  ;;  %s6892_s30 = sadd.s32 4294967295, %s6802_s29   ;;  %s6802_s29 = sphi %s6871_s29, %s30_s29   ;;  %s6798_s28 = sphi %s6869_s28, %s9392_s28   ;;  %s6794_s27 = sphi %s6867_s27, %s9388_s27   ;;  %s6790_s26 = sphi %s6865_s26, %s9387_s26   ;;  %s6786_s25 = sphi %s6863_s25, %s9391_s25   ;;  %s6782_s24 = sphi %s6861_s24, %s9390_s24  }
   0xe   : > { %9246 = sst [smem:[#allocation16_spill]] %s6790_s26  ;;  %s5738_s8 = sadd.s32 4294967294, %s6802_s29  }
   0xf   : > { %9247 = sst [smem:[#allocation17_spill]] %s6798_s28  ;;  %s42_s9 = sadd.s32 1, %s6798_s28 }
  0x10   : > { %9248 = sst [smem:[#allocation18_spill]] %s6802_s29  ;;  %s51_s10 = sadd.s32 1, %s6790_s26 }
  0x11   : > { %p44_p0 = scmp.ge.s32.totalorder %s42_s9, 8  ;;  %p58_p1 = scmp.ne.s32.totalorder %s6790_s26, %s6786_s25 }
  0x12   : > { %p59_p2 = scmp.eq.s32.totalorder %s6802_s29, 0  ;;  %p64_p3 = scmp.ne.s32.totalorder %s6786_s25, %s6782_s24 }
  0x13   : > { %s9394_s9 = smov (%p44_p0, %s42_s9), 0  ;;  %p65_p5 = scmp.eq.s32.totalorder %s6892_s30, 0 }
  0x14   : > { %9249 = sst [smem:[#allocation19_spill]] %s9394_s9  ;;  %p6904_p4 = por %p59_p2, %p58_p1 }
  0x15   : > { %s46_s12 = ssub.s32 %s6798_s28, %s9394_s9  ;;  %p342_p6 = scmp.eq.s32.totalorder %s6892_s30, 7 }
  0x16   : > { %p49_p7 = scmp.eq.s32.totalorder %s46_s12, 0  ;;  %p6912_p8 = por %p65_p5, %p64_p3 }
  0x17   : > { %p6916_p9 = por %p342_p6, %p58_p1  ;;  %p348_p10 = scmp.eq.s32.totalorder %s5738_s8, 7 }
  0x18   : > { %s6921_s15 = scalar_select %p49_p7, %s6790_s26, %s51_s10  }
  0x19   : > { %p6923_p11 = por %p348_p10, %p64_p3  ;;  %p6377_p12 = scmp.lt.s32.totalorder %s6802_s29, 8 }
  0x1a   : > { %9253 = sst [smem:[#allocation20_spill]] %s6921_s15  ;;  %s6929_s17 = sand.u32 1, %s6790_s26  }
  0x1b   : > { %s9254_s16 = scalar_select %p6923_p11, 1, 0 }
  0x1c   : > { %s6932_s18 = sshll.u32 %s6798_s28, 10  ;;  %s391_s19 = sand.u32 1, %s6802_s29  }
  0x1d   : > { %9255 = sst [smem:[#allocation21_spill]] %s9254_s16  ;;  %p6937_p13 = pnand %p6377_p12, %p6904_p4 }
  0x1e   : > { %s9187_s21 = sshll.u32 %s6929_s17, 2  ;;  %s9188_s22 = sadd.s32 960, %s6932_s18 }
  0x1f   : > { %s9257_s1 = sld [smem:[#allocation60_spill]]  ;;  %s395_s12 = scalar_lea.vmem [#allocation5], %s9187_s21 }
  0x20   : > { %s418_s9 = sshll.u32 %s395_s12, 4  ;;  %s6954_s26 = scalar_lea.sflag [#allocation6], %s391_s19  ;;  %s419_s9 = int_to_ptr.vmem [resolvable:$true] %s418_s9 }
  0x21   : > { %p6604_p0 = pneg %p6937_p13  ;;  %s6615_s16 = scalar_lea.vmem %s419_s9, 64 }
  0x22   : > { %p6616_p1 = scmp.ne.s32.totalorder %s419_s9, %s6615_s16  ;;  %s6804_s23 = smov [#allocation5]  }
  0x23   : > { %s6620_s8 = sshll.u32 %s6804_s23, 4  ;;  %s6621_s8 = int_to_ptr.vmem [resolvable:$false] %s6620_s8 }
  0x24   : > { %p6618_p2 = pnand %p6616_p1, %p6604_p0  ;;  %s6622_s21 = scalar_lea.vmem %s6621_s8, 128 }
  0x25   : > { %s416_s10 = scalar_lea.hbm %s9257_s1, %s9188_s22  ;;  %p6623_p4 = scmp.lt.s32.totalorder %s419_s9, %s6621_s8 }
  0x26   : > { %p6619_p3 = pneg %p6618_p2  ;;  %p6624_p5 = scmp.lt.s32.totalorder %s6622_s21, %s6615_s16 }
  0x28   : > { %p6625_p6 = por %p6624_p5, %p6623_p4 }
  0x2a   : > { %p6626_p7 = pnand %p6625_p6, %p6619_p3 }
  0x2c   : > { %6629 = shalt.err (!%p6626_p7)
}
  0x2d   : > { %6366 = dma.hbm_to_vmem [thread:$0]  (!%p6937_p13), %s416_s10, 64, %s419_s9, %s6954_s26  }
  0x2e   : > { %p5753_p10 = scmp.ge.s32.totalorder %s6802_s29, 1  ;;  %p530_p12 = scmp.lt.s32.totalorder %s6802_s29, 9 }
  0x2f   : > { %s5741_s15 = sshll.u32 %s6929_s17, 6  ;;  %s9259_s0 = sld [smem:[#allocation59_spill]] }
  0x30   : > { %p6966_p1 = pnand %p5753_p10, %p530_p12  ;;  %s372_s12 = scalar_lea.vmem [#allocation2], %s5741_s15 }
  0x31   : > { %s381_s23 = sshll.u32 %s372_s12, 4  ;;  %s369_s8 = scalar_lea.sflag [#allocation3], %s6929_s17  ;;  %s382_s23 = int_to_ptr.vmem [resolvable:$true] %s381_s23 }
  0x32   : > { %s6643_s22 = scalar_lea.vmem %s382_s23, 1024  ;;  %s6805_s9 = smov [#allocation2]  }
  0x33   : > { %p6644_p2 = scmp.ne.s32.totalorder %s382_s23, %s6643_s22  ;;  %s6648_s10 = sshll.u32 %s6805_s9, 4  ;;  %s6649_s10 = int_to_ptr.vmem [resolvable:$false] %s6648_s10 }
  0x34   : > { %s6650_s11 = scalar_lea.vmem %s6649_s10, 2048  ;;  %p6651_p5 = scmp.lt.s32.totalorder %s382_s23, %s6649_s10 }
  0x35   : > { %s380_s21 = scalar_lea.hbm %s9259_s0, %s6932_s18  ;;  %p6646_p3 = pnand %p6644_p2, %p6604_p0 }
  0x36   : > { %p6652_p6 = scmp.lt.s32.totalorder %s6650_s11, %s6643_s22 }
  0x37   : > { %p6647_p4 = pneg %p6646_p3 }
  0x38   : > { %p6653_p7 = por %p6652_p6, %p6651_p5 }
  0x3a   : > { %p6654_p10 = pnand %p6653_p7, %p6647_p4 }
  0x3c   : > { %6657 = shalt.err (!%p6654_p10)
}
  0x3d   : > { %s6806_s16 = smov 64   ;;  %s6807_s19 = smov 4  }
  0x3e   : > { %6363 = dma.hbm_to_vmem [thread:$0]  (!%p6937_p13), %s380_s21, 1024, %s382_s23, %s369_s8, %s6806_s16, %s6806_s16, %s6807_s19  }
  0x3f   : > { %s429_s12 = scalar_lea.vmem [#allocation7], %s5741_s15  ;;  %s6808_s9 = smov [#allocation7]  }
  0x40   : > { %s438_s0 = sshll.u32 %s429_s12, 4  ;;  %s6676_s22 = sshll.u32 %s6808_s9, 4  ;;  %s439_s0 = int_to_ptr.vmem [resolvable:$true] %s438_s0  ;;  %s6677_s22 = int_to_ptr.vmem [resolvable:$false] %s6676_s22 }
  0x41   : > { %s6671_s1 = scalar_lea.vmem %s439_s0, 1024  ;;  %s6678_s11 = scalar_lea.vmem %s6677_s22, 2048 }
  0x42   : > { %p6672_p12 = scmp.ne.s32.totalorder %s439_s0, %s6671_s1  ;;  %p6679_p4 = scmp.lt.s32.totalorder %s439_s0, %s6677_s22 }
  0x43   : > { %p6680_p5 = scmp.lt.s32.totalorder %s6678_s11, %s6671_s1 }
  0x44   : > { %p6674_p2 = pnand %p6672_p12, %p6604_p0 }
  0x45   : > { %p6681_p6 = por %p6680_p5, %p6679_p4 }
  0x46   : > { %p6675_p3 = pneg %p6674_p2 }
  0x48   : > { %p6682_p7 = pnand %p6681_p6, %p6675_p3 }
  0x4a   : > { %6685 = shalt.err (!%p6682_p7)
}
  0x4b   : > { %s9260_s23 = scalar_lea.hbm %s9177_s2, %s6932_s18  ;;  %s9261_s8 = sadd.s32 960, %s6932_s18 }
  0x4c   : > { %6369 = dma.hbm_to_vmem [thread:$0]  (!%p6937_p13), %s9260_s23, 1024, %s439_s0, %s6954_s26, %s6806_s16, %s6806_s16, %s6807_s19  }
  0x4d   : > { %s473_s1 = scalar_lea.hbm %s9178_s3, %s9261_s8  ;;  %s9262_s9 = sshll.u32 %s6929_s17, 2 }
  0x4e   : > { %s452_s22 = scalar_lea.vmem [#allocation8], %s9262_s9  ;;  %s449_s24 = scalar_lea.sflag [#allocation9], %s6929_s17 }
  0x4f   : > { %s475_s11 = sshll.u32 %s452_s22, 4  ;;  %s6809_s15 = smov [#allocation8]   ;;  %s476_s11 = int_to_ptr.vmem [resolvable:$true] %s475_s11 }
  0x50   : > { %s6699_s29 = scalar_lea.vmem %s476_s11, 64  ;;  %s6704_s21 = sshll.u32 %s6809_s15, 4  ;;  %s6705_s21 = int_to_ptr.vmem [resolvable:$false] %s6704_s21 }
  0x51   : > { %p6700_p10 = scmp.ne.s32.totalorder %s476_s11, %s6699_s29  ;;  %s6706_s0 = scalar_lea.vmem %s6705_s21, 128 }
  0x52   : > { %p6707_p3 = scmp.lt.s32.totalorder %s476_s11, %s6705_s21  ;;  %p6708_p4 = scmp.lt.s32.totalorder %s6706_s0, %s6699_s29 }
  0x53   : > { %p6702_p12 = pnand %p6700_p10, %p6604_p0 }
  0x54   : > { %p6709_p5 = por %p6708_p4, %p6707_p3 }
  0x55   : > { %p6703_p2 = pneg %p6702_p12 }
  0x57   : > { %p6710_p6 = pnand %p6709_p5, %p6703_p2 }
  0x59   : > { %6713 = shalt.err (!%p6710_p6)
}
  0x5a   : > { %6372 = dma.hbm_to_vmem [thread:$0]  (!%p6937_p13), %s473_s1, 64, %s476_s11, %s449_s24  }
  0x5b   : > { %534 = sbr.rel (%p6966_p1) target bundleno = 1476 (0x5c4), region = 44 }
  0x60   : > { %s7008_s26 = sand.u32 1, %s6786_s25  }
  0x61   : > { %s5754_s17 = sshll.u32 %s7008_s26, 6  ;;  %s537_s18 = scalar_lea.sflag [#allocation3], %s7008_s26 }
  0x62   : > { %s7012_s16 = scalar_lea.vmem [#allocation2], %s5754_s17 }
  0x63   : > { %6765 = dma.done.wait (%p6912_p8), %s537_s18, 1024  }
  0x64   : > { %6767 = vsyncadd (%p6912_p8), %s537_s18, 4294966272  ;;  %s545_s24 = sand.u32 1, %s6892_s30   ;;  %s5755_s29 = sshll.u32 %s7008_s26, 2 }
  0x65   : > { %s546_s20 = scalar_lea.sflag [#allocation6], %s545_s24  ;;  %s7020_s28 = scalar_lea.vmem [#allocation5], %s5755_s29 }
  0x66   : > { %6769 = dma.done.wait (%p6912_p8), %s546_s20, 1088  }
  0x67   : > { %6771 = vsyncadd (%p6912_p8), %s546_s20, 4294966208  ;;  %s7026_s19 = scalar_lea.vmem [#allocation7], %s5754_s17  ;;  %s564_s23 = scalar_lea.sflag [#allocation9], %s7008_s26 }
  0x68   : > { %s7029_s8 = scalar_lea.vmem [#allocation8], %s5755_s29 }
  0x69   : > { %6773 = dma.done.wait (%p6912_p8), %s564_s23, 64  }
  0x6a   : > { %6775 = vsyncadd (%p6912_p8), %s564_s23, 4294967232  ;;  %v7036_v0 = vld [vmem:[%s7012_s16] sm:$0xf]  ;;  %v7039_v1 = vld [vmem:[%s7012_s16 + $0x4] sm:$0xf]  ;;  %vm817_vm0 = vcmask 130048  }
  0x6b   : > { %v7042_v2 = vld [vmem:[%s7012_s16 + $0x8] sm:$0xf]  ;;  %v7045_v3 = vunpack.c.l.bf16 %v7036_v0  ;;  %v7048_v4 = vunpack.c.l.bf16 %v7039_v1  ;;  %v7051_v5 = vld [vmem:[%s7012_s16 + $0xc] sm:$0xf]  ;;  %v7060_v8 = vld [vmem:[%s7012_s16 + $0x10] sm:$0xf] }
  0x6c   : > { %v7054_v6 = vunpack.c.l.bf16 %v7042_v2  ;;  %v7057_v7 = vunpack.c.l.bf16 %v7051_v5  ;;  %v7067_v11 = vunpack.c.l.bf16 %v7060_v8  ;;  %v7070_v12 = vld [vmem:[%s7012_s16 + $0x14] sm:$0xf]  ;;  %v7080_v16 = vld [vmem:[%s7012_s16 + $0x18] sm:$0xf]  ;;  %v7084_v18 = vld [vmem:[%s7012_s16 + $0x1c] sm:$0xf] }
  0x6d   : > { %v801_v9 = vmul.f32 %v7045_v3, %v7045_v3  ;;  %v802_v10 = vmul.f32 %v7048_v4, %v7048_v4  ;;  %v7077_v15 = vunpack.c.l.bf16 %v7070_v12  ;;  %v7091_v22 = vunpack.c.l.bf16 %v7080_v16  ;;  %v7100_v26 = vld [vmem:[%s7012_s16 + $0x20] sm:$0xf]  ;;  %v7103_v27 = vld [vmem:[%s7012_s16 + $0x24] sm:$0xf]  ;;  %v7118_v34 = vld [vmem:[%s7012_s16 + $0x28] sm:$0xf] }
  0x6e   : > { %v803_v13 = vmul.f32 %v7054_v6, %v7054_v6  ;;  %v804_v14 = vmul.f32 %v7057_v7, %v7057_v7  ;;  %v805_v21 = vmul.f32 %v7067_v11, %v7067_v11  ;;  %v7097_v25 = vunpack.c.l.bf16 %v7084_v18  ;;  %v7121_v35 = vld [vmem:[%s7012_s16 + $0x2c] sm:$0xf]  ;;  %v7136_v42 = vld [vmem:[%s7012_s16 + $0x30] sm:$0xf]  ;;  %v7139_v43 = vld [vmem:[%s7012_s16 + $0x34] sm:$0xf] }
  0x6f   : > { %v818_v17 = vsel %vm817_vm0, %v801_v9, 0.0  ;;  %v821_v20 = vsel %vm817_vm0, %v802_v10, 0.0  ;;  %v806_v24 = vmul.f32 %v7077_v15, %v7077_v15  ;;  %v807_v29 = vmul.f32 %v7091_v22, %v7091_v22  ;;  %v7154_v50 = vld [vmem:[%s7012_s16 + $0x38] sm:$0xf]  ;;  %v7157_v51 = vld [vmem:[%s7012_s16 + $0x3c] sm:$0xf] }
  0x70   : > { %819 = vadd.xlane.f32.xlu0 %v818_v17  ;;  %v824_v19 = vsel %vm817_vm0, %v803_v13, 0.0  ;;  %v827_v23 = vsel %vm817_vm0, %v804_v14, 0.0  ;;  %v830_v28 = vsel %vm817_vm0, %v805_v21, 0.0  ;;  %v7109_v30 = vunpack.c.l.bf16 %v7100_v26  ;;  %v750_v58 = vld [vmem:[%s7020_s28] sm:$0xf]  ;;  %p680_p8 = scmp.lt.s32.totalorder %s6794_s27, 7 }
  0x71   : > { %825 = vadd.xlane.f32.xlu1 %v824_v19  ;;  %v833_v31 = vsel %vm817_vm0, %v806_v24, 0.0  ;;  %v808_v32 = vmul.f32 %v7097_v25, %v7097_v25  ;;  %v7115_v33 = vunpack.c.l.bf16 %v7103_v27  ;;  %v836_v36 = vsel %vm817_vm0, %v807_v29, 0.0  ;;  %s648_s21 = scalar_lea.vmem [#allocation10], %s7008_s26  ;;  %s6813_s0 = smov 16  }
  0x72   : > { %v809_v37 = vmul.f32 %v7109_v30, %v7109_v30  ;;  %v7127_v38 = vunpack.c.l.bf16 %v7118_v34  ;;  %v7133_v41 = vunpack.c.l.bf16 %v7121_v35  ;;  %v7145_v46 = vunpack.c.l.bf16 %v7136_v42  ;;  %s681_s30 = scalar_select %p680_p8, %s6794_s27, 7 }
  0x73   : > { %v839_v39 = vsel %vm817_vm0, %v808_v32, 0.0  ;;  %v810_v40 = vmul.f32 %v7115_v33, %v7115_v33  ;;  %v7151_v49 = vunpack.c.l.bf16 %v7139_v43  ;;  %v7163_v54 = vunpack.c.l.bf16 %v7154_v50  ;;  %s6814_s17 = smov 32   ;;  %s6815_s18 = smov 64  }
  0x74   : > { %822 = vadd.xlane.f32.xlu0 %v821_v20  ;;  %v842_v44 = vsel %vm817_vm0, %v809_v37, 0.0  ;;  %v811_v45 = vmul.f32 %v7127_v38, %v7127_v38  ;;  %v812_v48 = vmul.f32 %v7133_v41, %v7133_v41  ;;  %v813_v53 = vmul.f32 %v7145_v46, %v7145_v46  ;;  %s7196_s13 = sshll.u32 %s681_s30, 4  ;;  %s6816_s16 = smov 96  }
  0x75   : > { %828 = vadd.xlane.f32.xlu1 %v827_v23  ;;  %v845_v47 = vsel %vm817_vm0, %v810_v40, 0.0  ;;  %v814_v56 = vmul.f32 %v7151_v49, %v7151_v49  ;;  %v7169_v57 = vunpack.c.l.bf16 %v7157_v51  ;;  %v815_v60 = vmul.f32 %v7163_v54, %v7163_v54  ;;  %s7202_s1 = scalar_lea.vmem %s9179_s4, %s7196_s13  ;;  %s707_s9 = sadd.s32 15, %s7196_s13 }
  0x76   : > { %v848_v52 = vsel %vm817_vm0, %v811_v45, 0.0  ;;  %v851_v55 = vsel %vm817_vm0, %v812_v48, 0.0  ;;  %v854_v59 = vsel %vm817_vm0, %v813_v53, 0.0  ;;  %v7175_v61 = vunpack.c.l.bf16 %v750_v58  ;;  %v768_v23 = vld [vmem:[%s7202_s1] sm:$0x1]  ;;  %s708_s15 = scalar_lea.vmem %s9180_s5, %s707_s9  ;;  %s6817_s24 = smov 48  }
  0x77   : > { %v857_v62 = vsel %vm817_vm0, %v814_v56, 0.0  ;;  %v816_v63 = vmul.f32 %v7169_v57, %v7169_v57  ;;  %v9193_v9 = vmov 0.0   ;;  %v860_v10 = vsel %vm817_vm0, %v815_v60, 0.0  ;;  %v770_v37 = vld [vmem:[%s7202_s1 + $0x2] sm:$0x1]  ;;  %s6818_s29 = smov 80   ;;  %s8830_s23 = scalar_lea.vmem %s9181_s6, %s7196_s13 }
  0x78   : > { %831 = vadd.xlane.f32.xlu0 %v830_v28  ;;  %5966 = vmatprep.subr.bf16.mxu0 %v9193_v9  ;;  %v931_v13 = vmul.f32 %v7175_v61, %v7175_v61  ;;  %vm6811_vm1 = vmmov 0   ;;  %v9192_v19 = vlaneseq  ;;  %v6812_v28 = vmov 1966171168   ;;  %v771_v48 = vld [vmem:[%s7202_s1 + $0x3] sm:$0x1]  ;;  %s6819_s20 = smov 112  }
  0x79   : > { %834 = vadd.xlane.f32.xlu1 %v833_v31  ;;  %5972 = vmatprep.subr.bf16.mxu1 %v9193_v9  ;;  %v863_v14 = vsel %vm817_vm0, %v816_v63, 0.0  ;;  %v944_v29 = vunpack.c.l.s4 %v6812_v28  ;;  %v939_v32 = vcombine.low %v768_v23, %v768_v23  ;;  %v772_v56 = vld [vmem:[%s7202_s1 + $0x4] sm:$0x1]  ;;  %v774_v60 = vld [vmem:[%s7202_s1 + $0x6] sm:$0x1]  ;;  %vm2772_vm3 = vcmask 64512  }
  0x7a   : > { %v932_v17 = vsel %vm817_vm0, %v931_v13, 0.0  ;;  %5968 = vmatprep.mubr.msk.bf16.mxu0 %vm6811_vm1, %v9193_v9  ;;  %5974 = vmatprep.mubr.msk.bf16.mxu1 %vm6811_vm1, %v9193_v9  ;;  %v7194_v20 = vshrl.u32 %v9192_v19, 7  ;;  %vm1037_vm6 = vcmask 1040384   ;;  %s5524_s30 = sshll.u32 %s648_s21, 4  ;;  %s6820_s9 = smov [#allocation10]   ;;  %s5525_s30 = int_to_ptr.vmem [resolvable:$true] %s5524_s30 }
  0x7b   : > { %v945_v31 = vunpack.c.0.s8 %v944_v29  ;;  %s6718_s22 = sshll.u32 %s6820_s9, 4  ;;  %s6719_s22 = int_to_ptr.vmem [resolvable:$false] %s6718_s22 }
  0x7c   : > { %837 = vadd.xlane.f32.xlu0 %v836_v36  ;;  %9263 = vst [vmem:[#allocation22_spill] sm:$0xff] %v7194_v20  ;;  %v7205_v21 = vsub.s32 0, %v7194_v20  ;;  %s6720_s11 = scalar_lea.vmem %s6719_s22, 32  ;;  %p6721_p7 = scmp.lt.s32.totalorder %s5525_s30, %s6719_s22 }
  0x7d   : > { %840 = vadd.xlane.f32.xlu1 %v839_v39  ;;  %v7213_v36 = vsub.s32 %v945_v31, %v7194_v20  ;;  %v769_v39 = vld [vmem:[%s7202_s1 + $0x1] sm:$0x1] }
  0x7e   : > { %v7209_v24 = vrot.slane %v768_v23, %v7205_v21  ;;  %v7218_v40 = vrot.slane %v770_v37, %v7205_v21  ;;  %v7229_v53 = vrot.slane %v771_v48, %v7205_v21  ;;  %v7234_v58 = vrot.slane %v772_v56, %v7205_v21 }
  0x7f   : > { %v949_v45 = vrot.slane %v939_v32, %v7213_v36 }
  0x80   : > { %843 = vadd.xlane.f32.xlu0 %v842_v44  ;;  %v7221_v44 = vrot.slane %v769_v39, %v7205_v21 }
  0x81   : > { %846 = vadd.xlane.f32.xlu1 %v845_v47  ;;  %v940_v47 = vcombine.low %v769_v39, %v770_v37 }
  0x84   : > { %849 = vadd.xlane.f32.xlu0 %v848_v52  ;;  %v956_v52 = vrot.slane %v940_v47, %v7213_v36 }
  0x85   : > { %852 = vadd.xlane.f32.xlu1 %v851_v55 }
  0x86   : > { %v971_v55 = vcombine.low %v949_v45, %v956_v52  ;;  %v776_v52 = vld [vmem:[%s7202_s1 + $0x8] sm:$0x1] }
  0x88   : > { %855 = vadd.xlane.f32.xlu0 %v854_v59  ;;  %v941_v59 = vcombine.low %v771_v48, %v772_v56  ;;  %v7250_v47 = vrot.slane %v971_v55, %v7213_v36  ;;  %v775_v56 = vld [vmem:[%s7202_s1 + $0x7] sm:$0x1] }
  0x89   : > { %858 = vadd.xlane.f32.xlu1 %v857_v62  ;;  %v773_v62 = vld [vmem:[%s7202_s1 + $0x5] sm:$0x1] }
  0x8a   : > { %v7243_v13 = vrot.slane %v773_v62, %v7205_v21  ;;  %v963_v28 = vrot.slane %v941_v59, %v7213_v36  ;;  %v942_v29 = vcombine.low %v773_v62, %v774_v60  ;;  %v7258_v62 = vrot.slane %v776_v52, %v7205_v21 }
  0x8c   : > { %861 = vadd.xlane.f32.xlu0 %v860_v10  ;;  %v7240_v10 = vrot.slane %v774_v60, %v7205_v21  ;;  %v970_v32 = vrot.slane %v942_v29, %v7213_v36 }
  0x8d   : > { %864 = vadd.xlane.f32.xlu1 %v863_v14 }
  0x8e   : > { %v972_v48 = vcombine.low %v963_v28, %v970_v32  ;;  %v778_v32 = vld [vmem:[%s7202_s1 + $0xa] sm:$0x1] }
  0x90   : > { %933 = vadd.xlane.f32.xlu0 %v932_v17  ;;  %v7255_v60 = vrot.slane %v972_v48, %v7213_v36  ;;  %v7270_v48 = vrot.slane %v778_v32, %v7205_v21 }
  0x92   : > { %9264 = vst [vmem:[#allocation23_spill] sm:$0xff] %v7270_v48 }
  0x9e   : > { %2439 = vbcast.lane.b32.xlu1 %v7209_v24, 256 }
  0xa2   : > { %2453 = vbcast.lane.b32.xlu1 %v7218_v40, 256 }
  0xa6   : > { %2446 = vbcast.lane.b32.xlu0 %v7221_v44, 256  ;;  %2460 = vbcast.lane.b32.xlu1 %v7229_v53, 256 }
  0xaa   : > { %2467 = vbcast.lane.b32.xlu1 %v7234_v58, 256  ;;  %2474 = vbcast.lane.b32.xlu0 %v7243_v13, 256 }
  0xae   : > { %2481 = vbcast.lane.b32.xlu1 %v7240_v10, 256 }
  0xb2   : > { %2495 = vbcast.lane.b32.xlu1 %v7258_v62, 256 }
  0xb6   : > { %2509 = vbcast.lane.b32.xlu1 %v7270_v48, 256 }
  0xf9   : > { %v820_v63 = vpop.xlane.xlu0 %819 }
  0xfa   : > { %v866_v14 = vmax.f32 %v820_v63, 1e-24  ;;  %v826_v17 = vpop.xlane.xlu1 %825  ;;  %v7261_v63 = vrot.slane %v775_v56, %v7205_v21 }
  0xfb   : > { %v868_v23 = vmax.f32 %v826_v17, 1e-24 }
  0xfc   : > { %6440 = vrsqrt.f32 %v866_v14  ;;  %2488 = vbcast.lane.b32.xlu0 %v7261_v63, 256 }
  0xfd   : > { %v823_v31 = vpop.xlane.xlu0 %822  ;;  %6442 = vrsqrt.f32 %v868_v23  ;;  %v988_v23 = vcombine.low %v775_v56, %v776_v52 }
  0xfe   : > { %v867_v37 = vmax.f32 %v823_v31, 1e-24  ;;  %v829_v39 = vpop.xlane.xlu1 %828 }
  0xff   : > { %v869_v45 = vmax.f32 %v829_v39, 1e-24  ;;  %v7277_v56 = vrot.slane %v988_v23, %v7213_v36 }
 0x100   : > { %6444 = vrsqrt.f32 %v867_v37  ;;  %v777_v37 = vld [vmem:[%s7202_s1 + $0x9] sm:$0x1] }
 0x101   : > { %6446 = vrsqrt.f32 %v869_v45  ;;  %v832_v59 = vpop.xlane.xlu0 %831 }
 0x102   : > { %v870_v14 = vmax.f32 %v832_v59, 1e-24  ;;  %v835_v55 = vpop.xlane.xlu1 %834  ;;  %v7273_v59 = vrot.slane %v777_v37, %v7205_v21 }
 0x103   : > { %v871_v28 = vmax.f32 %v835_v55, 1e-24 }
 0x104   : > { %6448 = vrsqrt.f32 %v870_v14  ;;  %9265 = vst [vmem:[#allocation24_spill] sm:$0xff] %v7273_v59  ;;  %v989_v14 = vcombine.low %v777_v37, %v778_v32  ;;  %2502 = vbcast.lane.b32.xlu0 %v7273_v59, 256  ;;  %v9266_v37 = vmov 0.0  }
 0x105   : > { %v838_v29 = vpop.xlane.xlu0 %837  ;;  %6450 = vrsqrt.f32 %v871_v28 }
 0x106   : > { %v872_v31 = vmax.f32 %v838_v29, 1e-24  ;;  %v841_v45 = vpop.xlane.xlu1 %840  ;;  %v7283_v20 = vrot.slane %v989_v14, %v7213_v36  ;;  %v780_v14 = vld [vmem:[%s7202_s1 + $0xc] sm:$0x1] }
 0x107   : > { %v873_v28 = vmax.f32 %v841_v45, 1e-24 }
 0x108   : > { %6452 = vrsqrt.f32 %v872_v31 }
 0x109   : > { %v6441_v39 = vpop.eup %6440  ;;  %v844_v17 = vpop.xlane.xlu0 %843  ;;  %6454 = vrsqrt.f32 %v873_v28  ;;  %v782_v28 = vld [vmem:[%s7202_s1 + $0xe] sm:$0x1] }
 0x10a   : > { %v6443_v19 = vpop.eup %6442  ;;  %v898_v52 = vmul.f32 %v6441_v39, %v7045_v3  ;;  %v874_v31 = vmax.f32 %v844_v17, 1e-24 }
 0x10b   : > { %v900_v29 = vmul.f32 %v6443_v19, %v7054_v6 }
 0x10c   : > { %v914_v55 = vpack.c.bf16 %v898_v52, %v898_v52  ;;  %v847_v52 = vpop.xlane.xlu1 %846  ;;  %6456 = vrsqrt.f32 %v874_v31 }
 0x10d   : > { %v6445_v9 = vpop.eup %6444  ;;  %v916_v39 = vpack.c.bf16 %v900_v29, %v900_v29  ;;  %v875_v29 = vmax.f32 %v847_v52, 1e-24  ;;  %v850_v31 = vpop.xlane.xlu0 %849 }
 0x10e   : > { %v6447_v3 = vpop.eup %6446  ;;  %v7286_v23 = vsel %vm817_vm0, %v914_v55, 0  ;;  %v899_v32 = vmul.f32 %v6445_v9, %v7048_v4  ;;  %v779_v55 = vld [vmem:[%s7202_s1 + $0xb] sm:$0x1]  ;;  %v7297_v4 = vrot.slane %v780_v14, %v7205_v21 }
 0x10f   : > { %5967 = vmatpush3.bf16.xpose.msra.mxu0 %v7286_v23  ;;  %v901_v45 = vmul.f32 %v6447_v3, %v7057_v7  ;;  %v7307_v7 = vrot.slane %v779_v55, %v7205_v21  ;;  %v781_v3 = vld [vmem:[%s7202_s1 + $0xd] sm:$0x1]  ;;  %v7311_v6 = vsel %vm817_vm0, %v916_v39, 0  ;;  %6458 = vrsqrt.f32 %v875_v29 }
 0x110   : > { %v915_v19 = vpack.c.bf16 %v899_v32, %v899_v32  ;;  %5978 = vmatprep.subr.bf16.mxu0 %v9266_v37  ;;  %9267 = vst [vmem:[#allocation25_spill] sm:$0xff] %v7297_v4  ;;  %v990_v32 = vcombine.low %v779_v55, %v780_v14  ;;  %2523 = vbcast.lane.b32.xlu1 %v7297_v4, 256 }
 0x111   : > { %v6449_v48 = vpop.eup %6448  ;;  %9268 = vst [vmem:[#allocation26_spill] sm:$0xff] %v7307_v7  ;;  %v917_v9 = vpack.c.bf16 %v901_v45, %v901_v45  ;;  %v7316_v14 = vrot.slane %v782_v28, %v7205_v21  ;;  %2516 = vbcast.lane.b32.xlu0 %v7307_v7, 256  ;;  %v991_v55 = vcombine.low %v781_v3, %v782_v28  ;;  %v9270_v45 = vmul.bf16 1048592000, %v7036_v0  ;;  %v7349_v7 = vld [vmem:[%s7202_s1 + $0xf] ss:$0 sm:$0xff] }
 0x112   : > { %v7301_v17 = vsel %vm817_vm0, %v915_v19, 0  ;;  %v902_v19 = vmul.f32 %v6449_v48, %v7067_v11  ;;  %v6451_v59 = vpop.eup %6450  ;;  %v7319_v52 = vrot.slane %v990_v32, %v7213_v36  ;;  %v7323_v4 = vrot.slane %v781_v3, %v7205_v21  ;;  %9272 = vst [vmem:[#allocation28_spill] sm:$0xff] %v7349_v7  ;;  %s6714_s1 = scalar_lea.vmem %s5525_s30, 16 }
 0x113   : > { %5973 = vmatpush3.bf16.xpose.msra.mxu1 %v7301_v17  ;;  %9269 = vst [vmem:[#allocation27_spill] sm:$0xff] %v7316_v14  ;;  %v7333_v11 = vrot.slane %v991_v55, %v7213_v36  ;;  %v7336_v48 = vsel %vm817_vm0, %v917_v9, 0  ;;  %v876_v28 = vmax.f32 %v850_v31, 1e-24  ;;  %v903_v3 = vmul.f32 %v6451_v59, %v7077_v15  ;;  %v856_v55 = vpop.xlane.xlu0 %855  ;;  %p6715_p13 = scmp.ne.s32.totalorder %s5525_s30, %s6714_s1  ;;  %p6722_p10 = scmp.lt.s32.totalorder %s6720_s11, %s6714_s1 }
 0x114   : > { %5984 = vmatprep.subr.bf16.mxu1 %v9266_v37  ;;  %v918_v32 = vpack.c.bf16 %v902_v19, %v902_v19  ;;  %2537 = vbcast.lane.b32.xlu1 %v7316_v14, 256  ;;  %v9271_v9 = vmul.bf16 1048592000, %v7039_v1  ;;  %v9273_v14 = vmul.bf16 1048592000, %v7042_v2 }
 0x115   : > { %v6453_v39 = vpop.eup %6452  ;;  %2530 = vbcast.lane.b32.xlu0 %v7323_v4, 256  ;;  %6460 = vrsqrt.f32 %v876_v28  ;;  %v919_v19 = vpack.c.bf16 %v903_v3, %v903_v3  ;;  %p6716_p0 = pnand %p6715_p13, %p6916_p9  ;;  %p6723_p12 = por %p6722_p10, %p6721_p7 }
 0x116   : > { %5969 = vmatmul.mubr.msk.bf16.vlgmr.msra.gmra.mxu0 %vm817_vm0, %v9270_v45  ;;  %v853_v45 = vpop.xlane.xlu1 %852  ;;  %v7355_v59 = vsel %vm817_vm0, %v918_v32, 0  ;;  %v904_v31 = vmul.f32 %v6453_v39, %v7091_v22  ;;  %v6455_v29 = vpop.eup %6454  ;;  %v878_v39 = vmax.f32 %v856_v55, 1e-24 }
 0x117   : > { %5979 = vmatpush3.bf16.xpose.msra.mxu0 %v7311_v6  ;;  %5980 = vmatprep.mubr.msk.bf16.mxu0 %vm6811_vm1, %v9266_v37  ;;  %v877_v15 = vmax.f32 %v853_v45, 1e-24  ;;  %v7368_v28 = vsel %vm817_vm0, %v919_v19, 0  ;;  %v905_v3 = vmul.f32 %v6455_v29, %v7097_v25  ;;  %v862_v55 = vpop.xlane.xlu0 %861  ;;  %p6717_p1 = pneg %p6716_p0 }
 0x118   : > { %5990 = vmatprep.subr.bf16.mxu0 %v9266_v37  ;;  %v920_v22 = vpack.c.bf16 %v904_v31, %v904_v31  ;;  %v1044_v31 = vmul.bf16 1048592000, %v7070_v12  ;;  %v9282_v12 = vcombine.low %v7277_v56, %v7283_v20 }
 0x119   : > { %2544 = vbcast.lane.b32.xlu0 %v7349_v7, 256  ;;  %6462 = vrsqrt.f32 %v877_v15  ;;  %v6457_v32 = vpop.eup %6456  ;;  %v921_v25 = vpack.c.bf16 %v905_v3, %v905_v3  ;;  %p6724_p2 = pnand %p6723_p12, %p6717_p1 }
 0x11a   : > { %5975 = vmatmul.mubr.msk.bf16.vlgmr.msra.gmra.mxu1 %vm817_vm0, %v9271_v9  ;;  %v859_v45 = vpop.xlane.xlu1 %858  ;;  %v9203_v9 = vmul.bf16 1048592000, %v7060_v8  ;;  %v7380_v7 = vsel %vm817_vm0, %v920_v22, 0  ;;  %6464 = vrsqrt.f32 %v878_v39  ;;  %v906_v29 = vmul.f32 %v6457_v32, %v7109_v30 }
 0x11b   : > { %5985 = vmatpush3.bf16.xpose.msra.mxu1 %v7336_v48  ;;  %5986 = vmatprep.mubr.msk.bf16.mxu1 %vm6811_vm1, %v9266_v37  ;;  %v879_v15 = vmax.f32 %v859_v45, 1e-24  ;;  %v7392_v22 = vsel %vm817_vm0, %v921_v25, 0  ;;  %v880_v30 = vmax.f32 %v862_v55, 1e-24  ;;  %v934_v55 = vpop.xlane.xlu0 %933 }
 0x11c   : > { %5996 = vmatprep.subr.bf16.mxu1 %v9266_v37  ;;  %v6459_v19 = vpop.eup %6458  ;;  %v922_v39 = vpack.c.bf16 %v906_v29, %v906_v29 }
 0x11d   : > { %6466 = vrsqrt.f32 %v879_v15  ;;  %v907_v32 = vmul.f32 %v6459_v19, %v7115_v33 }
 0x11e   : > { %5981 = vmatmul.mubr.msk.bf16.vlgmr.msra.gmra.mxu0 %vm817_vm0, %v9273_v14  ;;  %v9274_v14 = vmul.bf16 1048592000, %v7051_v5  ;;  %v865_v3 = vpop.xlane.xlu1 %864  ;;  %v7404_v29 = vsel %vm817_vm0, %v922_v39, 0  ;;  %6468 = vrsqrt.f32 %v880_v30 }
 0x11f   : > { %5991 = vmatpush3.bf16.xpose.msra.mxu0 %v7355_v59  ;;  %5992 = vmatprep.mubr.msk.bf16.mxu0 %vm6811_vm1, %v9266_v37  ;;  %v881_v15 = vmax.f32 %v865_v3, 1e-24  ;;  %v923_v33 = vpack.c.bf16 %v907_v32, %v907_v32 }
 0x120   : > { %6002 = vmatprep.subr.bf16.mxu0 %v9266_v37 }
 0x121   : > { %6470 = vrsqrt.f32 %v881_v15  ;;  %v7416_v39 = vsel %vm817_vm0, %v923_v33, 0 }
 0x122   : > { %5987 = vmatmul.mubr.msk.bf16.vlgmr.msra.gmra.mxu1 %vm817_vm0, %v9274_v14  ;;  %v6461_v45 = vpop.eup %6460  ;;  %v1045_v14 = vmul.bf16 1048592000, %v7080_v16  ;;  %v7623_v16 = vrot.slane %v9282_v12, %v7213_v36 }
 0x123   : > { %5997 = vmatpush3.bf16.xpose.msra.mxu1 %v7368_v28  ;;  %5998 = vmatprep.mubr.msk.bf16.mxu1 %vm6811_vm1, %v9266_v37  ;;  %v908_v19 = vmul.f32 %v6461_v45, %v7127_v38  ;;  %v935_v38 = vmax.f32 %v934_v55, 1e-24  ;;  %v1047_v45 = vmul.bf16 1048592000, %v7100_v26 }
 0x124   : > { %6008 = vmatprep.subr.bf16.mxu1 %v9266_v37 }
 0x125   : > { %v924_v30 = vpack.c.bf16 %v908_v19, %v908_v19  ;;  %6472 = vrsqrt.f32 %v935_v38  ;;  %v9204_v19 = vmul.bf16 1048592000, %v7103_v27 }
 0x126   : > { %5993 = vmatmul.mubr.msk.bf16.vlgmr.msra.gmra.mxu0 %vm817_vm0, %v9203_v9  ;;  %v6463_v25 = vpop.eup %6462  ;;  %v1046_v9 = vmul.bf16 1048592000, %v7084_v18  ;;  %v9283_v18 = vcombine.low %v7319_v52, %v7333_v11 }
 0x127   : > { %6003 = vmatpush3.bf16.xpose.msra.mxu0 %v7380_v7  ;;  %6004 = vmatprep.mubr.msk.bf16.mxu0 %vm6811_vm1, %v9266_v37  ;;  %v909_v32 = vmul.f32 %v6463_v25, %v7133_v41  ;;  %v6465_v3 = vpop.eup %6464  ;;  %v7428_v33 = vsel %vm817_vm0, %v924_v30, 0 }
 0x128   : > { %6014 = vmatprep.subr.bf16.mxu0 %v9266_v37  ;;  %v910_v25 = vmul.f32 %v6465_v3, %v7145_v46  ;;  %v7629_v26 = vrot.slane %v9283_v18, %v7213_v36 }
 0x129   : > { %v925_v41 = vpack.c.bf16 %v909_v32, %v909_v32  ;;  %v1049_v32 = vmul.bf16 1048592000, %v7118_v34 }
 0x12a   : > { %5999 = vmatmul.mubr.msk.bf16.vlgmr.msra.gmra.mxu1 %vm817_vm0, %v1044_v31  ;;  %v6467_v15 = vpop.eup %6466  ;;  %v926_v30 = vpack.c.bf16 %v910_v25, %v910_v25  ;;  %v5794_v34 = vcombine.low %v7629_v26, %v7629_v26 }
 0x12b   : > { %6009 = vmatpush3.bf16.xpose.msra.mxu1 %v7392_v22  ;;  %6010 = vmatprep.mubr.msk.bf16.mxu1 %vm6811_vm1, %v9266_v37  ;;  %v7440_v55 = vsel %vm817_vm0, %v925_v41, 0  ;;  %v911_v38 = vmul.f32 %v6467_v15, %v7151_v49  ;;  %v6469_v46 = vpop.eup %6468  ;;  %v9205_v15 = vmul.bf16 1048592000, %v7121_v35 }
 0x12c   : > { %6020 = vmatprep.subr.bf16.mxu1 %v9266_v37  ;;  %v7452_v41 = vsel %vm817_vm0, %v926_v30, 0  ;;  %v912_v49 = vmul.f32 %v6469_v46, %v7163_v54  ;;  %v1051_v46 = vmul.bf16 1048592000, %v7136_v42 }
 0x12d   : > { %v927_v25 = vpack.c.bf16 %v911_v38, %v911_v38 }
 0x12e   : > { %6005 = vmatmul.mubr.msk.bf16.vlgmr.msra.gmra.mxu0 %vm817_vm0, %v1045_v14  ;;  %v6471_v3 = vpop.eup %6470  ;;  %v928_v30 = vpack.c.bf16 %v912_v49, %v912_v49 }
 0x12f   : > { %6015 = vmatpush3.bf16.xpose.msra.mxu0 %v7404_v29  ;;  %6016 = vmatprep.mubr.msk.bf16.mxu0 %vm6811_vm1, %v9266_v37  ;;  %v913_v38 = vmul.f32 %v6471_v3, %v7169_v57  ;;  %v1052_v3 = vmul.bf16 1048592000, %v7139_v43 }
 0x130   : > { %6026 = vmatprep.subr.bf16.mxu0 %v9266_v37 }
 0x131   : > { %v929_v49 = vpack.c.bf16 %v913_v38, %v913_v38  ;;  %v1053_v38 = vmul.bf16 1048592000, %v7154_v50  ;;  %v7643_v50 = vpop.permute.xlu1 %2439 }
 0x132   : > { %6011 = vmatmul.mubr.msk.bf16.vlgmr.msra.gmra.mxu1 %vm817_vm0, %v1046_v9  ;;  %v6473_v54 = vpop.eup %6472  ;;  %vm2546_vm2 = vcmp.eq.s32.totalorder %v7643_v50, %v7209_v24 }
 0x133   : > { %6021 = vmatpush3.bf16.xpose.msra.mxu1 %v7416_v39  ;;  %6022 = vmatprep.mubr.msk.bf16.mxu1 %vm6811_vm1, %v9266_v37  ;;  %v937_v57 = vmul.f32 %v6473_v54, %v7175_v61  ;;  %v1054_v54 = vmul.bf16 1048592000, %v7157_v51  ;;  %v7647_v51 = vpop.permute.xlu0 %2446 }
 0x134   : > { %6032 = vmatprep.subr.bf16.mxu1 %v9266_v37  ;;  %vm2547_vm4 = vcmp.eq.s32.totalorder %v7647_v51, %v7221_v44 }
 0x136   : > { %6017 = vmatmul.mubr.msk.bf16.vlgmr.msra.gmra.mxu0 %vm817_vm0, %v1047_v45 }
 0x137   : > { %6027 = vmatpush3.bf16.xpose.msra.mxu0 %v7428_v33  ;;  %6028 = vmatprep.mubr.msk.bf16.mxu0 %vm6811_vm1, %v9266_v37 }
 0x138   : > { %6038 = vmatprep.subr.bf16.mxu0 %v9266_v37 }
 0x13a   : > { %6023 = vmatmul.mubr.msk.bf16.vlgmr.msra.gmra.mxu1 %vm817_vm0, %v9204_v19  ;;  %v7464_v19 = vsel %vm817_vm0, %v927_v25, 0  ;;  %v7476_v25 = vsel %vm817_vm0, %v928_v30, 0  ;;  %v938_v30 = vpack.c.bf16 %v937_v57, %v937_v57 }
 0x13b   : > { %6033 = vmatpush3.bf16.xpose.msra.mxu1 %v7440_v55  ;;  %6034 = vmatprep.mubr.msk.bf16.mxu1 %vm6811_vm1, %v9266_v37 }
 0x13c   : > { %6044 = vmatprep.subr.bf16.mxu1 %v9266_v37  ;;  %v1792_v61 = vsel %vm817_vm0, %v938_v30, 0 }
 0x13e   : > { %6029 = vmatmul.mubr.msk.bf16.vlgmr.msra.gmra.mxu0 %vm817_vm0, %v1049_v32 }
 0x13f   : > { %6039 = vmatpush3.bf16.xpose.msra.mxu0 %v7452_v41  ;;  %6040 = vmatprep.mubr.msk.bf16.mxu0 %vm6811_vm1, %v9266_v37 }
 0x140   : > { %6050 = vmatprep.subr.bf16.mxu0 %v9266_v37 }
 0x142   : > { %6035 = vmatmul.mubr.msk.bf16.vlgmr.msra.gmra.mxu1 %vm817_vm0, %v9205_v15  ;;  %v1749_v15 = vsel %vm817_vm0, %v929_v49, 0  ;;  %v9276_v49 = vmul.bf16 1048592000, %v7039_v1  ;;  %v9278_v1 = vmul.bf16 1048592000, %v7051_v5 }
 0x143   : > { %6045 = vmatpush3.bf16.xpose.msra.mxu1 %v7464_v19  ;;  %6046 = vmatprep.mubr.msk.bf16.mxu1 %vm6811_vm1, %v9266_v37  ;;  %v9280_v5 = vmul.bf16 1048592000, %v7103_v27  ;;  %v1036_v27 = vcombine.low %v7623_v16, %v7629_v26 }
 0x144   : > { %6056 = vmatprep.subr.bf16.mxu1 %v9266_v37 }
 0x146   : > { %6041 = vmatmul.mubr.msk.bf16.vlgmr.msra.gmra.mxu0 %vm817_vm0, %v1051_v46 }
 0x147   : > { %6051 = vmatpush3.bf16.xpose.msra.mxu0 %v7476_v25  ;;  %6052 = vmatprep.mubr.msk.bf16.mxu0 %vm6811_vm1, %v9266_v37 }
 0x148   : > { %6062 = vmatprep.subr.bf16.mxu0 %v9266_v37 }
 0x14a   : > { %6047 = vmatmul.mubr.msk.bf16.vlgmr.msra.gmra.mxu1 %vm817_vm0, %v1052_v3 }
 0x14b   : > { %6057 = vmatpush3.bf16.xpose.msra.mxu1 %v1749_v15  ;;  %6058 = vmatprep.mubr.msk.bf16.mxu1 %vm6811_vm1, %v9266_v37  ;;  %v9275_v15 = vmul.bf16 1048592000, %v7036_v0  ;;  %v9277_v0 = vmul.bf16 1048592000, %v7042_v2  ;;  %v9279_v2 = vmul.bf16 1048592000, %v7060_v8 }
 0x14c   : > { %6068 = vmatprep.subr.bf16.mxu1 %v9266_v37  ;;  %v9281_v8 = vmul.bf16 1048592000, %v7121_v35  ;;  %v7636_v35 = vrot.slane %v5794_v34, %v7213_v36 }
 0x14e   : > { %6053 = vmatmul.mubr.msk.bf16.vlgmr.msra.gmra.mxu0 %vm817_vm0, %v1053_v38  ;;  %v2643_v42 = vcombine.high %v7636_v35, %v7636_v35 }
 0x14f   : > { %6063 = vmatpush3.bf16.xpose.msra.mxu0 %v1792_v61  ;;  %6064 = vmatprep.mubr.msk.bf16.mxu0 %vm6811_vm1, %v9266_v37 }
 0x150   : > { %6074 = vmatprep.subr.bf16.mxu0 %v9266_v37  ;;  %v7641_v43 = vrot.slane %v2643_v42, %v7213_v36 }
 0x152   : > { %6059 = vmatmul.mubr.msk.bf16.vlgmr.msra.gmra.mxu1 %vm817_vm0, %v1054_v54 }
 0x153   : > { %6069 = vmatpush3.bf16.xpose.msra.mxu1 %v7286_v23  ;;  %6070 = vmatprep.mubr.msk.bf16.mxu1 %vm6811_vm1, %v9266_v37 }
 0x154   : > { %6080 = vmatprep.subr.bf16.mxu1 %v9266_v37 }
 0x156   : > { %6065 = vmatmul.mubr.msk.bf16.vlgmr.msra.gmra.mxu0 %vm817_vm0, %v9275_v15 }
 0x157   : > { %6075 = vmatpush3.bf16.xpose.msra.mxu0 %v7301_v17  ;;  %6076 = vmatprep.mubr.msk.bf16.mxu0 %vm6811_vm1, %v9266_v37  ;;  %v7655_v17 = vpop.permute.xlu1 %2453 }
 0x158   : > { %6086 = vmatprep.subr.bf16.mxu0 %v9266_v37  ;;  %vm2548_vm5 = vcmp.eq.s32.totalorder %v7655_v17, %v7218_v40 }
 0x15a   : > { %6071 = vmatmul.mubr.msk.bf16.vlgmr.msra.gmra.mxu1 %vm817_vm0, %v9276_v49 }
 0x15b   : > { %6081 = vmatpush3.bf16.xpose.msra.mxu1 %v7311_v6  ;;  %6082 = vmatprep.mubr.msk.bf16.mxu1 %vm6811_vm1, %v9266_v37 }
 0x15c   : > { %6092 = vmatprep.subr.bf16.mxu1 %v9266_v37 }
 0x15e   : > { %6077 = vmatmul.mubr.msk.bf16.vlgmr.msra.gmra.mxu0 %vm817_vm0, %v9277_v0 }
 0x15f   : > { %6087 = vmatpush3.bf16.xpose.msra.mxu0 %v7336_v48  ;;  %6088 = vmatprep.mubr.msk.bf16.mxu0 %vm6811_vm1, %v9266_v37 }
 0x160   : > { %6098 = vmatprep.subr.bf16.mxu0 %v9266_v37 }
 0x162   : > { %6083 = vmatmul.mubr.msk.bf16.vlgmr.msra.gmra.mxu1 %vm817_vm0, %v9278_v1 }
 0x163   : > { %6093 = vmatpush3.bf16.xpose.msra.mxu1 %v7355_v59  ;;  %6094 = vmatprep.mubr.msk.bf16.mxu1 %vm6811_vm1, %v9266_v37 }
 0x164   : > { %6104 = vmatprep.subr.bf16.mxu1 %v9266_v37 }
 0x166   : > { %6089 = vmatmul.mubr.msk.bf16.vlgmr.msra.gmra.mxu0 %vm817_vm0, %v9279_v2 }
 0x167   : > { %6099 = vmatpush3.bf16.xpose.msra.mxu0 %v7368_v28  ;;  %6100 = vmatprep.mubr.msk.bf16.mxu0 %vm6811_vm1, %v9266_v37 }
 0x168   : > { %6110 = vmatprep.subr.bf16.mxu0 %v9266_v37 }
 0x16a   : > { %6095 = vmatmul.mubr.msk.bf16.vlgmr.msra.gmra.mxu1 %vm817_vm0, %v1044_v31 }
 0x16b   : > { %6105 = vmatpush3.bf16.xpose.msra.mxu1 %v7380_v7  ;;  %6106 = vmatprep.mubr.msk.bf16.mxu1 %vm6811_vm1, %v9266_v37 }
 0x16c   : > { %6116 = vmatprep.subr.bf16.mxu1 %v9266_v37 }
 0x16e   : > { %6101 = vmatmul.mubr.msk.bf16.vlgmr.msra.gmra.mxu0 %vm817_vm0, %v1045_v14 }
 0x16f   : > { %6111 = vmatpush3.bf16.xpose.msra.mxu0 %v7392_v22  ;;  %6112 = vmatprep.mubr.msk.bf16.mxu0 %vm6811_vm1, %v9266_v37 }
 0x170   : > { %6122 = vmatprep.subr.bf16.mxu0 %v9266_v37 }
 0x172   : > { %6107 = vmatmul.mubr.msk.bf16.vlgmr.msra.gmra.mxu1 %vm817_vm0, %v1046_v9 }
 0x173   : > { %6117 = vmatpush3.bf16.xpose.msra.mxu1 %v7404_v29  ;;  %6118 = vmatprep.mubr.msk.bf16.mxu1 %vm6811_vm1, %v9266_v37 }
 0x174   : > { %6128 = vmatprep.subr.bf16.mxu1 %v9266_v37 }
 0x176   : > { %6113 = vmatmul.mubr.msk.bf16.vlgmr.msra.gmra.mxu0 %vm817_vm0, %v1047_v45 }
 0x177   : > { %6123 = vmatpush3.bf16.xpose.msra.mxu0 %v7416_v39  ;;  %6124 = vmatprep.mubr.msk.bf16.mxu0 %vm6811_vm1, %v9266_v37 }
 0x178   : > { %6134 = vmatprep.subr.bf16.mxu0 %v9266_v37 }
 0x17a   : > { %6119 = vmatmul.mubr.msk.bf16.vlgmr.msra.gmra.mxu1 %vm817_vm0, %v9280_v5 }
 0x17b   : > { %6129 = vmatpush3.bf16.xpose.msra.mxu1 %v7428_v33  ;;  %6130 = vmatprep.mubr.msk.bf16.mxu1 %vm6811_vm1, %v9266_v37 }
 0x17c   : > { %6140 = vmatprep.subr.bf16.mxu1 %v9266_v37 }
 0x17e   : > { %6125 = vmatmul.mubr.msk.bf16.vlgmr.msra.gmra.mxu0 %vm817_vm0, %v1049_v32 }
 0x17f   : > { %6135 = vmatpush3.bf16.xpose.msra.mxu0 %v7440_v55  ;;  %6136 = vmatprep.mubr.msk.bf16.mxu0 %vm6811_vm1, %v9266_v37 }
 0x180   : > { %6146 = vmatprep.subr.bf16.mxu0 %v9266_v37 }
 0x182   : > { %6131 = vmatmul.mubr.msk.bf16.vlgmr.msra.gmra.mxu1 %vm817_vm0, %v9281_v8 }
 0x183   : > { %6141 = vmatpush3.bf16.xpose.msra.mxu1 %v7452_v41  ;;  %6142 = vmatprep.mubr.msk.bf16.mxu1 %vm6811_vm1, %v9266_v37 }
 0x184   : > { %6152 = vmatprep.subr.bf16.mxu1 %v9266_v37 }
 0x186   : > { %6137 = vmatmul.mubr.msk.bf16.vlgmr.msra.gmra.mxu0 %vm817_vm0, %v1051_v46 }
 0x187   : > { %6147 = vmatpush3.bf16.xpose.msra.mxu0 %v7464_v19  ;;  %6148 = vmatprep.mubr.msk.bf16.mxu0 %vm6811_vm1, %v9266_v37 }
 0x188   : > { %6158 = vmatprep.subr.bf16.mxu0 %v9266_v37 }
 0x18a   : > { %6143 = vmatmul.mubr.msk.bf16.vlgmr.msra.gmra.mxu1 %vm817_vm0, %v1052_v3 }
 0x18b   : > { %6153 = vmatpush3.bf16.xpose.msra.mxu1 %v7476_v25  ;;  %6154 = vmatprep.mubr.msk.bf16.mxu1 %vm6811_vm1, %v9266_v37 }
 0x18c   : > { %6164 = vmatprep.subr.bf16.mxu1 %v9266_v37 }
 0x18e   : > { %6149 = vmatmul.mubr.msk.bf16.vlgmr.msra.gmra.mxu0 %vm817_vm0, %v1053_v38 }
 0x18f   : > { %6160 = vmatprep.mubr.msk.bf16.mxu0 %vm6811_vm1, %v9266_v37 }
 0x192   : > { %6155 = vmatmul.mubr.msk.bf16.vlgmr.msra.gmra.mxu1 %vm817_vm0, %v1054_v54 }
 0x193   : > { %6166 = vmatprep.mubr.msk.bf16.mxu1 %vm6811_vm1, %v9266_v37 }
 0x1d6   : > { %v1095_v20 = vpop.f32.mrf.mxu0 }
 0x1d7   : > { %v7649_v56 = vsel %vm2546_vm2, -50000.0, %v1095_v20 }
 0x1d8   : > { %v5970_v23 = vpop.f32.mrf.mxu0  ;;  %v2773_v6 = vsel %vm2772_vm3, %v7649_v56, -inf }
 0x1d9   : > { %2774 = vmax.xlane.f32.xlu1 %v2773_v6 }
 0x1da   : > { %v1098_v7 = vpop.f32.mrf.mxu0  ;;  %v1141_v52 = vpop.f32.mrf.mxu1 }
 0x1db   : > { %v7657_v11 = vsel %vm2547_vm4, -50000.0, %v1141_v52 }
 0x1dc   : > { %v5971_v24 = vpop.f32.mrf.mxu0  ;;  %v5976_v48 = vpop.f32.mrf.mxu1  ;;  %v2776_v59 = vsel %vm2772_vm3, %v7657_v11, -inf }
 0x1dd   : > { %2777 = vmax.xlane.f32.xlu0 %v2776_v59 }
 0x1de   : > { %v1144_v9 = vpop.f32.mrf.mxu1  ;;  %v1187_v28 = vpop.f32.mrf.mxu0 }
 0x1df   : > { %v7663_v31 = vsel %vm2548_vm5, -50000.0, %v1187_v28  ;;  %v784_v9 = vld [vmem:[%s708_s15] sm:$0x1] }
 0x1e0   : > { %v5977_v44 = vpop.f32.mrf.mxu1  ;;  %v5982_v22 = vpop.f32.mrf.mxu0  ;;  %v2779_v14 = vsel %vm2772_vm3, %v7663_v31, -inf }
 0x1e1   : > { %2780 = vmax.xlane.f32.xlu1 %v2779_v14  ;;  %v9284_v22 = vcombine.low %v7250_v47, %v7255_v60 }
 0x1e2   : > { %v1190_v29 = vpop.f32.mrf.mxu0  ;;  %v7667_v39 = vpop.f32.mrf.mxu1 }
 0x1e3   : > { %v1038_v14 = vsel %vm1037_vm6, %v784_v9, %v9284_v22 }
 0x1e4   : > { %v5983_v45 = vpop.f32.mrf.mxu0  ;;  %v5988_v33 = vpop.f32.mrf.mxu1 }
 0x1e6   : > { %v1236_v40 = vpop.f32.mrf.mxu1  ;;  %v7669_v19 = vpop.f32.mrf.mxu0 }
 0x1e8   : > { %v5989_v55 = vpop.f32.mrf.mxu1  ;;  %v5994_v32 = vpop.f32.mrf.mxu0 }
 0x1e9   : > { %v2585_v55 = vrot.slane %v1038_v14, %v7213_v36 }
 0x1ea   : > { %v1282_v41 = vpop.f32.mrf.mxu0  ;;  %v7671_v46 = vpop.f32.mrf.mxu1 }
 0x1ec   : > { %v5995_v25 = vpop.f32.mrf.mxu0  ;;  %v6000_v57 = vpop.f32.mrf.mxu1 }
 0x1ed   : > { %v2601_v25 = vrot.slane %v2585_v55, %v7213_v36 }
 0x1ee   : > { %v1328_v3 = vpop.f32.mrf.mxu1  ;;  %v7673_v30 = vpop.f32.mrf.mxu0 }
 0x1ef   : > { %v2679_v47 = vrot.slane %v2601_v25, %v7205_v21 }
 0x1f0   : > { %v6001_v38 = vpop.f32.mrf.mxu1  ;;  %v6006_v61 = vpop.f32.mrf.mxu0 }
 0x1f1   : > { %v2593_v38 = vcombine.high %v2585_v55, %v2585_v55  ;;  %vm2740_vm7 = vcmp.eq.s32.totalorder %v7643_v50, %v2679_v47 }
 0x1f2   : > { %v1374_v54 = vpop.f32.mrf.mxu0  ;;  %v7675_v15 = vpop.f32.mrf.mxu1 }
 0x1f4   : > { %v6007_v49 = vpop.f32.mrf.mxu0  ;;  %v6012_v0 = vpop.f32.mrf.mxu1 }
 0x1f5   : > { %v2615_v0 = vrot.slane %v2593_v38, %v7213_v36 }
 0x1f6   : > { %v1420_v1 = vpop.f32.mrf.mxu1  ;;  %v7677_v2 = vpop.f32.mrf.mxu0 }
 0x1f7   : > { %v2625_v22 = vcombine.high %v2615_v0, %v2615_v0 }
 0x1f8   : > { %v6013_v5 = vpop.f32.mrf.mxu1  ;;  %v6018_v8 = vpop.f32.mrf.mxu0 }
 0x1f9   : > { %v2461_v8 = vpop.permute.xlu1 %2460 }
 0x1fa   : > { %v1466_v12 = vpop.f32.mrf.mxu0  ;;  %v7679_v18 = vpop.f32.mrf.mxu1  ;;  %vm2549_vm8 = vcmp.eq.s32.totalorder %v2461_v8, %v7229_v53 }
 0x1fb   : > { %v7720_v53 = vsel %vm2549_vm8, -50000.0, %v7667_v39 }
 0x1fc   : > { %v6019_v34 = vpop.f32.mrf.mxu0  ;;  %v6024_v42 = vpop.f32.mrf.mxu1 }
 0x1fd   : > { %v2683_v42 = vrot.slane %v2615_v0, %v7205_v21  ;;  %v2782_v0 = vsel %vm2772_vm3, %v7720_v53, -inf }
 0x1fe   : > { %v1512_v20 = vpop.f32.mrf.mxu1  ;;  %v7681_v23 = vpop.f32.mrf.mxu0 }
 0x1ff   : > { %v2623_v20 = vcombine.high %v2601_v25, %v2601_v25  ;;  %vm2741_vm9 = vcmp.eq.s32.totalorder %v7647_v51, %v2683_v42 }
 0x200   : > { %v6025_v6 = vpop.f32.mrf.mxu1  ;;  %v6030_v7 = vpop.f32.mrf.mxu0 }
 0x201   : > { %v2578_v6 = vcombine.high %v1038_v14, %v1038_v14  ;;  %v2687_v50 = vrot.slane %v2623_v20, %v7205_v21  ;;  %v2468_v14 = vpop.permute.xlu1 %2467 }
 0x202   : > { %v1558_v52 = vpop.f32.mrf.mxu0  ;;  %v7687_v24 = vpop.f32.mrf.mxu1  ;;  %vm2550_vm10 = vcmp.eq.s32.totalorder %v2468_v14, %v7234_v58 }
 0x203   : > { %vm2742_vm11 = vcmp.eq.s32.totalorder %v7655_v17, %v2687_v50 }
 0x204   : > { %v6031_v48 = vpop.f32.mrf.mxu0  ;;  %v6036_v59 = vpop.f32.mrf.mxu1 }
 0x206   : > { %v1604_v28 = vpop.f32.mrf.mxu1  ;;  %v7689_v44 = vpop.f32.mrf.mxu0 }
 0x208   : > { %v6037_v29 = vpop.f32.mrf.mxu1  ;;  %v6042_v45 = vpop.f32.mrf.mxu0 }
 0x209   : > { %v2592_v29 = vrot.slane %v2578_v6, %v7213_v36 }
 0x20a   : > { %v1650_v33 = vpop.f32.mrf.mxu0  ;;  %v7695_v40 = vpop.f32.mrf.mxu1 }
 0x20b   : > { %v2608_v38 = vrot.slane %v2592_v29, %v7213_v36 }
 0x20c   : > { %v6043_v32 = vpop.f32.mrf.mxu0  ;;  %v6048_v41 = vpop.f32.mrf.mxu1 }
 0x20d   : > { %v2594_v41 = vcombine.high %v2592_v29, %v2592_v29 }
 0x20e   : > { %v1696_v57 = vpop.f32.mrf.mxu1  ;;  %v7699_v3 = vpop.f32.mrf.mxu0 }
 0x20f   : > { %v2691_v57 = vrot.slane %v2625_v22, %v7205_v21  ;;  %v2622_v58 = vrot.slane %v2594_v41, %v7213_v36 }
 0x210   : > { %v6049_v61 = vpop.f32.mrf.mxu1  ;;  %v6054_v54 = vpop.f32.mrf.mxu0 }
 0x211   : > { %v2475_v61 = vpop.permute.xlu0 %2474  ;;  %vm2743_vm12 = vcmp.eq.s32.totalorder %v2461_v8, %v2691_v57 }
 0x212   : > { %v1742_v60 = vpop.f32.mrf.mxu0  ;;  %v7702_v49 = vpop.f32.mrf.mxu1  ;;  %vm2551_vm13 = vcmp.eq.s32.totalorder %v2475_v61, %v7243_v13 }
 0x213   : > { %v7746_v8 = vsel %vm2551_vm13, -50000.0, %v7671_v46  ;;  %v2626_v46 = vcombine.high %v2622_v58, %v2622_v58 }
 0x214   : > { %v6055_v1 = vpop.f32.mrf.mxu0  ;;  %v6060_v5 = vpop.f32.mrf.mxu1 }
 0x215   : > { %v7734_v1 = vsel %vm2550_vm10, -50000.0, %v7669_v19 }
 0x216   : > { %v1788_v12 = vpop.f32.mrf.mxu1  ;;  %v1828_v34 = vpop.f32.mrf.mxu0 }
 0x217   : > { %v7707_v7 = vsel %vm2740_vm7, -50000.0, %v1828_v34  ;;  %v2695_v12 = vrot.slane %v2608_v38, %v7205_v21  ;;  %v2482_v34 = vpop.permute.xlu1 %2481 }
 0x218   : > { %v6061_v52 = vpop.f32.mrf.mxu1  ;;  %v6066_v48 = vpop.f32.mrf.mxu0  ;;  %v2821_v59 = vsel %vm2772_vm3, %v7707_v7, -inf  ;;  %vm2552_vm14 = vcmp.eq.s32.totalorder %v2482_v34, %v7240_v10 }
 0x219   : > { %2822 = vmax.xlane.f32.xlu0 %v2821_v59  ;;  %v2785_v52 = vsel %vm2772_vm3, %v7734_v1, -inf  ;;  %v2699_v48 = vrot.slane %v2622_v58, %v7205_v21  ;;  %vm2744_vm15 = vcmp.eq.s32.totalorder %v2468_v14, %v2695_v12 }
 0x21a   : > { %v1831_v9 = vpop.f32.mrf.mxu0  ;;  %v1868_v28 = vpop.f32.mrf.mxu1 }
 0x21b   : > { %v7715_v45 = vsel %vm2741_vm9, -50000.0, %v1868_v28  ;;  %v2624_v9 = vcombine.high %v2608_v38, %v2608_v38  ;;  %v2489_v28 = vpop.permute.xlu0 %2488  ;;  %vm2745_vm2 = vcmp.eq.s32.totalorder %v2475_v61, %v2699_v48 }
 0x21c   : > { %v6067_v33 = vpop.f32.mrf.mxu0  ;;  %v6072_v55 = vpop.f32.mrf.mxu1  ;;  %v2824_v32 = vsel %vm2772_vm3, %v7715_v45, -inf  ;;  %vm2553_vm4 = vcmp.eq.s32.totalorder %v2489_v28, %v7261_v63 }
 0x21d   : > { %2825 = vmax.xlane.f32.xlu0 %v2824_v32  ;;  %v2788_v55 = vsel %vm2772_vm3, %v7746_v8, -inf  ;;  %v7756_v32 = vsel %vm2552_vm14, -50000.0, %v7673_v30  ;;  %v2703_v41 = vrot.slane %v2624_v9, %v7205_v21  ;;  %v7772_v63 = vsel %vm2553_vm4, -50000.0, %v7675_v15 }
 0x21e   : > { %v1871_v51 = vpop.f32.mrf.mxu1  ;;  %v1908_v25 = vpop.f32.mrf.mxu0  ;;  %v2791_v30 = vsel %vm2772_vm3, %v7756_v32, -inf }
 0x21f   : > { %v7726_v54 = vsel %vm2742_vm11, -50000.0, %v1908_v25  ;;  %v2634_v51 = vrot.slane %v1036_v27, %v7213_v36  ;;  %v2496_v25 = vpop.permute.xlu1 %2495  ;;  %vm2746_vm7 = vcmp.eq.s32.totalorder %v2482_v34, %v2703_v41 }
 0x220   : > { %v6073_v47 = vpop.f32.mrf.mxu1  ;;  %v6078_v60 = vpop.f32.mrf.mxu0  ;;  %v2827_v39 = vsel %vm2772_vm3, %v7726_v54, -inf  ;;  %vm2554_vm5 = vcmp.eq.s32.totalorder %v2496_v25, %v7258_v62 }
 0x221   : > { %2828 = vmax.xlane.f32.xlu1 %v2827_v39  ;;  %2783 = vmax.xlane.f32.xlu0 %v2782_v0  ;;  %v2707_v60 = vrot.slane %v2626_v46, %v7205_v21  ;;  %v2642_v39 = vcombine.high %v2634_v51, %v2634_v51  ;;  %v2650_v27 = vrot.slane %v2634_v51, %v7213_v36  ;;  %v2503_v0 = vpop.permute.xlu0 %2502  ;;  %v7784_v62 = vsel %vm2554_vm5, -50000.0, %v7677_v2 }
 0x222   : > { %v1911_v17 = vpop.f32.mrf.mxu0  ;;  %v1948_v5 = vpop.f32.mrf.mxu1 }
 0x223   : > { %v7738_v42 = vsel %vm2743_vm12, -50000.0, %v1948_v5  ;;  %vm2747_vm8 = vcmp.eq.s32.totalorder %v2489_v28, %v2707_v60  ;;  %v2664_v15 = vrot.slane %v2642_v39, %v7213_v36  ;;  %v2510_v48 = vpop.permute.xlu1 %2509  ;;  %v2797_v28 = vsel %vm2772_vm3, %v7784_v62, -inf }
 0x224   : > { %v6079_v20 = vpop.f32.mrf.mxu0  ;;  %v6084_v6 = vpop.f32.mrf.mxu1  ;;  %v2830_v19 = vsel %vm2772_vm3, %v7738_v42, -inf }
 0x225   : > { %2786 = vmax.xlane.f32.xlu1 %v2785_v52  ;;  %2831 = vmax.xlane.f32.xlu0 %v2830_v19  ;;  %v2794_v20 = vsel %vm2772_vm3, %v7772_v63, -inf  ;;  %v2711_v52 = vrot.slane %v2650_v27, %v7205_v21  ;;  %v9285_v19 = vld [vmem:[#allocation24_spill] sm:$0xff] }
 0x226   : > { %v1951_v13 = vpop.f32.mrf.mxu1  ;;  %v1988_v59 = vpop.f32.mrf.mxu0  ;;  %vm2555_vm9 = vcmp.eq.s32.totalorder %v2503_v0, %v9285_v19 }
 0x227   : > { %v7749_v50 = vsel %vm2744_vm15, -50000.0, %v1988_v59  ;;  %vm2748_vm11 = vcmp.eq.s32.totalorder %v2496_v25, %v2711_v52  ;;  %v2657_v52 = vrot.slane %v7636_v35, %v7213_v36 }
 0x228   : > { %v6085_v22 = vpop.f32.mrf.mxu1  ;;  %v6090_v29 = vpop.f32.mrf.mxu0  ;;  %v2833_v33 = vsel %vm2772_vm3, %v7749_v50, -inf }
 0x229   : > { %2834 = vmax.xlane.f32.xlu1 %v2833_v33  ;;  %2789 = vmax.xlane.f32.xlu0 %v2788_v55  ;;  %v2715_v22 = vrot.slane %v2664_v15, %v7205_v21  ;;  %v7796_v29 = vsel %vm2555_vm9, -50000.0, %v7679_v18  ;;  %v9286_v33 = vld [vmem:[#allocation23_spill] sm:$0xff]  ;;  %v2674_v18 = vcombine.high %v2664_v15, %v2664_v15  ;;  %v9288_v15 = vld [vmem:[#allocation25_spill] sm:$0xff]  ;;  %v2727_v36 = vrot.slane %v2657_v52, %v7205_v21 }
 0x22a   : > { %v1991_v10 = vpop.f32.mrf.mxu0  ;;  %v2028_v14 = vpop.f32.mrf.mxu1  ;;  %vm2556_vm10 = vcmp.eq.s32.totalorder %v2510_v48, %v9286_v33 }
 0x22b   : > { %v7764_v57 = vsel %vm2745_vm2, -50000.0, %v2028_v14  ;;  %v2672_v10 = vcombine.high %v2650_v27, %v2650_v27  ;;  %v2517_v14 = vpop.permute.xlu0 %2516  ;;  %vm2749_vm12 = vcmp.eq.s32.totalorder %v2503_v0, %v2715_v22 }
 0x22c   : > { %v6091_v38 = vpop.f32.mrf.mxu0  ;;  %v6096_v61 = vpop.f32.mrf.mxu1  ;;  %v2836_v47 = vsel %vm2772_vm3, %v7764_v57, -inf }
 0x22d   : > { %2792 = vmax.xlane.f32.xlu1 %v2791_v30  ;;  %2837 = vmax.xlane.f32.xlu0 %v2836_v47  ;;  %v2800_v30 = vsel %vm2772_vm3, %v7796_v29, -inf  ;;  %v7806_v47 = vsel %vm2556_vm10, -50000.0, %v7681_v23  ;;  %v2719_v39 = vrot.slane %v2672_v10, %v7205_v21 }
 0x22e   : > { %v2031_v16 = vpop.f32.mrf.mxu1  ;;  %v2068_v26 = vpop.f32.mrf.mxu0  ;;  %v2803_v0 = vsel %vm2772_vm3, %v7806_v47, -inf }
 0x22f   : > { %v7776_v58 = vsel %vm2746_vm7, -50000.0, %v2068_v26  ;;  %v9287_v16 = vld [vmem:[#allocation26_spill] sm:$0xff]  ;;  %v2524_v26 = vpop.permute.xlu1 %2523  ;;  %vm2750_vm15 = vcmp.eq.s32.totalorder %v2510_v48, %v2719_v39  ;;  %v2531_v19 = vpop.permute.xlu0 %2530 }
 0x230   : > { %v6097_v17 = vpop.f32.mrf.mxu1  ;;  %v6102_v5 = vpop.f32.mrf.mxu0  ;;  %v2839_v12 = vsel %vm2772_vm3, %v7776_v58, -inf  ;;  %vm2557_vm13 = vcmp.eq.s32.totalorder %v2517_v14, %v9287_v16  ;;  %vm2558_vm14 = vcmp.eq.s32.totalorder %v2524_v26, %v9288_v15  ;;  %vm2559_vm4 = vcmp.eq.s32.totalorder %v2531_v19, %v7323_v4  ;;  %v9289_v4 = vld [vmem:[#allocation27_spill] sm:$0xff]  ;;  %v9290_v15 = vld [vmem:[#allocation28_spill] sm:$0xff] }
 0x231   : > { %2840 = vmax.xlane.f32.xlu1 %v2839_v12  ;;  %2795 = vmax.xlane.f32.xlu0 %v2794_v20  ;;  %v2723_v12 = vrot.slane %v2674_v18, %v7205_v21  ;;  %v7818_v20 = vsel %vm2557_vm13, -50000.0, %v7687_v24  ;;  %v7830_v22 = vsel %vm2558_vm14, -50000.0, %v7689_v44  ;;  %vm2752_vm7 = vcmp.eq.s32.totalorder %v2524_v26, %v2727_v36 }
 0x232   : > { %v2071_v34 = vpop.f32.mrf.mxu0  ;;  %v2108_v6 = vpop.f32.mrf.mxu1  ;;  %v2806_v24 = vsel %vm2772_vm3, %v7818_v20, -inf  ;;  %v2673_v18 = vcombine.high %v2657_v52, %v2657_v52  ;;  %vm5477_vm13 = vcmask 195584   ;;  %vm5097_vm14 = vcmask 261120  }
 0x233   : > { %v7788_v13 = vsel %vm2747_vm8, -50000.0, %v2108_v6  ;;  %vm2751_vm2 = vcmp.eq.s32.totalorder %v2517_v14, %v2723_v12  ;;  %v2538_v35 = vpop.permute.xlu1 %2537  ;;  %v2731_v14 = vrot.slane %v7641_v43, %v7205_v21 }
 0x234   : > { %v6103_v59 = vpop.f32.mrf.mxu0  ;;  %v6108_v9 = vpop.f32.mrf.mxu1  ;;  %v2842_v2 = vsel %vm2772_vm3, %v7788_v13, -inf  ;;  %vm2560_vm5 = vcmp.eq.s32.totalorder %v2538_v35, %v9289_v4  ;;  %v2735_v12 = vrot.slane %v2673_v18, %v7205_v21 }
 0x235   : > { %2798 = vmax.xlane.f32.xlu1 %v2797_v28  ;;  %2843 = vmax.xlane.f32.xlu0 %v2842_v2  ;;  %vm2753_vm8 = vcmp.eq.s32.totalorder %v2531_v19, %v2731_v14 }
 0x236   : > { %v2111_v55 = vpop.f32.mrf.mxu1  ;;  %v2148_v46 = vpop.f32.mrf.mxu0  ;;  %vm2754_vm10 = vcmp.eq.s32.totalorder %v2538_v35, %v2735_v12 }
 0x237   : > { %v7799_v41 = vsel %vm2748_vm11, -50000.0, %v2148_v46 }
 0x238   : > { %v6109_v51 = vpop.f32.mrf.mxu1  ;;  %v6114_v38 = vpop.f32.mrf.mxu0  ;;  %v2845_v61 = vsel %vm2772_vm3, %v7799_v41, -inf }
 0x239   : > { %2846 = vmax.xlane.f32.xlu1 %v2845_v61  ;;  %2801 = vmax.xlane.f32.xlu0 %v2800_v30  ;;  %v2809_v51 = vsel %vm2772_vm3, %v7830_v22, -inf  ;;  %v7843_v38 = vsel %vm2559_vm4, -50000.0, %v7695_v40  ;;  %v2675_v40 = vcombine.high %v7641_v43, %v7641_v43  ;;  %vm5483_vm4 = vcmask 457728  }
 0x23a   : > { %v2151_v25 = vpop.f32.mrf.mxu0  ;;  %v2188_v60 = vpop.f32.mrf.mxu1 }
 0x23b   : > { %v7810_v27 = vsel %vm2749_vm12, -50000.0, %v2188_v60  ;;  %v2545_v25 = vpop.permute.xlu0 %2544  ;;  %vm3240_vm12 = vcmask 1043456  }
 0x23c   : > { %v6115_v17 = vpop.f32.mrf.mxu0  ;;  %v6120_v5 = vpop.f32.mrf.mxu1  ;;  %v2848_v23 = vsel %vm2772_vm3, %v7810_v27, -inf  ;;  %vm2561_vm9 = vcmp.eq.s32.totalorder %v2545_v25, %v9290_v15 }
 0x23d   : > { %2804 = vmax.xlane.f32.xlu1 %v2803_v0  ;;  %2849 = vmax.xlane.f32.xlu0 %v2848_v23  ;;  %v2812_v5 = vsel %vm2772_vm3, %v7843_v38, -inf  ;;  %v7855_v0 = vsel %vm2560_vm5, -50000.0, %v7699_v3  ;;  %v2739_v3 = vrot.slane %v2675_v40, %v7205_v21  ;;  %vm5163_vm5 = vcmask 523264  }
 0x23e   : > { %v2191_v34 = vpop.f32.mrf.mxu1  ;;  %v2228_v6 = vpop.f32.mrf.mxu0  ;;  %v2815_v19 = vsel %vm2772_vm3, %v7855_v0, -inf }
 0x23f   : > { %v7823_v59 = vsel %vm2750_vm15, -50000.0, %v2228_v6  ;;  %vm2755_vm11 = vcmp.eq.s32.totalorder %v2545_v25, %v2739_v3  ;;  %vm5480_vm15 = vcmask 326656  }
 0x240   : > { %v6121_v9 = vpop.f32.mrf.mxu1  ;;  %v6126_v28 = vpop.f32.mrf.mxu0  ;;  %v2851_v2 = vsel %vm2772_vm3, %v7823_v59, -inf }
 0x241   : > { %2852 = vmax.xlane.f32.xlu1 %v2851_v2  ;;  %2807 = vmax.xlane.f32.xlu0 %v2806_v24  ;;  %v7867_v9 = vsel %vm2561_vm9, -50000.0, %v7702_v49  ;;  %vm5489_vm9 = vcmask 719872  }
 0x242   : > { %v2231_v48 = vpop.f32.mrf.mxu0  ;;  %v2268_v33 = vpop.f32.mrf.mxu1 }
 0x243   : > { %v7834_v55 = vsel %vm2751_vm2, -50000.0, %v2268_v33  ;;  %vm5130_vm2 = vcmask 392192  }
 0x244   : > { %v6127_v46 = vpop.f32.mrf.mxu0  ;;  %v6132_v10 = vpop.f32.mrf.mxu1  ;;  %v2854_v44 = vsel %vm2772_vm3, %v7834_v55, -inf }
 0x245   : > { %2810 = vmax.xlane.f32.xlu1 %v2809_v51  ;;  %2855 = vmax.xlane.f32.xlu0 %v2854_v44  ;;  %v2818_v46 = vsel %vm2772_vm3, %v7867_v9, -inf }
 0x246   : > { %v2271_v61 = vpop.f32.mrf.mxu1  ;;  %v2308_v30 = vpop.f32.mrf.mxu0 }
 0x247   : > { %v7846_v60 = vsel %vm2752_vm7, -50000.0, %v2308_v30  ;;  %vm5486_vm7 = vcmask 588800  }
 0x248   : > { %v6133_v39 = vpop.f32.mrf.mxu1  ;;  %v6138_v16 = vpop.f32.mrf.mxu0  ;;  %v2857_v17 = vsel %vm2772_vm3, %v7846_v60, -inf }
 0x249   : > { %2858 = vmax.xlane.f32.xlu1 %v2857_v17  ;;  %2813 = vmax.xlane.f32.xlu0 %v2812_v5 }
 0x24a   : > { %v2311_v26 = vpop.f32.mrf.mxu0  ;;  %v2348_v23 = vpop.f32.mrf.mxu1 }
 0x24b   : > { %v7859_v34 = vsel %vm2753_vm8, -50000.0, %v2348_v23  ;;  %vm5196_vm8 = vcmask 654336  }
 0x24c   : > { %v6139_v6 = vpop.f32.mrf.mxu0  ;;  %v6144_v52 = vpop.f32.mrf.mxu1  ;;  %v2860_v43 = vsel %vm2772_vm3, %v7859_v34, -inf }
 0x24d   : > { %2816 = vmax.xlane.f32.xlu1 %v2815_v19  ;;  %2861 = vmax.xlane.f32.xlu0 %v2860_v43 }
 0x24e   : > { %v2351_v28 = vpop.f32.mrf.mxu1  ;;  %v2388_v2 = vpop.f32.mrf.mxu0 }
 0x24f   : > { %v7869_v24 = vsel %vm2754_vm10, -50000.0, %v2388_v2  ;;  %vm5229_vm10 = vcmask 785408  }
 0x250   : > { %v6145_v48 = vpop.f32.mrf.mxu1  ;;  %v6150_v33 = vpop.f32.mrf.mxu0  ;;  %v2863_v36 = vsel %vm2772_vm3, %v7869_v24, -inf }
 0x251   : > { %2864 = vmax.xlane.f32.xlu1 %v2863_v36  ;;  %2819 = vmax.xlane.f32.xlu0 %v2818_v46 }
 0x252   : > { %v2391_v21 = vpop.f32.mrf.mxu0  ;;  %v2428_v10 = vpop.f32.mrf.mxu1 }
 0x253   : > { %v7875_v49 = vsel %vm2755_vm11, -50000.0, %v2428_v10  ;;  %vm5492_vm11 = vcmask 850944  }
 0x254   : > { %v6151_v51 = vpop.f32.mrf.mxu0  ;;  %v6156_v44 = vpop.f32.mrf.mxu1  ;;  %v2866_v35 = vsel %vm2772_vm3, %v7875_v49, -inf }
 0x255   : > { %2867 = vmax.xlane.f32.xlu0 %v2866_v35 }
 0x256   : > { %v2431_v14 = vpop.f32.mrf.mxu1 }
 0x258   : > { %v6157_v4 = vpop.f32.mrf.mxu1 }
 0x262   : > { %v2775_v30 = vpop.xlane.xlu1 %2774 }
 0x266   : > { %v2778_v61 = vpop.xlane.xlu0 %2777 }
 0x26a   : > { %v2781_v17 = vpop.xlane.xlu1 %2780 }
 0x2a2   : > { %v2823_v18 = vpop.xlane.xlu0 %2822 }
 0x2a3   : > { %v7879_v39 = vmax.f32 %v2775_v30, %v2823_v18 }
 0x2a5   : > { %v2885_v25 = vsub.f32 %v7649_v56, %v7879_v39  ;;  %v2933_v16 = vsub.f32 %v7707_v7, %v7879_v39 }
 0x2a6   : > { %v2826_v5 = vpop.xlane.xlu0 %2825 }
 0x2a7   : > { %v2901_v40 = vmul.f32 1.442695, %v2885_v25  ;;  %v2949_v26 = vmul.f32 1.442695, %v2933_v16  ;;  %v7885_v23 = vmax.f32 %v2778_v61, %v2826_v5 }
 0x2a9   : > { %6474 = vpow2.f32 %v2901_v40  ;;  %v2886_v12 = vsub.f32 %v7657_v11, %v7885_v23  ;;  %v2934_v15 = vsub.f32 %v7715_v45, %v7885_v23 }
 0x2aa   : > { %6476 = vpow2.f32 %v2949_v26  ;;  %v2829_v6 = vpop.xlane.xlu1 %2828  ;;  %v2784_v52 = vpop.xlane.xlu0 %2783 }
 0x2ab   : > { %v2903_v56 = vmul.f32 1.442695, %v2886_v12  ;;  %v2951_v19 = vmul.f32 1.442695, %v2934_v15  ;;  %v7891_v43 = vmax.f32 %v2781_v17, %v2829_v6 }
 0x2ad   : > { %6478 = vpow2.f32 %v2903_v56  ;;  %v2887_v7 = vsub.f32 %v7663_v31, %v7891_v43  ;;  %v2935_v3 = vsub.f32 %v7726_v54, %v7891_v43 }
 0x2ae   : > { %6480 = vpow2.f32 %v2951_v19  ;;  %v2787_v28 = vpop.xlane.xlu1 %2786  ;;  %v2832_v11 = vpop.xlane.xlu0 %2831 }
 0x2af   : > { %v2905_v2 = vmul.f32 1.442695, %v2887_v7  ;;  %v2953_v48 = vmul.f32 1.442695, %v2935_v3  ;;  %v7897_v45 = vmax.f32 %v2784_v52, %v2832_v11 }
 0x2b1   : > { %6482 = vpow2.f32 %v2905_v2  ;;  %v2888_v33 = vsub.f32 %v7720_v53, %v7897_v45  ;;  %v2936_v36 = vsub.f32 %v7738_v42, %v7897_v45 }
 0x2b2   : > { %6484 = vpow2.f32 %v2953_v48  ;;  %v2835_v46 = vpop.xlane.xlu1 %2834  ;;  %v2790_v31 = vpop.xlane.xlu0 %2789 }
 0x2b3   : > { %v2907_v21 = vmul.f32 1.442695, %v2888_v33  ;;  %v2955_v10 = vmul.f32 1.442695, %v2936_v36  ;;  %v7903_v54 = vmax.f32 %v2787_v28, %v2835_v46 }
 0x2b5   : > { %6486 = vpow2.f32 %v2907_v21  ;;  %v2889_v51 = vsub.f32 %v7734_v1, %v7903_v54  ;;  %v2937_v44 = vsub.f32 %v7749_v50, %v7903_v54 }
 0x2b6   : > { %v7909_v35 = vpop.eup %6474  ;;  %6488 = vpow2.f32 %v2955_v10  ;;  %v2793_v53 = vpop.xlane.xlu1 %2792 }
 0x2b7   : > { %9291 = vst [vmem:[#allocation24_spill] sm:$0xff] %v7909_v35  ;;  %v2838_v14 = vpop.xlane.xlu0 %2837  ;;  %v7911_v42 = vpop.eup %6476  ;;  %v2909_v4 = vmul.f32 1.442695, %v2889_v51  ;;  %v2957_v61 = vmul.f32 1.442695, %v2937_v44  ;;  %v2981_v18 = vsel %vm2772_vm3, %v7909_v35, 0.0 }
 0x2b8   : > { %v7913_v30 = vmax.f32 %v2790_v31, %v2838_v14  ;;  %2982 = vadd.xlane.f32.xlu1 %v2981_v18  ;;  %v3029_v5 = vsel %vm2772_vm3, %v7911_v42, 0.0 }
 0x2b9   : > { %6490 = vpow2.f32 %v2909_v4 }
 0x2ba   : > { %v2890_v1 = vsub.f32 %v7746_v8, %v7913_v30  ;;  %v2938_v50 = vsub.f32 %v7764_v57, %v7913_v30  ;;  %v7921_v25 = vpop.eup %6478  ;;  %6492 = vpow2.f32 %v2957_v61  ;;  %v2841_v16 = vpop.xlane.xlu1 %2840 }
 0x2bb   : > { %9292 = vst [vmem:[#allocation23_spill] sm:$0xff] %v7921_v25  ;;  %v2796_v17 = vpop.xlane.xlu0 %2795  ;;  %v7925_v40 = vpop.eup %6480  ;;  %v7927_v15 = vmax.f32 %v2793_v53, %v2841_v16  ;;  %v2984_v8 = vsel %vm2772_vm3, %v7921_v25, 0.0 }
 0x2bc   : > { %v2911_v26 = vmul.f32 1.442695, %v2890_v1  ;;  %v2959_v12 = vmul.f32 1.442695, %v2938_v50  ;;  %3030 = vadd.xlane.f32.xlu1 %v3029_v5  ;;  %2985 = vadd.xlane.f32.xlu0 %v2984_v8  ;;  %v3032_v7 = vsel %vm2772_vm3, %v7925_v40, 0.0 }
 0x2bd   : > { %v2891_v57 = vsub.f32 %v7756_v32, %v7927_v15  ;;  %v2939_v6 = vsub.f32 %v7776_v58, %v7927_v15 }
 0x2be   : > { %6494 = vpow2.f32 %v2911_v26  ;;  %v7935_v52 = vpop.eup %6482  ;;  %v2799_v56 = vpop.xlane.xlu1 %2798 }
 0x2bf   : > { %9293 = vst [vmem:[#allocation26_spill] sm:$0xff] %v7935_v52  ;;  %6496 = vpow2.f32 %v2959_v12  ;;  %v2844_v19 = vpop.xlane.xlu0 %2843  ;;  %v7939_v3 = vpop.eup %6484  ;;  %v2913_v28 = vmul.f32 1.442695, %v2891_v57  ;;  %v2961_v11 = vmul.f32 1.442695, %v2939_v6  ;;  %v2987_v32 = vsel %vm2772_vm3, %v7935_v52, 0.0 }
 0x2c0   : > { %v7941_v2 = vmax.f32 %v2796_v17, %v2844_v19  ;;  %2988 = vadd.xlane.f32.xlu1 %v2987_v32  ;;  %3033 = vadd.xlane.f32.xlu0 %v3032_v7  ;;  %v3035_v31 = vsel %vm2772_vm3, %v7939_v3, 0.0 }
 0x2c1   : > { %6498 = vpow2.f32 %v2913_v28 }
 0x2c2   : > { %v2892_v58 = vsub.f32 %v7772_v63, %v7941_v2  ;;  %v2940_v48 = vsub.f32 %v7788_v13, %v7941_v2  ;;  %v7949_v33 = vpop.eup %6486  ;;  %6500 = vpow2.f32 %v2961_v11  ;;  %v2847_v36 = vpop.xlane.xlu1 %2846 }
 0x2c3   : > { %9294 = vst [vmem:[#allocation25_spill] sm:$0xff] %v7949_v33  ;;  %v2802_v46 = vpop.xlane.xlu0 %2801  ;;  %v7953_v21 = vpop.eup %6488  ;;  %v7955_v44 = vmax.f32 %v2799_v56, %v2847_v36  ;;  %v2990_v63 = vsel %vm2772_vm3, %v7949_v33, 0.0 }
 0x2c4   : > { %v2915_v10 = vmul.f32 1.442695, %v2892_v58  ;;  %v2963_v51 = vmul.f32 1.442695, %v2940_v48  ;;  %3036 = vadd.xlane.f32.xlu1 %v3035_v31  ;;  %2991 = vadd.xlane.f32.xlu0 %v2990_v63  ;;  %v3038_v18 = vsel %vm2772_vm3, %v7953_v21, 0.0 }
 0x2c5   : > { %v2893_v13 = vsub.f32 %v7784_v62, %v7955_v44  ;;  %v2941_v53 = vsub.f32 %v7799_v41, %v7955_v44 }
 0x2c6   : > { %6502 = vpow2.f32 %v2915_v10  ;;  %v7963_v14 = vpop.eup %6490  ;;  %v2805_v4 = vpop.xlane.xlu1 %2804 }
 0x2c7   : > { %9295 = vst [vmem:[#allocation27_spill] sm:$0xff] %v7963_v14  ;;  %6504 = vpow2.f32 %v2963_v51  ;;  %v2850_v61 = vpop.xlane.xlu0 %2849  ;;  %v7967_v1 = vpop.eup %6492  ;;  %v2917_v50 = vmul.f32 1.442695, %v2893_v13  ;;  %v2965_v16 = vmul.f32 1.442695, %v2941_v53  ;;  %v2993_v62 = vsel %vm2772_vm3, %v7963_v14, 0.0 }
 0x2c8   : > { %v7969_v17 = vmax.f32 %v2802_v46, %v2850_v61  ;;  %2994 = vadd.xlane.f32.xlu1 %v2993_v62  ;;  %3039 = vadd.xlane.f32.xlu0 %v3038_v18  ;;  %v3041_v57 = vsel %vm2772_vm3, %v7967_v1, 0.0 }
 0x2c9   : > { %6506 = vpow2.f32 %v2917_v50 }
 0x2ca   : > { %v2894_v41 = vsub.f32 %v7796_v29, %v7969_v17  ;;  %v2942_v5 = vsub.f32 %v7810_v27, %v7969_v17  ;;  %6508 = vpow2.f32 %v2965_v16  ;;  %v2853_v12 = vpop.xlane.xlu1 %2852 }
 0x2cb   : > { %v7977_v26 = vpop.eup %6494  ;;  %v2808_v8 = vpop.xlane.xlu0 %2807  ;;  %v7983_v7 = vmax.f32 %v2805_v4, %v2853_v12 }
 0x2cc   : > { %9296 = vst [vmem:[#allocation28_spill] sm:$0xff] %v7977_v26  ;;  %v7981_v6 = vpop.eup %6496  ;;  %v2919_v56 = vmul.f32 1.442695, %v2894_v41  ;;  %v2967_v19 = vmul.f32 1.442695, %v2942_v5  ;;  %v2996_v29 = vsel %vm2772_vm3, %v7977_v26, 0.0  ;;  %3042 = vadd.xlane.f32.xlu1 %v3041_v57 }
 0x2cd   : > { %2997 = vadd.xlane.f32.xlu0 %v2996_v29  ;;  %v2895_v27 = vsub.f32 %v7806_v47, %v7983_v7  ;;  %v2943_v28 = vsub.f32 %v7823_v59, %v7983_v7  ;;  %v3044_v48 = vsel %vm2772_vm3, %v7981_v6, 0.0  ;;  %v767_v57 = vld [vmem:[%s7029_s8] sm:$0xf]  ;;  %s5827_s8 = sshll.u32 %s6794_s27, 4  ;;  %s5507_s27 = scalar_lea.sflag [#allocation4], %s7008_s26 }
 0x2ce   : > { %6510 = vpow2.f32 %v2919_v56  ;;  %v7991_v11 = vpop.eup %6498  ;;  %v2811_v32 = vpop.xlane.xlu1 %2810  ;;  %s9006_s12 = scalar_lea.hbm %s9182_s7, %s5827_s8 }
 0x2cf   : > { %9297 = vst [vmem:[#allocation29_spill] sm:$0xff] %v7991_v11  ;;  %6512 = vpow2.f32 %v2967_v19  ;;  %v2856_v58 = vpop.xlane.xlu0 %2855  ;;  %v7995_v36 = vpop.eup %6500  ;;  %v2921_v46 = vmul.f32 1.442695, %v2895_v27  ;;  %v2969_v31 = vmul.f32 1.442695, %v2943_v28  ;;  %v2999_v47 = vsel %vm2772_vm3, %v7991_v11, 0.0 }
 0x2d0   : > { %v7997_v10 = vmax.f32 %v2808_v8, %v2856_v58  ;;  %3000 = vadd.xlane.f32.xlu1 %v2999_v47  ;;  %v3047_v4 = vsel %vm2772_vm3, %v7995_v36, 0.0  ;;  %v751_v47 = vld [vmem:[%s7026_s19] sm:$0xf] }
 0x2d1   : > { %3045 = vadd.xlane.f32.xlu0 %v3044_v48  ;;  %6514 = vpow2.f32 %v2921_v46 }
 0x2d2   : > { %v2896_v59 = vsub.f32 %v7818_v20, %v7997_v10  ;;  %v2944_v51 = vsub.f32 %v7834_v55, %v7997_v10  ;;  %6516 = vpow2.f32 %v2969_v31  ;;  %v2859_v13 = vpop.xlane.xlu1 %2858 }
 0x2d3   : > { %v8005_v63 = vpop.eup %6502  ;;  %v2814_v53 = vpop.xlane.xlu0 %2813  ;;  %v8011_v16 = vmax.f32 %v2811_v32, %v2859_v13 }
 0x2d4   : > { %9298 = vst [vmem:[#allocation30_spill] sm:$0xff] %v8005_v63  ;;  %v8009_v61 = vpop.eup %6504  ;;  %v2923_v18 = vmul.f32 1.442695, %v2896_v59  ;;  %v2971_v50 = vmul.f32 1.442695, %v2944_v51  ;;  %v3002_v20 = vsel %vm2772_vm3, %v8005_v63, 0.0  ;;  %3048 = vadd.xlane.f32.xlu1 %v3047_v4 }
 0x2d5   : > { %3003 = vadd.xlane.f32.xlu0 %v3002_v20  ;;  %v2897_v55 = vsub.f32 %v7830_v22, %v8011_v16  ;;  %v2945_v62 = vsub.f32 %v7846_v60, %v8011_v16  ;;  %v3050_v8 = vsel %vm2772_vm3, %v8009_v61, 0.0  ;;  %v3242_v60 = vsel %vm3240_vm12, %v767_v57, 0 }
 0x2d6   : > { %6518 = vpow2.f32 %v2923_v18  ;;  %v8019_v41 = vpop.eup %6506  ;;  %v2817_v5 = vpop.xlane.xlu1 %2816  ;;  %6159 = vmatpush3.bf16.msra.mxu0 %v3242_v60 }
 0x2d7   : > { %9299 = vst [vmem:[#allocation31_spill] sm:$0xff] %v8019_v41  ;;  %6520 = vpow2.f32 %v2971_v50  ;;  %v2862_v12 = vpop.xlane.xlu0 %2861  ;;  %v8024_v56 = vpop.eup %6508  ;;  %v2925_v19 = vmul.f32 1.442695, %v2897_v55  ;;  %v2973_v29 = vmul.f32 1.442695, %v2945_v62  ;;  %v3005_v22 = vsel %vm2772_vm3, %v8019_v41, 0.0  ;;  %6170 = vmatprep.subr.bf16.mxu0 %v9266_v37 }
 0x2d8   : > { %v8026_v27 = vmax.f32 %v2814_v53, %v2862_v12  ;;  %3006 = vadd.xlane.f32.xlu1 %v3005_v22  ;;  %v3053_v31 = vsel %vm2772_vm3, %v8024_v56, 0.0  ;;  %v8048_v53 = vsel %vm3240_vm12, %v751_v47, 0 }
 0x2d9   : > { %3051 = vadd.xlane.f32.xlu0 %v3050_v8  ;;  %6522 = vpow2.f32 %v2925_v19  ;;  %6165 = vmatpush3.bf16.msra.mxu1 %v8048_v53 }
 0x2da   : > { %v2898_v28 = vsub.f32 %v7843_v38, %v8026_v27  ;;  %v2946_v32 = vsub.f32 %v7859_v34, %v8026_v27  ;;  %6524 = vpow2.f32 %v2973_v29  ;;  %v2865_v48 = vpop.xlane.xlu1 %2864  ;;  %6176 = vmatprep.subr.bf16.mxu1 %v9266_v37 }
 0x2db   : > { %v8035_v58 = vpop.eup %6510  ;;  %v2820_v46 = vpop.xlane.xlu0 %2819  ;;  %v8043_v38 = vmax.f32 %v2817_v5, %v2865_v48 }
 0x2dc   : > { %9300 = vst [vmem:[#allocation32_spill] sm:$0xff] %v8035_v58  ;;  %v8041_v59 = vpop.eup %6512  ;;  %v2927_v51 = vmul.f32 1.442695, %v2898_v28  ;;  %v2975_v13 = vmul.f32 1.442695, %v2946_v32  ;;  %v3008_v34 = vsel %vm2772_vm3, %v8035_v58, 0.0  ;;  %3054 = vadd.xlane.f32.xlu1 %v3053_v31 }
 0x2dd   : > { %3009 = vadd.xlane.f32.xlu0 %v3008_v34  ;;  %v2899_v4 = vsub.f32 %v7855_v0, %v8043_v38  ;;  %v2947_v18 = vsub.f32 %v7869_v24, %v8043_v38  ;;  %v3056_v55 = vsel %vm2772_vm3, %v8041_v59, 0.0 }
 0x2de   : > { %6526 = vpow2.f32 %v2927_v51  ;;  %v8055_v50 = vpop.eup %6514 }
 0x2df   : > { %9301 = vst [vmem:[#allocation33_spill] sm:$0xff] %v8055_v50  ;;  %6528 = vpow2.f32 %v2975_v13  ;;  %v2868_v20 = vpop.xlane.xlu0 %2867  ;;  %v8060_v62 = vpop.eup %6516  ;;  %v2929_v5 = vmul.f32 1.442695, %v2899_v4  ;;  %v2977_v12 = vmul.f32 1.442695, %v2947_v18  ;;  %v3011_v0 = vsel %vm2772_vm3, %v8055_v50, 0.0 }
 0x2e0   : > { %v8062_v8 = vmax.f32 %v2820_v46, %v2868_v20  ;;  %3012 = vadd.xlane.f32.xlu1 %v3011_v0  ;;  %v3059_v29 = vsel %vm2772_vm3, %v8060_v62, 0.0 }
 0x2e1   : > { %3057 = vadd.xlane.f32.xlu0 %v3056_v55  ;;  %6530 = vpow2.f32 %v2929_v5 }
 0x2e2   : > { %v2900_v24 = vsub.f32 %v7867_v9, %v8062_v8  ;;  %v2948_v57 = vsub.f32 %v7875_v49, %v8062_v8  ;;  %6532 = vpow2.f32 %v2977_v12 }
 0x2e3   : > { %v8070_v19 = vpop.eup %6518 }
 0x2e4   : > { %9302 = vst [vmem:[#allocation34_spill] sm:$0xff] %v8070_v19  ;;  %v8074_v22 = vpop.eup %6520  ;;  %v2931_v60 = vmul.f32 1.442695, %v2900_v24  ;;  %v2979_v28 = vmul.f32 1.442695, %v2948_v57  ;;  %v3014_v32 = vsel %vm2772_vm3, %v8070_v19, 0.0  ;;  %3060 = vadd.xlane.f32.xlu1 %v3059_v29 }
 0x2e5   : > { %3015 = vadd.xlane.f32.xlu0 %v3014_v32  ;;  %v3062_v46 = vsel %vm2772_vm3, %v8074_v22, 0.0 }
 0x2e6   : > { %6534 = vpow2.f32 %v2931_v60  ;;  %v8078_v9 = vpop.eup %6522 }
 0x2e7   : > { %9303 = vst [vmem:[#allocation35_spill] sm:$0xff] %v8078_v9  ;;  %v8080_v48 = vpop.eup %6524  ;;  %6536 = vpow2.f32 %v2979_v28  ;;  %v3017_v49 = vsel %vm2772_vm3, %v8078_v9, 0.0  ;;  %v753_v9 = vld [vmem:[%s7026_s19 + $0x8] sm:$0xf] }
 0x2e8   : > { %3018 = vadd.xlane.f32.xlu1 %v3017_v49  ;;  %v3065_v51 = vsel %vm2772_vm3, %v8080_v48, 0.0 }
 0x2e9   : > { %3063 = vadd.xlane.f32.xlu0 %v3062_v46 }
 0x2eb   : > { %v8086_v31 = vpop.eup %6526 }
 0x2ec   : > { %9304 = vst [vmem:[#allocation36_spill] sm:$0xff] %v8086_v31  ;;  %v8088_v47 = vpop.eup %6528  ;;  %v3020_v13 = vsel %vm2772_vm3, %v8086_v31, 0.0  ;;  %3066 = vadd.xlane.f32.xlu1 %v3065_v51 }
 0x2ed   : > { %3021 = vadd.xlane.f32.xlu0 %v3020_v13  ;;  %v3068_v18 = vsel %vm2772_vm3, %v8088_v47, 0.0 }
 0x2ee   : > { %v8094_v34 = vpop.eup %6530 }
 0x2ef   : > { %9305 = vst [vmem:[#allocation37_spill] sm:$0xff] %v8094_v34  ;;  %v3023_v4 = vsel %vm2772_vm3, %v8094_v34, 0.0  ;;  %v8100_v20 = vpop.eup %6532 }
 0x2f0   : > { %3024 = vadd.xlane.f32.xlu1 %v3023_v4  ;;  %v3071_v5 = vsel %vm2772_vm3, %v8100_v20, 0.0 }
 0x2f1   : > { %3069 = vadd.xlane.f32.xlu0 %v3068_v18 }
 0x2f3   : > { %v8102_v55 = vpop.eup %6534 }
 0x2f4   : > { %9306 = vst [vmem:[#allocation38_spill] sm:$0xff] %v8102_v55  ;;  %v3026_v12 = vsel %vm2772_vm3, %v8102_v55, 0.0  ;;  %v8108_v0 = vpop.eup %6536  ;;  %3072 = vadd.xlane.f32.xlu1 %v3071_v5 }
 0x2f5   : > { %3027 = vadd.xlane.f32.xlu0 %v3026_v12  ;;  %v3074_v24 = vsel %vm2772_vm3, %v8108_v0, 0.0 }
 0x2f9   : > { %3075 = vadd.xlane.f32.xlu0 %v3074_v24 }
 0x341   : > { %v2983_v57 = vpop.xlane.xlu1 %2982 }
 0x345   : > { %v3031_v29 = vpop.xlane.xlu1 %3030  ;;  %v2986_v60 = vpop.xlane.xlu0 %2985 }
 0x346   : > { %v8112_v28 = vadd.f32 %v3031_v29, %v2983_v57 }
 0x348   : > { %6538 = vrcp.f32 %v8112_v28 }
 0x349   : > { %v2989_v32 = vpop.xlane.xlu1 %2988  ;;  %v3034_v49 = vpop.xlane.xlu0 %3033 }
 0x34a   : > { %v8115_v46 = vadd.f32 %v3034_v49, %v2986_v60  ;;  %v752_v49 = vld [vmem:[%s7026_s19 + $0x4] sm:$0xf] }
 0x34c   : > { %6540 = vrcp.f32 %v8115_v46 }
 0x34d   : > { %v3037_v51 = vpop.xlane.xlu1 %3036  ;;  %v2992_v13 = vpop.xlane.xlu0 %2991 }
 0x34e   : > { %v8118_v4 = vadd.f32 %v3037_v51, %v2989_v32 }
 0x350   : > { %6542 = vrcp.f32 %v8118_v4 }
 0x351   : > { %v2995_v18 = vpop.xlane.xlu1 %2994  ;;  %v3040_v5 = vpop.xlane.xlu0 %3039 }
 0x352   : > { %v8121_v12 = vadd.f32 %v3040_v5, %v2992_v13  ;;  %v8133_v13 = vsel %vm3240_vm12, %v752_v49, 0 }
 0x353   : > { %9308 = vst [vmem:[#allocation40_spill] sm:$0xff] %v8133_v13 }
 0x354   : > { %6544 = vrcp.f32 %v8121_v12 }
 0x355   : > { %v3043_v24 = vpop.xlane.xlu1 %3042  ;;  %v8124_v29 = vpop.eup %6538 }
 0x356   : > { %v2998_v57 = vpop.xlane.xlu0 %2997  ;;  %9307 = vst [vmem:[#allocation39_spill] sm:$0xff] %v8124_v29  ;;  %v8126_v60 = vadd.f32 %v3043_v24, %v2995_v18  ;;  %v3205_v32 = vmul.f32 %v8124_v29, %v7911_v42 }
 0x358   : > { %6546 = vrcp.f32 %v8126_v60  ;;  %v3221_v34 = vpack.c.bf16 %v3205_v32, %v3205_v32 }
 0x359   : > { %v3001_v51 = vpop.xlane.xlu1 %3000  ;;  %v8135_v5 = vpop.eup %6540 }
 0x35a   : > { %v3046_v55 = vpop.xlane.xlu0 %3045  ;;  %9309 = vst [vmem:[#allocation41_spill] sm:$0xff] %v8135_v5  ;;  %6161 = vmatmul.mubr.msk.bf16.vlgmr.msra.gmra.mxu0 %vm2772_vm3, %v3221_v34  ;;  %v3206_v18 = vmul.f32 %v8135_v5, %v7925_v40  ;;  %v754_v40 = vld [vmem:[%s7026_s19 + $0xc] sm:$0xf] }
 0x35b   : > { %v8137_v31 = vadd.f32 %v3046_v55, %v2998_v57  ;;  %6171 = vmatpush3.bf16.msra.mxu0 %v8133_v13  ;;  %6172 = vmatprep.mubr.msk.bf16.mxu0 %vm6811_vm1, %v9266_v37  ;;  %v8149_v55 = vsel %vm3240_vm12, %v753_v9, 0  ;;  %v8164_v50 = vsel %vm3240_vm12, %v754_v40, 0 }
 0x35c   : > { %v3222_v49 = vpack.c.bf16 %v3206_v18, %v3206_v18  ;;  %6182 = vmatprep.subr.bf16.mxu0 %v9266_v37  ;;  %9310 = vst [vmem:[#allocation42_spill] sm:$0xff] %v8149_v55  ;;  %9312 = vst [vmem:[#allocation44_spill] sm:$0xff] %v8164_v50 }
 0x35d   : > { %6548 = vrcp.f32 %v8137_v31  ;;  %v3049_v42 = vpop.xlane.xlu1 %3048  ;;  %v8151_v34 = vpop.eup %6542 }
 0x35e   : > { %v3004_v24 = vpop.xlane.xlu0 %3003  ;;  %9311 = vst [vmem:[#allocation43_spill] sm:$0xff] %v8151_v34  ;;  %v8153_v57 = vadd.f32 %v3049_v42, %v3001_v51  ;;  %6167 = vmatmul.mubr.msk.bf16.vlgmr.msra.gmra.mxu1 %vm2772_vm3, %v3222_v49  ;;  %v3207_v32 = vmul.f32 %v8151_v34, %v7939_v3  ;;  %v755_v3 = vld [vmem:[%s7026_s19 + $0x10] sm:$0xf] }
 0x35f   : > { %6177 = vmatpush3.bf16.msra.mxu1 %v8149_v55  ;;  %6178 = vmatprep.mubr.msk.bf16.mxu1 %vm6811_vm1, %v9266_v37  ;;  %v8178_v41 = vsel %vm3240_vm12, %v755_v3, 0 }
 0x360   : > { %6550 = vrcp.f32 %v8153_v57  ;;  %v3223_v19 = vpack.c.bf16 %v3207_v32, %v3207_v32  ;;  %6188 = vmatprep.subr.bf16.mxu1 %v9266_v37  ;;  %9314 = vst [vmem:[#allocation46_spill] sm:$0xff] %v8178_v41 }
 0x361   : > { %v3007_v9 = vpop.xlane.xlu1 %3006  ;;  %v8167_v51 = vpop.eup %6544 }
 0x362   : > { %v3052_v18 = vpop.xlane.xlu0 %3051  ;;  %9313 = vst [vmem:[#allocation45_spill] sm:$0xff] %v8167_v51  ;;  %6173 = vmatmul.mubr.msk.bf16.vlgmr.msra.gmra.mxu0 %vm2772_vm3, %v3223_v19  ;;  %v3208_v49 = vmul.f32 %v8167_v51, %v7953_v21 }
 0x363   : > { %v3084_v42 = vadd.f32 %v3052_v18, %v3004_v24  ;;  %6183 = vmatpush3.bf16.msra.mxu0 %v8164_v50  ;;  %6184 = vmatprep.mubr.msk.bf16.mxu0 %vm6811_vm1, %v9266_v37  ;;  %v756_v18 = vld [vmem:[%s7026_s19 + $0x14] sm:$0xf] }
 0x364   : > { %v3224_v58 = vpack.c.bf16 %v3208_v49, %v3208_v49  ;;  %6194 = vmatprep.subr.bf16.mxu0 %v9266_v37 }
 0x365   : > { %6552 = vrcp.f32 %v3084_v42  ;;  %v3055_v40 = vpop.xlane.xlu1 %3054  ;;  %v8180_v24 = vpop.eup %6546 }
 0x366   : > { %v3010_v32 = vpop.xlane.xlu0 %3009  ;;  %9315 = vst [vmem:[#allocation47_spill] sm:$0xff] %v8180_v24  ;;  %v3085_v19 = vadd.f32 %v3055_v40, %v3007_v9  ;;  %6179 = vmatmul.mubr.msk.bf16.vlgmr.msra.gmra.mxu1 %vm2772_vm3, %v3224_v58  ;;  %v3209_v21 = vmul.f32 %v8180_v24, %v7967_v1  ;;  %6554 = vlog2.f32 %v8112_v28  ;;  %v8191_v9 = vsel %vm3240_vm12, %v756_v18, 0  ;;  %v757_v28 = vld [vmem:[%s7026_s19 + $0x18] sm:$0xf] }
 0x367   : > { %6189 = vmatpush3.bf16.msra.mxu1 %v8178_v41  ;;  %6190 = vmatprep.mubr.msk.bf16.mxu1 %vm6811_vm1, %v9266_v37  ;;  %9316 = vst [vmem:[#allocation48_spill] sm:$0xff] %v8191_v9 }
 0x368   : > { %6556 = vrcp.f32 %v3085_v19  ;;  %v3225_v63 = vpack.c.bf16 %v3209_v21, %v3209_v21  ;;  %6200 = vmatprep.subr.bf16.mxu1 %v9266_v37  ;;  %v9320_v21 = vlaneseq }
 0x369   : > { %v3013_v3 = vpop.xlane.xlu1 %3012  ;;  %6558 = vlog2.f32 %v8115_v46 }
 0x36a   : > { %v3058_v49 = vpop.xlane.xlu0 %3057  ;;  %v8194_v58 = vpop.eup %6548  ;;  %6560 = vlog2.f32 %v8118_v4  ;;  %6185 = vmatmul.mubr.msk.bf16.vlgmr.msra.gmra.mxu0 %vm2772_vm3, %v3225_v63  ;;  %v8208_v4 = vsel %vm3240_vm12, %v757_v28, 0 }
 0x36b   : > { %9317 = vst [vmem:[#allocation49_spill] sm:$0xff] %v8194_v58  ;;  %v3086_v1 = vadd.f32 %v3058_v49, %v3010_v32  ;;  %v3210_v40 = vmul.f32 %v8194_v58, %v7981_v6  ;;  %6562 = vlog2.f32 %v8121_v12  ;;  %6195 = vmatpush3.bf16.msra.mxu0 %v8191_v9  ;;  %6196 = vmatprep.mubr.msk.bf16.mxu0 %vm6811_vm1, %v9266_v37  ;;  %9318 = vst [vmem:[#allocation50_spill] sm:$0xff] %v8208_v4  ;;  %v758_v49 = vld [vmem:[%s7026_s19 + $0x1c] sm:$0xf] }
 0x36c   : > { %6206 = vmatprep.subr.bf16.mxu0 %v9266_v37  ;;  %v8213_v6 = vand.u32 127, %v9320_v21  ;;  %v759_v21 = vld [vmem:[%s7026_s19 + $0x20] sm:$0xf] }
 0x36d   : > { %6564 = vrcp.f32 %v3086_v1  ;;  %v3061_v18 = vpop.xlane.xlu1 %3060  ;;  %v3226_v32 = vpack.c.bf16 %v3210_v40, %v3210_v40  ;;  %v8210_v63 = vpop.eup %6550 }
 0x36e   : > { %v3016_v46 = vpop.xlane.xlu0 %3015  ;;  %9319 = vst [vmem:[#allocation51_spill] sm:$0xff] %v8210_v63  ;;  %6566 = vlog2.f32 %v8126_v60  ;;  %v3087_v12 = vadd.f32 %v3061_v18, %v3013_v3  ;;  %v3211_v40 = vmul.f32 %v8210_v63, %v7995_v36  ;;  %v8222_v28 = vadd.s32 4294967288, %v8213_v6  ;;  %v9323_v63 = vld [vmem:[#allocation22_spill] sm:$0xff] }
 0x36f   : > { %6568 = vlog2.f32 %v8137_v31  ;;  %6191 = vmatmul.mubr.msk.bf16.vlgmr.msra.gmra.mxu1 %vm2772_vm3, %v3226_v32  ;;  %v8229_v18 = vsel %vm3240_vm12, %v758_v49, 0  ;;  %v8260_v11 = vadd.s32 4294967264, %v8213_v6  ;;  %v8263_v49 = vadd.s32 4294967256, %v8213_v6 }
 0x370   : > { %6570 = vlog2.f32 %v8153_v57  ;;  %6201 = vmatpush3.bf16.msra.mxu1 %v8208_v4  ;;  %6202 = vmatprep.mubr.msk.bf16.mxu1 %vm6811_vm1, %v9266_v37  ;;  %v3227_v31 = vpack.c.bf16 %v3211_v40, %v3211_v40  ;;  %9321 = vst [vmem:[#allocation52_spill] sm:$0xff] %v8229_v18  ;;  %v8243_v40 = vadd.s32 4294967280, %v8213_v6  ;;  %v8267_v58 = vadd.s32 4294967248, %v8213_v6 }
 0x371   : > { %6572 = vrcp.f32 %v3087_v12  ;;  %v3019_v60 = vpop.xlane.xlu1 %3018  ;;  %6212 = vmatprep.subr.bf16.mxu1 %v9266_v37  ;;  %v8297_v14 = vadd.s32 4294967216, %v8213_v6  ;;  %v8300_v41 = vadd.s32 4294967208, %v8213_v6  ;;  %v8360_v5 = vadd.s32 4294967184, %v8213_v6 }
 0x372   : > { %v3064_v3 = vpop.xlane.xlu0 %3063  ;;  %v8232_v36 = vpop.eup %6552  ;;  %6574 = vlog2.f32 %v3084_v42  ;;  %6197 = vmatmul.mubr.msk.bf16.vlgmr.msra.gmra.mxu0 %vm2772_vm3, %v3227_v31  ;;  %v8255_v31 = vsel %vm3240_vm12, %v759_v21, 0 }
 0x373   : > { %9322 = vst [vmem:[#allocation53_spill] sm:$0xff] %v8232_v36  ;;  %v3088_v32 = vadd.f32 %v3064_v3, %v3016_v46  ;;  %6576 = vlog2.f32 %v3085_v19  ;;  %v3212_v57 = vmul.f32 %v8232_v36, %v8009_v61  ;;  %6207 = vmatpush3.bf16.msra.mxu0 %v8229_v18  ;;  %6208 = vmatprep.mubr.msk.bf16.mxu0 %vm6811_vm1, %v9266_v37  ;;  %v8248_v42 = vpop.eup %6554  ;;  %v8251_v61 = vadd.s32 4294967272, %v8213_v6  ;;  %v760_v18 = vld [vmem:[%s7026_s19 + $0x24] sm:$0xf] }
 0x374   : > { %6578 = vlog2.f32 %v3086_v1  ;;  %6218 = vmatprep.subr.bf16.mxu0 %v9266_v37  ;;  %9324 = vst [vmem:[#allocation22_spill] sm:$0xff] %v8255_v31  ;;  %v3094_v55 = vmul.f32 0.6931472, %v8248_v42 }
 0x375   : > { %6580 = vrcp.f32 %v3088_v32  ;;  %v3067_v19 = vpop.xlane.xlu1 %3066  ;;  %v3228_v3 = vpack.c.bf16 %v3212_v57, %v3212_v57  ;;  %v8257_v1 = vpop.eup %6556  ;;  %v8270_v57 = vadd.s32 4294967240, %v8213_v6 }
 0x376   : > { %v3022_v46 = vpop.xlane.xlu0 %3021  ;;  %9325 = vst [vmem:[#allocation54_spill] sm:$0xff] %v8257_v1  ;;  %6582 = vlog2.f32 %v3087_v12  ;;  %v3089_v36 = vadd.f32 %v3067_v19, %v3019_v60  ;;  %v6559_v4 = vpop.eup %6558  ;;  %v3213_v21 = vmul.f32 %v8257_v1, %v8024_v56  ;;  %v8278_v12 = vadd.s32 4294967232, %v8213_v6 }
 0x377   : > { %6584 = vlog2.f32 %v3088_v32  ;;  %6203 = vmatmul.mubr.msk.bf16.vlgmr.msra.gmra.mxu1 %vm2772_vm3, %v3228_v3  ;;  %v6561_v26 = vpop.eup %6560  ;;  %v8281_v60 = vadd.s32 4294967224, %v8213_v6  ;;  %v8289_v1 = vsel %vm3240_vm12, %v760_v18, 0  ;;  %v8317_v18 = vadd.s32 4294967200, %v8213_v6 }
 0x378   : > { %6586 = vlog2.f32 %v3089_v36  ;;  %6213 = vmatpush3.bf16.msra.mxu1 %v8255_v31  ;;  %6214 = vmatprep.mubr.msk.bf16.mxu1 %vm6811_vm1, %v9266_v37  ;;  %v6563_v32 = vpop.eup %6562  ;;  %v3229_v9 = vpack.c.bf16 %v3213_v21, %v3213_v21  ;;  %9326 = vst [vmem:[#allocation55_spill] sm:$0xff] %v8289_v1  ;;  %v761_v21 = vld [vmem:[%s7026_s19 + $0x28] sm:$0xf]  ;;  %v763_v31 = vld [vmem:[%s7026_s19 + $0x30] sm:$0xf] }
 0x379   : > { %6588 = vrcp.f32 %v3089_v36  ;;  %v3025_v19 = vpop.xlane.xlu1 %3024  ;;  %6224 = vmatprep.subr.bf16.mxu1 %v9266_v37  ;;  %v3098_v13 = vmul.f32 0.6931472, %v6561_v26  ;;  %v3100_v35 = vmul.f32 0.6931472, %v6563_v32  ;;  %v764_v26 = vld [vmem:[%s7026_s19 + $0x34] sm:$0xf] }
 0x37a   : > { %v3070_v3 = vpop.xlane.xlu0 %3069  ;;  %v8292_v24 = vpop.eup %6564  ;;  %6209 = vmatmul.mubr.msk.bf16.vlgmr.msra.gmra.mxu0 %vm2772_vm3, %v3229_v9  ;;  %v762_v9 = vld [vmem:[%s7026_s19 + $0x2c] sm:$0xf] }
 0x37b   : > { %9327 = vst [vmem:[#allocation56_spill] sm:$0xff] %v8292_v24  ;;  %v3090_v36 = vadd.f32 %v3070_v3, %v3022_v46  ;;  %v6567_v56 = vpop.eup %6566  ;;  %v3214_v33 = vmul.f32 %v8292_v24, %v8041_v59  ;;  %6219 = vmatpush3.bf16.msra.mxu0 %v8289_v1  ;;  %6220 = vmatprep.mubr.msk.bf16.mxu0 %vm6811_vm1, %v9266_v37  ;;  %v8325_v59 = vadd.s32 4294967192, %v8213_v6  ;;  %v8329_v3 = vsel %vm3240_vm12, %v761_v21, 0 }
 0x37c   : > { %v6569_v50 = vpop.eup %6568  ;;  %6230 = vmatprep.subr.bf16.mxu0 %v9266_v37  ;;  %9328 = vst [vmem:[#allocation57_spill] sm:$0xff] %v8329_v3  ;;  %v3096_v1 = vmul.f32 0.6931472, %v6559_v4  ;;  %v8341_v21 = vsel %vm3240_vm12, %v762_v9, 0  ;;  %v8344_v4 = vsel %vm3240_vm12, %v763_v31, 0 }
 0x37d   : > { %6590 = vlog2.f32 %v3090_v36  ;;  %v6571_v51 = vpop.eup %6570  ;;  %v3073_v46 = vpop.xlane.xlu1 %3072  ;;  %v3230_v34 = vpack.c.bf16 %v3214_v33, %v3214_v33 }
 0x37e   : > { %6592 = vrcp.f32 %v3090_v36  ;;  %v3028_v24 = vpop.xlane.xlu0 %3027  ;;  %v8331_v52 = vpop.eup %6572  ;;  %v3091_v25 = vadd.f32 %v3073_v46, %v3025_v19  ;;  %v3126_v9 = vadd.f32 %v3096_v1, %v7885_v23  ;;  %v3104_v19 = vmul.f32 0.6931472, %v6569_v50 }
 0x37f   : > { %9329 = vst [vmem:[#allocation58_spill] sm:$0xff] %v8331_v52  ;;  %v6575_v36 = vpop.eup %6574  ;;  %6215 = vmatmul.mubr.msk.bf16.vlgmr.msra.gmra.mxu1 %vm2772_vm3, %v3230_v34  ;;  %v3215_v33 = vmul.f32 %v8331_v52, %v8060_v62  ;;  %v3102_v34 = vmul.f32 0.6931472, %v6567_v56  ;;  %v3127_v56 = vadd.f32 %v3098_v13, %v7891_v43  ;;  %v3106_v31 = vmul.f32 0.6931472, %v6571_v51 }
 0x380   : > { %v6577_v29 = vpop.eup %6576  ;;  %6594 = vlog2.f32 %v3091_v25  ;;  %6225 = vmatpush3.bf16.msra.mxu1 %v8329_v3  ;;  %6226 = vmatprep.mubr.msk.bf16.mxu1 %vm6811_vm1, %v9266_v37  ;;  %v3125_v50 = vadd.f32 %v3094_v55, %v7879_v39  ;;  %v3128_v1 = vadd.f32 %v3100_v35, %v7897_v45  ;;  %v9330_v45 = vsub.s32 %v8222_v28, %v9323_v63 }
 0x381   : > { %v6579_v62 = vpop.eup %6578  ;;  %6596 = vrcp.f32 %v3091_v25  ;;  %v3231_v42 = vpack.c.bf16 %v3215_v33, %v3215_v33  ;;  %6236 = vmatprep.subr.bf16.mxu1 %v9266_v37  ;;  %v8367_v33 = vsel %vm3240_vm12, %v764_v26, 0  ;;  %v3129_v13 = vadd.f32 %v3102_v34, %v7903_v54 }
 0x382   : > { %v3076_v46 = vpop.xlane.xlu0 %3075  ;;  %v8356_v32 = vpop.eup %6580  ;;  %v5375_v35 = vrot.slane %v3126_v9, %v9330_v45  ;;  %v3130_v55 = vadd.f32 %v3104_v19, %v7913_v30  ;;  %v8383_v26 = vadd.s32 4294967176, %v8213_v6  ;;  %v9331_v54 = vsub.s32 %v8243_v40, %v9323_v63 }
 0x383   : > { %v3092_v52 = vadd.f32 %v3076_v46, %v3028_v24  ;;  %v6583_v3 = vpop.eup %6582  ;;  %6221 = vmatmul.mubr.msk.bf16.vlgmr.msra.gmra.mxu0 %vm2772_vm3, %v3231_v42  ;;  %v3216_v25 = vmul.f32 %v8356_v32, %v8074_v22  ;;  %v3108_v24 = vmul.f32 0.6931472, %v6575_v36  ;;  %v3110_v22 = vmul.f32 0.6931472, %v6577_v29 }
 0x384   : > { %v6585_v23 = vpop.eup %6584  ;;  %6231 = vmatpush3.bf16.msra.mxu0 %v8341_v21  ;;  %6232 = vmatprep.mubr.msk.bf16.mxu0 %vm6811_vm1, %v9266_v37  ;;  %v3112_v36 = vmul.f32 0.6931472, %v6579_v62  ;;  %v3131_v29 = vadd.f32 %v3106_v31, %v7927_v15  ;;  %v3114_v34 = vmul.f32 0.6931472, %v6583_v3  ;;  %v9332_v30 = vsub.s32 %v8213_v6, %v9323_v63 }
 0x385   : > { %6598 = vlog2.f32 %v3092_v52  ;;  %v6587_v43 = vpop.eup %6586  ;;  %v3232_v51 = vpack.c.bf16 %v3216_v25, %v3216_v25  ;;  %6242 = vmatprep.subr.bf16.mxu0 %v9266_v37  ;;  %v9333_v62 = vsub.s32 %v8251_v61, %v9323_v63  ;;  %v3132_v40 = vadd.f32 %v3108_v24, %v7941_v2  ;;  %v765_v61 = vld [vmem:[%s7026_s19 + $0x38] sm:$0xf] }
 0x386   : > { %6600 = vrcp.f32 %v3092_v52  ;;  %v8376_v39 = vpop.eup %6588  ;;  %v5382_v52 = vrot.slane %v3127_v56, %v9331_v54  ;;  %v5368_v19 = vrot.slane %v3125_v50, %v9332_v30  ;;  %v3116_v15 = vmul.f32 0.6931472, %v6585_v23 }
 0x387   : > { %6227 = vmatmul.mubr.msk.bf16.vlgmr.msra.gmra.mxu1 %vm2772_vm3, %v3232_v51  ;;  %v3217_v28 = vmul.f32 %v8376_v39, %v8080_v48  ;;  %v5389_v46 = vrot.slane %v3128_v1, %v9333_v62  ;;  %v9334_v48 = vsub.s32 %v8260_v11, %v9323_v63  ;;  %v3133_v6 = vadd.f32 %v3110_v22, %v7955_v44 }
 0x388   : > { %6237 = vmatpush3.bf16.msra.mxu1 %v8344_v4  ;;  %6238 = vmatprep.mubr.msk.bf16.mxu1 %vm6811_vm1, %v9266_v37  ;;  %v3118_v42 = vmul.f32 0.6931472, %v6587_v43  ;;  %v5475_v56 = vsel %vm2772_vm3, %v5368_v19, %v5375_v35  ;;  %v9335_v25 = vsub.s32 %v8263_v49, %v9323_v63  ;;  %v3134_v50 = vadd.f32 %v3112_v36, %v7969_v17 }
 0x389   : > { %v5396_v31 = vrot.slane %v3129_v13, %v9334_v48  ;;  %v3233_v9 = vpack.c.bf16 %v3217_v28, %v3217_v28  ;;  %6248 = vmatprep.subr.bf16.mxu1 %v9266_v37  ;;  %v5476_v11 = vsel %vm817_vm0, %v5475_v56, %v5382_v52  ;;  %v9336_v44 = vsub.s32 %v8267_v58, %v9323_v63 }
 0x38a   : > { %v6591_v3 = vpop.eup %6590  ;;  %v5403_v23 = vrot.slane %v3130_v55, %v9335_v25  ;;  %v3135_v43 = vadd.f32 %v3114_v34, %v7983_v7  ;;  %v5478_v22 = vsel %vm5477_vm13, %v5476_v11, %v5389_v46  ;;  %v9337_v49 = vsub.s32 %v8270_v57, %v9323_v63 }
 0x38b   : > { %v8408_v2 = vpop.eup %6592  ;;  %v3120_v1 = vmul.f32 0.6931472, %v6591_v3  ;;  %v5410_v24 = vrot.slane %v3131_v29, %v9336_v44  ;;  %6233 = vmatmul.mubr.msk.bf16.vlgmr.msra.gmra.mxu0 %vm2772_vm3, %v3233_v9  ;;  %v3136_v51 = vadd.f32 %v3116_v15, %v7997_v10  ;;  %v8432_v7 = vsel %vm3240_vm12, %v765_v61, 0  ;;  %v9347_v44 = vld [vmem:[#allocation23_spill] sm:$0xff] }
 0x38c   : > { %v3218_v13 = vmul.f32 %v8408_v2, %v8088_v47  ;;  %v5417_v17 = vrot.slane %v3132_v40, %v9337_v49  ;;  %6243 = vmatpush3.bf16.msra.mxu0 %v8367_v33  ;;  %6244 = vmatprep.mubr.msk.bf16.mxu0 %vm6811_vm1, %v9266_v37  ;;  %v5479_v45 = vsel %vm5097_vm14, %v5478_v22, %v5396_v31  ;;  %vm5262_vm13 = vcmask 916480   ;;  %v9350_v49 = vld [vmem:[#allocation26_spill] sm:$0xff] }
 0x38d   : > { %v6595_v58 = vpop.eup %6594  ;;  %v9338_v47 = vsub.s32 %v8278_v12, %v9323_v63  ;;  %v3137_v57 = vadd.f32 %v3118_v42, %v8011_v16  ;;  %6254 = vmatprep.subr.bf16.mxu0 %v9266_v37  ;;  %v5481_v36 = vsel %vm5480_vm15, %v5479_v45, %v5403_v23  ;;  %v9339_v54 = vsub.s32 %v8281_v60, %v9323_v63 }
 0x38e   : > { %v3234_v55 = vpack.c.bf16 %v3218_v13, %v3218_v13  ;;  %v8440_v10 = vpop.eup %6596  ;;  %v3138_v29 = vadd.f32 %v3120_v1, %v8026_v27  ;;  %v3122_v34 = vmul.f32 0.6931472, %v6595_v58  ;;  %v5482_v28 = vsel %vm5130_vm2, %v5481_v36, %v5410_v24  ;;  %v9348_v24 = vld [vmem:[#allocation41_spill] sm:$0xff]  ;;  %v9349_v13 = vld [vmem:[#allocation42_spill] sm:$0xff]  ;;  %v9352_v58 = vld [vmem:[#allocation44_spill] sm:$0xff] }
 0x38f   : > { %v5424_v35 = vrot.slane %v3133_v6, %v9338_v47  ;;  %v5431_v52 = vrot.slane %v3134_v50, %v9339_v54  ;;  %v9340_v12 = vsub.s32 %v8297_v14, %v9323_v63  ;;  %v5465_v30 = vsub.s32 %v8360_v5, %v9323_v63  ;;  %v9353_v47 = vld [vmem:[#allocation25_spill] sm:$0xff]  ;;  %v9356_v54 = vld [vmem:[#allocation27_spill] sm:$0xff] }
 0x390   : > { %6239 = vmatmul.mubr.msk.bf16.vlgmr.msra.gmra.mxu1 %vm2772_vm3, %v3234_v55  ;;  %v3219_v19 = vmul.f32 %v8440_v10, %v8100_v20  ;;  %v5484_v60 = vsel %vm5483_vm4, %v5482_v28, %v5417_v17  ;;  %v9341_v27 = vsub.s32 %v8300_v41, %v9323_v63  ;;  %v3139_v46 = vadd.f32 %v3122_v34, %v8043_v38  ;;  %v9351_v17 = vld [vmem:[#allocation43_spill] sm:$0xff]  ;;  %v9355_v55 = vld [vmem:[#allocation46_spill] sm:$0xff]  ;;  %v9358_v34 = vld [vmem:[#allocation48_spill] sm:$0xff] }
 0x391   : > { %v5438_v16 = vrot.slane %v3135_v43, %v9340_v12  ;;  %6249 = vmatpush3.bf16.msra.mxu1 %v8432_v7  ;;  %6250 = vmatprep.mubr.msk.bf16.mxu1 %vm6811_vm1, %v9266_v37  ;;  %v5485_v5 = vsel %vm5163_vm5, %v5484_v60, %v5424_v35  ;;  %v9342_v20 = vsub.s32 %v8317_v18, %v9323_v63  ;;  %vm5495_vm15 = vcmask 982016   ;;  %v9354_v35 = vld [vmem:[#allocation45_spill] sm:$0xff]  ;;  %v9359_v12 = vld [vmem:[#allocation28_spill] sm:$0xff] }
 0x392   : > { %v5445_v62 = vrot.slane %v3136_v51, %v9341_v27  ;;  %v6599_v14 = vpop.eup %6598  ;;  %v3235_v15 = vpack.c.bf16 %v3219_v19, %v3219_v19  ;;  %6260 = vmatprep.subr.bf16.mxu1 %v9266_v37  ;;  %v5487_v38 = vsel %vm5486_vm7, %v5485_v5, %v5431_v52  ;;  %v9343_v3 = vsub.s32 %v8325_v59, %v9323_v63  ;;  %v9344_v59 = vld [vmem:[#allocation24_spill] sm:$0xff]  ;;  %v9357_v52 = vld [vmem:[#allocation47_spill] sm:$0xff]  ;;  %v9361_v19 = vld [vmem:[#allocation50_spill] sm:$0xff] }
 0x393   : > { %v5452_v40 = vrot.slane %v3137_v57, %v9342_v20  ;;  %v8469_v41 = vpop.eup %6600  ;;  %v5472_v31 = vsub.s32 %v8383_v26, %v9323_v63  ;;  %v3124_v6 = vmul.f32 0.6931472, %v6599_v14  ;;  %v5488_v42 = vsel %vm5196_vm8, %v5487_v38, %v5438_v16  ;;  %v9345_v26 = vld [vmem:[#allocation39_spill] sm:$0xff]  ;;  %v9360_v16 = vld [vmem:[#allocation49_spill] sm:$0xff]  ;;  %v9364_v14 = vld [vmem:[#allocation52_spill] sm:$0xff] }
 0x394   : > { %v5459_v48 = vrot.slane %v3138_v29, %v9343_v3  ;;  %v5466_v18 = vrot.slane %v3139_v46, %v5465_v30  ;;  %6245 = vmatmul.mubr.msk.bf16.vlgmr.msra.gmra.mxu0 %vm2772_vm3, %v3235_v15  ;;  %v3220_v9 = vmul.f32 %v8469_v41, %v8108_v0  ;;  %v5490_v61 = vsel %vm5489_vm9, %v5488_v42, %v5445_v62  ;;  %v9362_v27 = vld [vmem:[#allocation29_spill] sm:$0xff]  ;;  %v9363_v62 = vld [vmem:[#allocation51_spill] sm:$0xff]  ;;  %v9365_v20 = vld [vmem:[#allocation30_spill] sm:$0xff] }
 0x395   : > { %v3140_v56 = vadd.f32 %v3124_v6, %v8062_v8  ;;  %6255 = vmatpush3.bf16.msra.mxu0 %v8048_v53  ;;  %6256 = vmatprep.mubr.msk.bf16.mxu0 %vm6811_vm1, %v9266_v37  ;;  %v3173_v25 = vmul.f32 %v9345_v26, %v9344_v59  ;;  %v5491_v0 = vsel %vm5229_vm10, %v5490_v61, %v5452_v40  ;;  %v9346_v8 = vld [vmem:[#allocation40_spill] sm:$0xff]  ;;  %v9366_v40 = vld [vmem:[#allocation53_spill] sm:$0xff]  ;;  %v9367_v38 = vld [vmem:[#allocation22_spill] sm:$0xff] }
 0x396   : > { %v3236_v63 = vpack.c.bf16 %v3220_v9, %v3220_v9  ;;  %6266 = vmatprep.subr.bf16.mxu0 %v9266_v37  ;;  %v5493_v50 = vsel %vm5492_vm11, %v5491_v0, %v5459_v48  ;;  %v3174_v43 = vmul.f32 %v9348_v24, %v9347_v44  ;;  %v3175_v51 = vmul.f32 %v9351_v17, %v9350_v49  ;;  %v9368_v3 = vld [vmem:[#allocation31_spill] sm:$0xff]  ;;  %v9369_v48 = vld [vmem:[#allocation54_spill] sm:$0xff]  ;;  %v9372_v9 = vld [vmem:[#allocation56_spill] sm:$0xff] }
 0x397   : > { %v5473_v23 = vrot.slane %v3140_v56, %v5472_v31  ;;  %v5494_v53 = vsel %vm5262_vm13, %v5493_v50, %v5466_v18  ;;  %v3189_v11 = vpack.c.bf16 %v3173_v25, %v3173_v25  ;;  %v3176_v57 = vmul.f32 %v9354_v35, %v9353_v47  ;;  %v9370_v42 = vld [vmem:[#allocation55_spill] sm:$0xff]  ;;  %v9371_v18 = vld [vmem:[#allocation32_spill] sm:$0xff]  ;;  %v9374_v59 = vld [vmem:[#allocation33_spill] sm:$0xff] }
 0x398   : > { %6251 = vmatmul.mubr.msk.bf16.vlgmr.msra.gmra.mxu1 %vm2772_vm3, %v3236_v63  ;;  %v3190_v22 = vpack.c.bf16 %v3174_v43, %v3174_v43  ;;  %v3191_v45 = vpack.c.bf16 %v3175_v51, %v3175_v51  ;;  %v3177_v29 = vmul.f32 %v9357_v52, %v9356_v54  ;;  %v3178_v30 = vmul.f32 %v9360_v16, %v9359_v12  ;;  %v9373_v63 = vld [vmem:[#allocation57_spill] sm:$0xff]  ;;  %v9375_v26 = vld [vmem:[#allocation58_spill] sm:$0xff]  ;;  %v766_v44 = vld [vmem:[%s7026_s19 + $0x3c] sm:$0xf] }
 0x399   : > { %6261 = vmatpush3.bf16.msra.mxu1 %v9346_v8  ;;  %6262 = vmatprep.mubr.msk.bf16.mxu1 %vm6811_vm1, %v9266_v37  ;;  %v5496_v1 = vsel %vm5495_vm15, %v5494_v53, %v5473_v23  ;;  %v3192_v36 = vpack.c.bf16 %v3176_v57, %v3176_v57  ;;  %v3179_v46 = vmul.f32 %v9363_v62, %v9362_v27  ;;  %v9376_v23 = vld [vmem:[#allocation34_spill] sm:$0xff]  ;;  %v9377_v8 = vld [vmem:[#allocation35_spill] sm:$0xff]  ;;  %v4623_v43 = vsel %vm3240_vm12, %v766_v44, 0 }
 0x39a   : > { %6272 = vmatprep.subr.bf16.mxu1 %v9266_v37  ;;  %5497 = vst [vmem:[%s648_s21] sm:$0x1] %v5496_v1  ;;  %v3193_v28 = vpack.c.bf16 %v3177_v29, %v3177_v29  ;;  %v3194_v60 = vpack.c.bf16 %v3178_v30, %v3178_v30  ;;  %v3180_v15 = vmul.f32 %v9366_v40, %v9365_v20 }
 0x39b   : > { %v3195_v5 = vpack.c.bf16 %v3179_v46, %v3179_v46  ;;  %v3181_v31 = vmul.f32 %v9369_v48, %v9368_v3  ;;  %v3182_v61 = vmul.f32 %v9372_v9, %v9371_v18  ;;  %v3183_v25 = vmul.f32 %v9375_v26, %v9374_v59 }
 0x39c   : > { %6257 = vmatmul.mubr.msk.bf16.vlgmr.msra.gmra.mxu0 %vm2772_vm3, %v3189_v11  ;;  %v3196_v6 = vpack.c.bf16 %v3180_v15, %v3180_v15  ;;  %v3184_v50 = vmul.f32 %v8356_v32, %v9376_v23  ;;  %v9378_v32 = vld [vmem:[#allocation36_spill] sm:$0xff] }
 0x39d   : > { %6267 = vmatpush3.bf16.msra.mxu0 %v9349_v13  ;;  %6268 = vmatprep.mubr.msk.bf16.mxu0 %vm6811_vm1, %v9266_v37  ;;  %v3197_v56 = vpack.c.bf16 %v3181_v31, %v3181_v31  ;;  %v3198_v0 = vpack.c.bf16 %v3182_v61, %v3182_v61  ;;  %v3199_v53 = vpack.c.bf16 %v3183_v25, %v3183_v25 }
 0x39e   : > { %6278 = vmatprep.subr.bf16.mxu0 %v9266_v37  ;;  %v3200_v1 = vpack.c.bf16 %v3184_v50, %v3184_v50  ;;  %v3186_v11 = vmul.f32 %v8408_v2, %v9378_v32  ;;  %v9380_v2 = vld [vmem:[#allocation38_spill] sm:$0xff] }
 0x39f   : > { %v3188_v13 = vmul.f32 %v8469_v41, %v9380_v2 }
 0x3a0   : > { %6263 = vmatmul.mubr.msk.bf16.vlgmr.msra.gmra.mxu1 %vm2772_vm3, %v3190_v22  ;;  %v3202_v24 = vpack.c.bf16 %v3186_v11, %v3186_v11 }
 0x3a1   : > { %6273 = vmatpush3.bf16.msra.mxu1 %v9352_v58  ;;  %6274 = vmatprep.mubr.msk.bf16.mxu1 %vm6811_vm1, %v9266_v37 }
 0x3a2   : > { %6284 = vmatprep.subr.bf16.mxu1 %v9266_v37 }
 0x3a4   : > { %6269 = vmatmul.mubr.msk.bf16.vlgmr.msra.gmra.mxu0 %vm2772_vm3, %v3191_v45 }
 0x3a5   : > { %6279 = vmatpush3.bf16.msra.mxu0 %v9355_v55  ;;  %6280 = vmatprep.mubr.msk.bf16.mxu0 %vm6811_vm1, %v9266_v37 }
 0x3a6   : > { %6290 = vmatprep.subr.bf16.mxu0 %v9266_v37 }
 0x3a8   : > { %6275 = vmatmul.mubr.msk.bf16.vlgmr.msra.gmra.mxu1 %vm2772_vm3, %v3192_v36 }
 0x3a9   : > { %6285 = vmatpush3.bf16.msra.mxu1 %v9358_v34  ;;  %6286 = vmatprep.mubr.msk.bf16.mxu1 %vm6811_vm1, %v9266_v37 }
 0x3aa   : > { %6296 = vmatprep.subr.bf16.mxu1 %v9266_v37 }
 0x3ac   : > { %6281 = vmatmul.mubr.msk.bf16.vlgmr.msra.gmra.mxu0 %vm2772_vm3, %v3193_v28 }
 0x3ad   : > { %6291 = vmatpush3.bf16.msra.mxu0 %v9361_v19  ;;  %6292 = vmatprep.mubr.msk.bf16.mxu0 %vm6811_vm1, %v9266_v37 }
 0x3ae   : > { %6302 = vmatprep.subr.bf16.mxu0 %v9266_v37 }
 0x3b0   : > { %6287 = vmatmul.mubr.msk.bf16.vlgmr.msra.gmra.mxu1 %vm2772_vm3, %v3194_v60 }
 0x3b1   : > { %6297 = vmatpush3.bf16.msra.mxu1 %v9364_v14  ;;  %6298 = vmatprep.mubr.msk.bf16.mxu1 %vm6811_vm1, %v9266_v37 }
 0x3b2   : > { %6308 = vmatprep.subr.bf16.mxu1 %v9266_v37 }
 0x3b4   : > { %6293 = vmatmul.mubr.msk.bf16.vlgmr.msra.gmra.mxu0 %vm2772_vm3, %v3195_v5 }
 0x3b5   : > { %6303 = vmatpush3.bf16.msra.mxu0 %v9367_v38  ;;  %6304 = vmatprep.mubr.msk.bf16.mxu0 %vm6811_vm1, %v9266_v37 }
 0x3b6   : > { %6314 = vmatprep.subr.bf16.mxu0 %v9266_v37 }
 0x3b8   : > { %6299 = vmatmul.mubr.msk.bf16.vlgmr.msra.gmra.mxu1 %vm2772_vm3, %v3196_v6 }
 0x3b9   : > { %6309 = vmatpush3.bf16.msra.mxu1 %v9370_v42  ;;  %6310 = vmatprep.mubr.msk.bf16.mxu1 %vm6811_vm1, %v9266_v37 }
 0x3ba   : > { %6320 = vmatprep.subr.bf16.mxu1 %v9266_v37 }
 0x3bc   : > { %6305 = vmatmul.mubr.msk.bf16.vlgmr.msra.gmra.mxu0 %vm2772_vm3, %v3197_v56 }
 0x3bd   : > { %6315 = vmatpush3.bf16.msra.mxu0 %v9373_v63  ;;  %6316 = vmatprep.mubr.msk.bf16.mxu0 %vm6811_vm1, %v9266_v37 }
 0x3be   : > { %6326 = vmatprep.subr.bf16.mxu0 %v9266_v37 }
 0x3c0   : > { %6311 = vmatmul.mubr.msk.bf16.vlgmr.msra.gmra.mxu1 %vm2772_vm3, %v3198_v0 }
 0x3c1   : > { %6321 = vmatpush3.bf16.msra.mxu1 %v8341_v21  ;;  %6322 = vmatprep.mubr.msk.bf16.mxu1 %vm6811_vm1, %v9266_v37  ;;  %v3185_v21 = vmul.f32 %v8376_v39, %v9377_v8  ;;  %v9379_v39 = vld [vmem:[#allocation37_spill] sm:$0xff] }
 0x3c2   : > { %6332 = vmatprep.subr.bf16.mxu1 %v9266_v37 }
 0x3c4   : > { %6317 = vmatmul.mubr.msk.bf16.vlgmr.msra.gmra.mxu0 %vm2772_vm3, %v3199_v53 }
 0x3c5   : > { %6327 = vmatpush3.bf16.msra.mxu0 %v8344_v4  ;;  %6328 = vmatprep.mubr.msk.bf16.mxu0 %vm6811_vm1, %v9266_v37  ;;  %v3201_v4 = vpack.c.bf16 %v3185_v21, %v3185_v21 }
 0x3c6   : > { %6338 = vmatprep.subr.bf16.mxu0 %v9266_v37 }
 0x3c8   : > { %6323 = vmatmul.mubr.msk.bf16.vlgmr.msra.gmra.mxu1 %vm2772_vm3, %v3200_v1 }
 0x3c9   : > { %6333 = vmatpush3.bf16.msra.mxu1 %v8367_v33  ;;  %6334 = vmatprep.mubr.msk.bf16.mxu1 %vm6811_vm1, %v9266_v37  ;;  %v3187_v33 = vmul.f32 %v8440_v10, %v9379_v39 }
 0x3ca   : > { %6344 = vmatprep.subr.bf16.mxu1 %v9266_v37 }
 0x3cb   : > { %v3203_v22 = vpack.c.bf16 %v3187_v33, %v3187_v33 }
 0x3cc   : > { %6329 = vmatmul.mubr.msk.bf16.vlgmr.msra.gmra.mxu0 %vm2772_vm3, %v3201_v4 }
 0x3cd   : > { %6339 = vmatpush3.bf16.msra.mxu0 %v8432_v7  ;;  %6340 = vmatprep.mubr.msk.bf16.mxu0 %vm6811_vm1, %v9266_v37  ;;  %v3204_v7 = vpack.c.bf16 %v3188_v13, %v3188_v13 }
 0x3d0   : > { %6335 = vmatmul.mubr.msk.bf16.vlgmr.msra.gmra.mxu1 %vm2772_vm3, %v3202_v24 }
 0x3d1   : > { %6345 = vmatpush3.bf16.msra.mxu1 %v4623_v43  ;;  %6346 = vmatprep.mubr.msk.bf16.mxu1 %vm6811_vm1, %v9266_v37  ;;  %vm5312_vm1 = vsmask.f32 256 }
 0x3d4   : > { %6341 = vmatmul.mubr.msk.bf16.vlgmr.msra.gmra.mxu0 %vm2772_vm3, %v3203_v22 }
 0x3d8   : > { %6347 = vmatmul.mubr.msk.bf16.vlgmr.msra.gmra.mxu1 %vm2772_vm3, %v3204_v7  ;;  %vm8843_vm3 = vmand %vm1037_vm6, %vm5312_vm1 }
 0x41a   : > { %v8600_v49 = vpop.f32.mrf.mxu0 }
 0x41c   : > { %v6162_v10 = vpop.f32.mrf.mxu0 }
 0x41e   : > { %v3281_v17 = vpop.f32.mrf.mxu0  ;;  %v8602_v51 = vpop.f32.mrf.mxu1 }
 0x420   : > { %v6163_v58 = vpop.f32.mrf.mxu0  ;;  %v6168_v45 = vpop.f32.mrf.mxu1 }
 0x422   : > { %v3327_v47 = vpop.f32.mrf.mxu1  ;;  %v8604_v35 = vpop.f32.mrf.mxu0 }
 0x424   : > { %v6169_v37 = vpop.f32.mrf.mxu1  ;;  %v6174_v57 = vpop.f32.mrf.mxu0 }
 0x426   : > { %v3373_v41 = vpop.f32.mrf.mxu0  ;;  %v8606_v55 = vpop.f32.mrf.mxu1 }
 0x428   : > { %v6175_v36 = vpop.f32.mrf.mxu0  ;;  %v6180_v54 = vpop.f32.mrf.mxu1 }
 0x42a   : > { %v3419_v52 = vpop.f32.mrf.mxu1  ;;  %v8608_v29 = vpop.f32.mrf.mxu0 }
 0x42c   : > { %v6181_v34 = vpop.f32.mrf.mxu1  ;;  %v6186_v28 = vpop.f32.mrf.mxu0 }
 0x42e   : > { %v3465_v12 = vpop.f32.mrf.mxu0 }
 0x42f   : > { %v8610_v16 = vpop.f32.mrf.mxu1 }
 0x430   : > { %v6187_v30 = vpop.f32.mrf.mxu0 }
 0x431   : > { %v6192_v19 = vpop.f32.mrf.mxu1 }
 0x432   : > { %v8612_v27 = vpop.f32.mrf.mxu0 }
 0x433   : > { %v3511_v60 = vpop.f32.mrf.mxu1 }
 0x434   : > { %v6198_v46 = vpop.f32.mrf.mxu0 }
 0x435   : > { %v6193_v62 = vpop.f32.mrf.mxu1 }
 0x436   : > { %v3557_v14 = vpop.f32.mrf.mxu0 }
 0x437   : > { %v8614_v5 = vpop.f32.mrf.mxu1 }
 0x438   : > { %v6199_v20 = vpop.f32.mrf.mxu0 }
 0x439   : > { %v6204_v40 = vpop.f32.mrf.mxu1 }
 0x43a   : > { %v8616_v38 = vpop.f32.mrf.mxu0 }
 0x43b   : > { %v3603_v15 = vpop.f32.mrf.mxu1 }
 0x43c   : > { %v6210_v48 = vpop.f32.mrf.mxu0 }
 0x43d   : > { %v6205_v3 = vpop.f32.mrf.mxu1 }
 0x43e   : > { %v3649_v31 = vpop.f32.mrf.mxu0 }
 0x43f   : > { %v8618_v6 = vpop.f32.mrf.mxu1 }
 0x440   : > { %v6211_v42 = vpop.f32.mrf.mxu0 }
 0x441   : > { %v6216_v18 = vpop.f32.mrf.mxu1 }
 0x443   : > { %v3695_v9 = vpop.f32.mrf.mxu1  ;;  %v8620_v61 = vpop.f32.mrf.mxu0 }
 0x445   : > { %v6217_v56 = vpop.f32.mrf.mxu1  ;;  %v6222_v63 = vpop.f32.mrf.mxu0 }
 0x447   : > { %v3741_v59 = vpop.f32.mrf.mxu0  ;;  %v8622_v26 = vpop.f32.mrf.mxu1 }
 0x449   : > { %v6223_v25 = vpop.f32.mrf.mxu0  ;;  %v6228_v0 = vpop.f32.mrf.mxu1 }
 0x44b   : > { %v3787_v23 = vpop.f32.mrf.mxu1  ;;  %v8624_v50 = vpop.f32.mrf.mxu0 }
 0x44d   : > { %v6229_v53 = vpop.f32.mrf.mxu1  ;;  %v6234_v8 = vpop.f32.mrf.mxu0 }
 0x44f   : > { %v3833_v21 = vpop.f32.mrf.mxu0 }
 0x450   : > { %v8626_v1 = vpop.f32.mrf.mxu1 }
 0x451   : > { %v6235_v32 = vpop.f32.mrf.mxu0 }
 0x452   : > { %v6240_v11 = vpop.f32.mrf.mxu1 }
 0x454   : > { %v3879_v4 = vpop.f32.mrf.mxu1  ;;  %v8628_v44 = vpop.f32.mrf.mxu0 }
 0x456   : > { %v6241_v39 = vpop.f32.mrf.mxu1  ;;  %v6246_v33 = vpop.f32.mrf.mxu0 }
 0x458   : > { %v3925_v24 = vpop.f32.mrf.mxu0  ;;  %v8630_v43 = vpop.f32.mrf.mxu1 }
 0x45a   : > { %v6247_v2 = vpop.f32.mrf.mxu0  ;;  %v6252_v13 = vpop.f32.mrf.mxu1 }
 0x45c   : > { %v3971_v22 = vpop.f32.mrf.mxu1  ;;  %v4011_v7 = vpop.f32.mrf.mxu0 }
 0x45d   : > { %v4012_v10 = vadd.f32 %v4011_v7, %v8600_v49 }
 0x45e   : > { %v6253_v17 = vpop.f32.mrf.mxu1  ;;  %v6258_v58 = vpop.f32.mrf.mxu0 }
 0x45f   : > { %v8633_v45 = vpack.c.bf16 %v4012_v10, %v4012_v10 }
 0x460   : > { %v4014_v47 = vpop.f32.mrf.mxu0  ;;  %v4054_v37 = vpop.f32.mrf.mxu1 }
 0x461   : > { %v4055_v57 = vadd.f32 %v4054_v37, %v8602_v51  ;;  %v4682_v41 = vshrl.u32 %v8633_v45, 16  ;;  %v4777_v49 = vrot.slane %v8633_v45, 1  ;;  %v4873_v62 = vrot.slane %v8633_v45, 2 }
 0x462   : > { %v6259_v36 = vpop.f32.mrf.mxu0  ;;  %v6264_v54 = vpop.f32.mrf.mxu1  ;;  %v4969_v3 = vrot.slane %v8633_v45, 3 }
 0x463   : > { %v8637_v52 = vpack.c.bf16 %v4055_v57, %v4055_v57  ;;  %4729 = vrot.lane.b32.xlu1 %v4682_v41, %s6813_s0  ;;  %v4825_v56 = vrot.slane %v4682_v41, 1  ;;  %v4921_v21 = vrot.slane %v4682_v41, 2  ;;  %v5017_v2 = vrot.slane %v4682_v41, 3 }
 0x464   : > { %v4057_v34 = vpop.f32.mrf.mxu1  ;;  %v4097_v28 = vpop.f32.mrf.mxu0 }
 0x465   : > { %v8642_v12 = vshrl.u32 %v8637_v52, 16  ;;  %v4778_v46 = vrot.slane %v8637_v52, 1  ;;  %v4874_v48 = vrot.slane %v8637_v52, 2  ;;  %v4970_v63 = vrot.slane %v8637_v52, 3 }
 0x466   : > { %v6265_v30 = vpop.f32.mrf.mxu1  ;;  %v6270_v19 = vpop.f32.mrf.mxu0  ;;  %v4098_v53 = vadd.f32 %v4097_v28, %v8604_v35 }
 0x467   : > { %4793 = vrot.lane.b32.xlu1 %v4777_v49, %s6814_s17  ;;  %4731 = vrot.lane.b32.xlu0 %v8642_v12, %s6813_s0  ;;  %v4826_v32 = vrot.slane %v8642_v12, 1 }
 0x468   : > { %v4100_v51 = vpop.f32.mrf.mxu0  ;;  %v4140_v60 = vpop.f32.mrf.mxu1  ;;  %v8671_v24 = vpack.c.bf16 %v4098_v53, %v4098_v53 }
 0x469   : > { %v4141_v35 = vadd.f32 %v4140_v60, %v8606_v55  ;;  %v5018_v55 = vrot.slane %v8642_v12, 3 }
 0x46a   : > { %v6271_v14 = vpop.f32.mrf.mxu0  ;;  %v6276_v20 = vpop.f32.mrf.mxu1  ;;  %v8683_v47 = vshrl.u32 %v8671_v24, 16 }
 0x46b   : > { %4889 = vrot.lane.b32.xlu1 %v4873_v62, %s6815_s18  ;;  %4795 = vrot.lane.b32.xlu0 %v4778_v46, %s6814_s17  ;;  %v8677_v17 = vpack.c.bf16 %v4141_v35, %v4141_v35 }
 0x46c   : > { %v4143_v40 = vpop.f32.mrf.mxu1  ;;  %v8651_v15 = vpop.f32.mrf.mxu0  ;;  %v4923_v35 = vrot.slane %v8683_v47, 2 }
 0x46d   : > { %v4691_v34 = vshrl.u32 %v8677_v17, 16  ;;  %v4876_v51 = vrot.slane %v8677_v17, 2  ;;  %v4972_v40 = vrot.slane %v8677_v17, 3 }
 0x46e   : > { %v6277_v31 = vpop.f32.mrf.mxu1  ;;  %v6282_v42 = vpop.f32.mrf.mxu0 }
 0x46f   : > { %4985 = vrot.lane.b32.xlu1 %v4969_v3, %s6816_s16  ;;  %4891 = vrot.lane.b32.xlu0 %v4874_v48, %s6815_s18 }
 0x470   : > { %v4186_v18 = vpop.f32.mrf.mxu0  ;;  %v8657_v9 = vpop.f32.mrf.mxu1 }
 0x472   : > { %v6283_v59 = vpop.f32.mrf.mxu0  ;;  %v6288_v25 = vpop.f32.mrf.mxu1 }
 0x473   : > { %4841 = vrot.lane.b32.xlu1 %v4825_v56, %s6817_s24  ;;  %4987 = vrot.lane.b32.xlu0 %v4970_v63, %s6816_s16  ;;  %v4971_v56 = vrot.slane %v8671_v24, 3  ;;  %v4828_v63 = vrot.slane %v4691_v34, 1 }
 0x474   : > { %v4229_v0 = vpop.f32.mrf.mxu1  ;;  %v4269_v23 = vpop.f32.mrf.mxu0 }
 0x475   : > { %v8664_v8 = vadd.f32 %v4269_v23, %v8612_v27  ;;  %v4922_v27 = vrot.slane %v8642_v12, 2  ;;  %v4227_v23 = vadd.f32 %v8657_v9, %v8610_v16  ;;  %v5020_v9 = vrot.slane %v4691_v34, 3 }
 0x476   : > { %v6289_v11 = vpop.f32.mrf.mxu1  ;;  %v6294_v4 = vpop.f32.mrf.mxu0 }
 0x477   : > { %4937 = vrot.lane.b32.xlu1 %v4921_v21, %s6818_s29  ;;  %4843 = vrot.lane.b32.xlu0 %v4826_v32, %s6817_s24  ;;  %v4924_v21 = vrot.slane %v4691_v34, 2  ;;  %v8727_v16 = vpack.c.bf16 %v4227_v23, %v4227_v23 }
 0x478   : > { %v4272_v39 = vpop.f32.mrf.mxu0  ;;  %v8669_v33 = vpop.f32.mrf.mxu1 }
 0x47a   : > { %v6295_v13 = vpop.f32.mrf.mxu0  ;;  %v6300_v22 = vpop.f32.mrf.mxu1 }
 0x47b   : > { %5033 = vrot.lane.b32.xlu1 %v5017_v2, %s6819_s20  ;;  %4939 = vrot.lane.b32.xlu0 %v4922_v27, %s6818_s29  ;;  %v4184_v2 = vadd.f32 %v8651_v15, %v8608_v29  ;;  %v5019_v29 = vrot.slane %v8683_v47, 3  ;;  %v4697_v15 = vshrl.u32 %v8727_v16, 16 }
 0x47c   : > { %v4315_v7 = vpop.f32.mrf.mxu1  ;;  %v4355_v10 = vpop.f32.mrf.mxu0 }
 0x47d   : > { %v8680_v58 = vadd.f32 %v4355_v10, %v8616_v38  ;;  %v4780_v38 = vrot.slane %v8677_v17, 1  ;;  %v8734_v10 = vpack.c.bf16 %v4184_v2, %v4184_v2 }
 0x47e   : > { %v6301_v37 = vpop.f32.mrf.mxu1  ;;  %v6306_v57 = vpop.f32.mrf.mxu0 }
 0x47f   : > { %4733 = vrot.lane.b32.xlu1 %v8683_v47, %s6813_s0  ;;  %5035 = vrot.lane.b32.xlu0 %v5018_v55, %s6819_s20  ;;  %v8798_v23 = vpack.c.bf16 %v8680_v58, %v8680_v58 }
 0x480   : > { %v4358_v41 = vpop.f32.mrf.mxu0  ;;  %v4398_v36 = vpop.f32.mrf.mxu1 }
 0x481   : > { %v8690_v54 = vadd.f32 %v4398_v36, %v8618_v6  ;;  %v4779_v6 = vrot.slane %v8671_v24, 1  ;;  %v4694_v41 = vshrl.u32 %v8734_v10, 16  ;;  %v4782_v36 = vrot.slane %v8727_v16, 1 }
 0x482   : > { %v6307_v28 = vpop.f32.mrf.mxu0  ;;  %v6312_v49 = vpop.f32.mrf.mxu1  ;;  %v4785_v58 = vrot.slane %v8798_v23, 1 }
 0x483   : > { %4799 = vrot.lane.b32.xlu0 %v4780_v38, %s6814_s17  ;;  %4735 = vrot.lane.b32.xlu1 %v4691_v34, %s6813_s0  ;;  %v4877_v34 = vrot.slane %v8734_v10, 2  ;;  %v4974_v28 = vrot.slane %v8727_v16, 3  ;;  %v4973_v49 = vrot.slane %v8734_v10, 3 }
 0x484   : > { %v4401_v12 = vpop.f32.mrf.mxu1  ;;  %v4441_v30 = vpop.f32.mrf.mxu0 }
 0x485   : > { %v8697_v19 = vadd.f32 %v4441_v30, %v8620_v61  ;;  %v4875_v61 = vrot.slane %v8671_v24, 2  ;;  %v4830_v12 = vrot.slane %v4697_v15, 1  ;;  %v4313_v30 = vadd.f32 %v8669_v33, %v8614_v5 }
 0x486   : > { %v6313_v60 = vpop.f32.mrf.mxu1  ;;  %v6318_v62 = vpop.f32.mrf.mxu0 }
 0x487   : > { %4895 = vrot.lane.b32.xlu0 %v4876_v51, %s6815_s18  ;;  %4797 = vrot.lane.b32.xlu1 %v4779_v6, %s6814_s17  ;;  %v4829_v51 = vrot.slane %v4694_v41, 1  ;;  %v4926_v6 = vrot.slane %v4697_v15, 2  ;;  %v8762_v60 = vpack.c.bf16 %v4313_v30, %v4313_v30  ;;  %v4925_v62 = vrot.slane %v4694_v41, 2 }
 0x488   : > { %v4444_v46 = vpop.f32.mrf.mxu0  ;;  %v4484_v14 = vpop.f32.mrf.mxu1 }
 0x489   : > { %v8704_v20 = vadd.f32 %v4484_v14, %v8622_v26  ;;  %v5022_v46 = vrot.slane %v4697_v15, 3  ;;  %v8768_v14 = vpack.c.bf16 %v8664_v8, %v8664_v8  ;;  %v4703_v5 = vshrl.u32 %v8762_v60, 16 }
 0x48a   : > { %v6319_v3 = vpop.f32.mrf.mxu0  ;;  %v6324_v48 = vpop.f32.mrf.mxu1  ;;  %v4880_v8 = vrot.slane %v8762_v60, 2 }
 0x48b   : > { %4991 = vrot.lane.b32.xlu0 %v4972_v40, %s6816_s16  ;;  %4893 = vrot.lane.b32.xlu1 %v4875_v61, %s6815_s18  ;;  %v5021_v40 = vrot.slane %v4694_v41, 3  ;;  %v4700_v33 = vshrl.u32 %v8768_v14, 16  ;;  %v4784_v61 = vrot.slane %v8762_v60, 1  ;;  %v4783_v3 = vrot.slane %v8768_v14, 1 }
 0x48c   : > { %v4487_v31 = vpop.f32.mrf.mxu1  ;;  %v4527_v42 = vpop.f32.mrf.mxu0  ;;  %v4879_v48 = vrot.slane %v8768_v14, 2 }
 0x48d   : > { %v8711_v18 = vadd.f32 %v4527_v42, %v8624_v50  ;;  %v4827_v50 = vrot.slane %v8683_v47, 1  ;;  %v4878_v47 = vrot.slane %v8727_v16, 2  ;;  %v4976_v31 = vrot.slane %v8762_v60, 3 }
 0x48e   : > { %v6325_v26 = vpop.f32.mrf.mxu1  ;;  %v6330_v59 = vpop.f32.mrf.mxu0  ;;  %v4975_v42 = vrot.slane %v8768_v14, 3 }
 0x48f   : > { %4989 = vrot.lane.b32.xlu1 %v4971_v56, %s6816_s16  ;;  %4847 = vrot.lane.b32.xlu0 %v4828_v63, %s6817_s24  ;;  %v4832_v56 = vrot.slane %v4703_v5, 1  ;;  %v4831_v63 = vrot.slane %v4700_v33, 1  ;;  %v4928_v26 = vrot.slane %v4703_v5, 2  ;;  %v8792_v59 = vpack.c.bf16 %v8690_v54, %v8690_v54 }
 0x490   : > { %v4530_v25 = vpop.f32.mrf.mxu0  ;;  %v4570_v0 = vpop.f32.mrf.mxu1  ;;  %v4706_v54 = vshrl.u32 %v8798_v23, 16 }
 0x491   : > { %v8719_v53 = vadd.f32 %v4570_v0, %v8626_v1  ;;  %v4927_v25 = vrot.slane %v4700_v33, 2  ;;  %v5024_v0 = vrot.slane %v4703_v5, 3 }
 0x492   : > { %v6331_v32 = vpop.f32.mrf.mxu0  ;;  %v6336_v11 = vpop.f32.mrf.mxu1 }
 0x493   : > { %4845 = vrot.lane.b32.xlu1 %v4827_v50, %s6817_s24  ;;  %4943 = vrot.lane.b32.xlu0 %v4924_v21, %s6818_s29  ;;  %v5023_v50 = vrot.slane %v4700_v33, 3  ;;  %v4709_v21 = vshrl.u32 %v8792_v59, 16  ;;  %v4786_v11 = vrot.slane %v8792_v59, 1 }
 0x494   : > { %v4573_v4 = vpop.f32.mrf.mxu1  ;;  %v4613_v39 = vpop.f32.mrf.mxu0 }
 0x495   : > { %v8730_v1 = vadd.f32 %v4613_v39, %v8628_v44 }
 0x496   : > { %v6337_v27 = vpop.f32.mrf.mxu1  ;;  %v6342_v13 = vpop.f32.mrf.mxu0 }
 0x497   : > { %4941 = vrot.lane.b32.xlu1 %v4923_v35, %s6818_s29  ;;  %5039 = vrot.lane.b32.xlu0 %v5020_v9, %s6819_s20  ;;  %v4882_v35 = vrot.slane %v8792_v59, 2  ;;  %v4881_v27 = vrot.slane %v8798_v23, 2  ;;  %v4978_v13 = vrot.slane %v8792_v59, 3 }
 0x498   : > { %v4616_v22 = vpop.f32.mrf.mxu0  ;;  %v4659_v7 = vpop.f32.mrf.mxu1 }
 0x499   : > { %v8737_v55 = vadd.f32 %v4659_v7, %v8630_v43  ;;  %v4781_v43 = vrot.slane %v8734_v10, 1 }
 0x49a   : > { %v6343_v44 = vpop.f32.mrf.mxu0  ;;  %v6348_v37 = vpop.f32.mrf.mxu1 }
 0x49b   : > { %5037 = vrot.lane.b32.xlu1 %v5019_v29, %s6819_s20  ;;  %4739 = vrot.lane.b32.xlu0 %v4697_v15, %s6813_s0  ;;  %v4977_v29 = vrot.slane %v8798_v23, 3  ;;  %v4834_v15 = vrot.slane %v4709_v21, 1 }
 0x49c   : > { %v4662_v57 = vpop.f32.mrf.mxu1 }
 0x49e   : > { %v6349_v38 = vpop.f32.mrf.mxu1 }
 0x49f   : > { %4737 = vrot.lane.b32.xlu1 %v4694_v41, %s6813_s0  ;;  %4803 = vrot.lane.b32.xlu0 %v4782_v36, %s6814_s17  ;;  %v4833_v36 = vrot.slane %v4706_v54, 1  ;;  %v4930_v38 = vrot.slane %v4709_v21, 2 }
 0x4a3   : > { %4801 = vrot.lane.b32.xlu1 %v4781_v43, %s6814_s17  ;;  %4899 = vrot.lane.b32.xlu0 %v4878_v47, %s6815_s18 }
 0x4a7   : > { %4897 = vrot.lane.b32.xlu1 %v4877_v34, %s6815_s18  ;;  %4995 = vrot.lane.b32.xlu0 %v4974_v28, %s6816_s16  ;;  %v4929_v34 = vrot.slane %v4706_v54, 2 }
 0x4ab   : > { %4993 = vrot.lane.b32.xlu1 %v4973_v49, %s6816_s16  ;;  %4851 = vrot.lane.b32.xlu0 %v4830_v12, %s6817_s24 }
 0x4af   : > { %4849 = vrot.lane.b32.xlu1 %v4829_v51, %s6817_s24  ;;  %4947 = vrot.lane.b32.xlu0 %v4926_v6, %s6818_s29  ;;  %v5026_v51 = vrot.slane %v4709_v21, 3 }
 0x4b3   : > { %4945 = vrot.lane.b32.xlu1 %v4925_v62, %s6818_s29  ;;  %5043 = vrot.lane.b32.xlu0 %v5022_v46, %s6819_s20  ;;  %v5314_v62 = vld [vmem:[%s8830_s23] sm:$0x1]  ;;  %v5025_v46 = vrot.slane %v4706_v54, 3 }
 0x4b7   : > { %5041 = vrot.lane.b32.xlu1 %v5021_v40, %s6819_s20  ;;  %4743 = vrot.lane.b32.xlu0 %v4703_v5, %s6813_s0  ;;  %v8850_v40 = vpack.c.bf16 %v8697_v19, %v8697_v19  ;;  %v5317_v19 = vld [vmem:[%s8830_s23 + $0x1] sm:$0x1] }
 0x4bb   : > { %4741 = vrot.lane.b32.xlu1 %v4700_v33, %s6813_s0  ;;  %4807 = vrot.lane.b32.xlu0 %v4784_v61, %s6814_s17 }
 0x4bf   : > { %4805 = vrot.lane.b32.xlu1 %v4783_v3, %s6814_s17  ;;  %4903 = vrot.lane.b32.xlu0 %v4880_v8, %s6815_s18 }
 0x4c3   : > { %4901 = vrot.lane.b32.xlu1 %v4879_v48, %s6815_s18  ;;  %4999 = vrot.lane.b32.xlu0 %v4976_v31, %s6816_s16 }
 0x4c7   : > { %4997 = vrot.lane.b32.xlu1 %v4975_v42, %s6816_s16  ;;  %4855 = vrot.lane.b32.xlu0 %v4832_v56, %s6817_s24 }
 0x4cb   : > { %4853 = vrot.lane.b32.xlu1 %v4831_v63, %s6817_s24  ;;  %4951 = vrot.lane.b32.xlu0 %v4928_v26, %s6818_s29 }
 0x4cf   : > { %4949 = vrot.lane.b32.xlu1 %v4927_v25, %s6818_s29  ;;  %5047 = vrot.lane.b32.xlu0 %v5024_v0, %s6819_s20  ;;  %v4712_v25 = vshrl.u32 %v8850_v40, 16 }
 0x4d3   : > { %5045 = vrot.lane.b32.xlu1 %v5023_v50, %s6819_s20  ;;  %4747 = vrot.lane.b32.xlu0 %v4709_v21, %s6813_s0 }
 0x4d5   : > { %v4730_v32 = vpop.permute.xlu1 %4729 }
 0x4d6   : > { %v5066_v44 = vsel %vm817_vm0, %v8633_v45, %v4730_v32  ;;  %v8834_v45 = vpack.c.bf16 %v8704_v20, %v8704_v20 }
 0x4d7   : > { %4745 = vrot.lane.b32.xlu1 %v4706_v54, %s6813_s0  ;;  %4811 = vrot.lane.b32.xlu0 %v4786_v11, %s6814_s17  ;;  %v4787_v11 = vrot.slane %v8850_v40, 1 }
 0x4d8   : > { %v4715_v8 = vshrl.u32 %v8834_v45, 16  ;;  %v4788_v0 = vrot.slane %v8834_v45, 1 }
 0x4d9   : > { %v4794_v4 = vpop.permute.xlu1 %4793  ;;  %v4732_v39 = vpop.permute.xlu0 %4731 }
 0x4da   : > { %v5099_v37 = vsel %vm5097_vm14, %v5066_v44, %v4794_v4  ;;  %v5068_v47 = vsel %vm817_vm0, %v8637_v52, %v4732_v39  ;;  %v4884_v4 = vrot.slane %v8834_v45, 2 }
 0x4db   : > { %4809 = vrot.lane.b32.xlu1 %v4785_v58, %s6814_s17  ;;  %4907 = vrot.lane.b32.xlu0 %v4882_v35, %s6815_s18  ;;  %v4883_v35 = vrot.slane %v8850_v40, 2 }
 0x4dd   : > { %v4890_v2 = vpop.permute.xlu1 %4889  ;;  %v4796_v9 = vpop.permute.xlu0 %4795 }
 0x4de   : > { %v5101_v28 = vsel %vm5097_vm14, %v5068_v47, %v4796_v9 }
 0x4df   : > { %4905 = vrot.lane.b32.xlu1 %v4881_v27, %s6815_s18  ;;  %5003 = vrot.lane.b32.xlu0 %v4978_v13, %s6816_s16  ;;  %v4979_v13 = vrot.slane %v8850_v40, 3 }
 0x4e1   : > { %v4986_v22 = vpop.permute.xlu1 %4985  ;;  %v4892_v7 = vpop.permute.xlu0 %4891 }
 0x4e3   : > { %5001 = vrot.lane.b32.xlu1 %v4977_v29, %s6816_s16  ;;  %4859 = vrot.lane.b32.xlu0 %v4834_v15, %s6817_s24 }
 0x4e5   : > { %v4842_v57 = vpop.permute.xlu1 %4841  ;;  %v4988_v41 = vpop.permute.xlu0 %4987 }
 0x4e6   : > { %v5132_v43 = vsel %vm5130_vm2, %v5099_v37, %v4842_v57  ;;  %v4835_v37 = vrot.slane %v4712_v25, 1  ;;  %v4932_v57 = vrot.slane %v4715_v8, 2 }
 0x4e7   : > { %4857 = vrot.lane.b32.xlu1 %v4833_v36, %s6817_s24  ;;  %4955 = vrot.lane.b32.xlu0 %v4930_v38, %s6818_s29  ;;  %v5165_v49 = vsel %vm5163_vm5, %v5132_v43, %v4890_v2  ;;  %v4980_v2 = vrot.slane %v8834_v45, 3  ;;  %v4931_v36 = vrot.slane %v4712_v25, 2  ;;  %v8893_v38 = vpack.c.bf16 %v8719_v53, %v8719_v53 }
 0x4e8   : > { %v5027_v53 = vrot.slane %v4712_v25, 3 }
 0x4e9   : > { %v4938_v12 = vpop.permute.xlu1 %4937  ;;  %v4844_v30 = vpop.permute.xlu0 %4843 }
 0x4ea   : > { %v5198_v52 = vsel %vm5196_vm8, %v5165_v49, %v4938_v12  ;;  %v5134_v6 = vsel %vm5130_vm2, %v5101_v28, %v4844_v30  ;;  %v5028_v49 = vrot.slane %v4715_v8, 3 }
 0x4eb   : > { %4953 = vrot.lane.b32.xlu1 %v4929_v34, %s6818_s29  ;;  %5051 = vrot.lane.b32.xlu0 %v5026_v51, %s6819_s20  ;;  %v5231_v5 = vsel %vm5229_vm10, %v5198_v52, %v4986_v22  ;;  %v5167_v61 = vsel %vm5163_vm5, %v5134_v6, %v4892_v7  ;;  %v4836_v22 = vrot.slane %v4715_v8, 1  ;;  %v8904_v51 = vpack.c.bf16 %v8711_v18, %v8711_v18  ;;  %v5320_v18 = vld [vmem:[%s8830_s23 + $0x2] sm:$0x1] }
 0x4ed   : > { %v5034_v33 = vpop.permute.xlu1 %5033  ;;  %v4940_v3 = vpop.permute.xlu0 %4939 }
 0x4ee   : > { %v5264_v48 = vsel %vm5262_vm13, %v5231_v5, %v5034_v33  ;;  %v5200_v31 = vsel %vm5196_vm8, %v5167_v61, %v4940_v3  ;;  %v4721_v5 = vshrl.u32 %v8893_v38, 16 }
 0x4ef   : > { %v5315_v42 = vsel %vm8843_vm3, %v5264_v48, %v5314_v62  ;;  %5049 = vrot.lane.b32.xlu1 %v5025_v46, %s6819_s20  ;;  %4751 = vrot.lane.b32.xlu0 %v4715_v8, %s6813_s0  ;;  %v5233_v63 = vsel %vm5229_vm10, %v5200_v31, %v4988_v41 }
 0x4f0   : > { %5316 = vst [vmem:[%s8830_s23] sm:$0x1] %v5315_v42  ;;  %v4718_v42 = vshrl.u32 %v8904_v51, 16 }
 0x4f1   : > { %v4734_v56 = vpop.permute.xlu1 %4733  ;;  %v5036_v26 = vpop.permute.xlu0 %5035 }
 0x4f2   : > { %v5267_v50 = vsel %vm5262_vm13, %v5233_v63, %v5036_v26 }
 0x4f3   : > { %v5318_v21 = vsel %vm8843_vm3, %v5267_v50, %v5317_v19  ;;  %4749 = vrot.lane.b32.xlu1 %v4712_v25, %s6813_s0  ;;  %4815 = vrot.lane.b32.xlu0 %v4788_v0, %s6814_s17  ;;  %v4790_v19 = vrot.slane %v8893_v38, 1  ;;  %v4789_v0 = vrot.slane %v8904_v51, 1  ;;  %v4886_v50 = vrot.slane %v8893_v38, 2 }
 0x4f4   : > { %5319 = vst [vmem:[%s8830_s23 + $0x1] sm:$0x1] %v5318_v21 }
 0x4f5   : > { %v4800_v32 = vpop.permute.xlu0 %4799  ;;  %v4736_v54 = vpop.permute.xlu1 %4735 }
 0x4f6   : > { %v5072_v7 = vsel %vm817_vm0, %v8677_v17, %v4736_v54  ;;  %v5070_v17 = vsel %vm817_vm0, %v8671_v24, %v4734_v56  ;;  %v5323_v24 = vld [vmem:[%s8830_s23 + $0x3] sm:$0x1]  ;;  %v4885_v54 = vrot.slane %v8904_v51, 2 }
 0x4f7   : > { %4813 = vrot.lane.b32.xlu1 %v4787_v11, %s6814_s17  ;;  %4911 = vrot.lane.b32.xlu0 %v4884_v4, %s6815_s18  ;;  %v5105_v15 = vsel %vm5097_vm14, %v5072_v7, %v4800_v32  ;;  %v4982_v11 = vrot.slane %v8893_v38, 3  ;;  %v4934_v7 = vrot.slane %v4721_v5, 2 }
 0x4f9   : > { %v4896_v39 = vpop.permute.xlu0 %4895  ;;  %v4798_v58 = vpop.permute.xlu1 %4797 }
 0x4fa   : > { %v5103_v43 = vsel %vm5097_vm14, %v5070_v17, %v4798_v58  ;;  %v4981_v58 = vrot.slane %v8904_v51, 3 }
 0x4fb   : > { %4909 = vrot.lane.b32.xlu1 %v4883_v35, %s6815_s18  ;;  %5007 = vrot.lane.b32.xlu0 %v4980_v2, %s6816_s16  ;;  %v4838_v35 = vrot.slane %v4721_v5, 1 }
 0x4fd   : > { %v4992_v9 = vpop.permute.xlu0 %4991  ;;  %v4894_v27 = vpop.permute.xlu1 %4893 }
 0x4ff   : > { %5005 = vrot.lane.b32.xlu1 %v4979_v13, %s6816_s16  ;;  %4863 = vrot.lane.b32.xlu0 %v4836_v22, %s6817_s24  ;;  %v4837_v22 = vrot.slane %v4718_v42, 1 }
 0x501   : > { %v4990_v29 = vpop.permute.xlu1 %4989  ;;  %v4848_v44 = vpop.permute.xlu0 %4847 }
 0x502   : > { %v5138_v41 = vsel %vm5130_vm2, %v5105_v15, %v4848_v44  ;;  %v4933_v44 = vrot.slane %v4718_v42, 2 }
 0x503   : > { %4861 = vrot.lane.b32.xlu1 %v4835_v37, %s6817_s24  ;;  %4959 = vrot.lane.b32.xlu0 %v4932_v57, %s6818_s29  ;;  %v5171_v34 = vsel %vm5163_vm5, %v5138_v41, %v4896_v39 }
 0x505   : > { %v4846_v47 = vpop.permute.xlu1 %4845  ;;  %v4944_v28 = vpop.permute.xlu0 %4943 }
 0x506   : > { %v5136_v12 = vsel %vm5130_vm2, %v5103_v43, %v4846_v47  ;;  %v5204_v30 = vsel %vm5196_vm8, %v5171_v34, %v4944_v28  ;;  %v8958_v34 = vpack.c.bf16 %v8730_v1, %v8730_v1  ;;  %v5326_v1 = vld [vmem:[%s8830_s23 + $0x4] sm:$0x1] }
 0x507   : > { %4957 = vrot.lane.b32.xlu1 %v4931_v36, %s6818_s29  ;;  %5055 = vrot.lane.b32.xlu0 %v5028_v49, %s6819_s20  ;;  %v5169_v52 = vsel %vm5163_vm5, %v5136_v12, %v4894_v27  ;;  %v5237_v62 = vsel %vm5229_vm10, %v5204_v30, %v4992_v9  ;;  %v5030_v36 = vrot.slane %v4721_v5, 3 }
 0x509   : > { %v4942_v6 = vpop.permute.xlu1 %4941  ;;  %v5040_v46 = vpop.permute.xlu0 %5039 }
 0x50a   : > { %v5202_v33 = vsel %vm5196_vm8, %v5169_v52, %v4942_v6  ;;  %v5273_v61 = vsel %vm5262_vm13, %v5237_v62, %v5040_v46 }
 0x50b   : > { %v5324_v3 = vsel %vm8843_vm3, %v5273_v61, %v5323_v24  ;;  %5053 = vrot.lane.b32.xlu1 %v5027_v53, %s6819_s20  ;;  %4755 = vrot.lane.b32.xlu0 %v4721_v5, %s6813_s0  ;;  %v5235_v8 = vsel %vm5229_vm10, %v5202_v33, %v4990_v29  ;;  %v8976_v33 = vshrl.u32 %v8958_v34, 16 }
 0x50c   : > { %5325 = vst [vmem:[%s8830_s23 + $0x3] sm:$0x1] %v5324_v3 }
 0x50d   : > { %v5038_v48 = vpop.permute.xlu1 %5037  ;;  %v4740_v31 = vpop.permute.xlu0 %4739 }
 0x50e   : > { %v5270_v56 = vsel %vm5262_vm13, %v5235_v8, %v5038_v48  ;;  %v5076_v2 = vsel %vm817_vm0, %v8727_v16, %v4740_v31  ;;  %v8947_v16 = vpack.c.bf16 %v8737_v55, %v8737_v55  ;;  %v5029_v55 = vrot.slane %v4718_v42, 3 }
 0x50f   : > { %v5321_v63 = vsel %vm8843_vm3, %v5270_v56, %v5320_v18  ;;  %4753 = vrot.lane.b32.xlu1 %v4718_v42, %s6813_s0  ;;  %4819 = vrot.lane.b32.xlu0 %v4790_v19, %s6814_s17  ;;  %v4791_v31 = vrot.slane %v8958_v34, 1 }
 0x510   : > { %5322 = vst [vmem:[%s8830_s23 + $0x2] sm:$0x1] %v5321_v63  ;;  %v8963_v24 = vshrl.u32 %v8947_v16, 16  ;;  %v4792_v61 = vrot.slane %v8947_v16, 1  ;;  %v4888_v42 = vrot.slane %v8947_v16, 2  ;;  %v4887_v63 = vrot.slane %v8958_v34, 2 }
 0x511   : > { %v4738_v26 = vpop.permute.xlu1 %4737  ;;  %v4804_v25 = vpop.permute.xlu0 %4803 }
 0x512   : > { %v5109_v9 = vsel %vm5097_vm14, %v5076_v2, %v4804_v25  ;;  %v5074_v15 = vsel %vm817_vm0, %v8734_v10, %v4738_v26  ;;  %v5329_v10 = vld [vmem:[%s8830_s23 + $0x5] sm:$0x1]  ;;  %v4984_v26 = vrot.slane %v8947_v16, 3 }
 0x513   : > { %4817 = vrot.lane.b32.xlu1 %v4789_v0, %s6814_s17  ;;  %4915 = vrot.lane.b32.xlu0 %v4886_v50, %s6815_s18  ;;  %v4983_v50 = vrot.slane %v8958_v34, 3 }
 0x515   : > { %v4802_v21 = vpop.permute.xlu1 %4801  ;;  %v4900_v32 = vpop.permute.xlu0 %4899 }
 0x516   : > { %v5107_v37 = vsel %vm5097_vm14, %v5074_v15, %v4802_v21  ;;  %v4840_v21 = vrot.slane %v8963_v24, 1 }
 0x517   : > { %4913 = vrot.lane.b32.xlu1 %v4885_v54, %s6815_s18  ;;  %5011 = vrot.lane.b32.xlu0 %v4982_v11, %s6816_s16 }
 0x519   : > { %v4898_v4 = vpop.permute.xlu1 %4897  ;;  %v4996_v39 = vpop.permute.xlu0 %4995 }
 0x51b   : > { %5009 = vrot.lane.b32.xlu1 %v4981_v58, %s6816_s16  ;;  %4867 = vrot.lane.b32.xlu0 %v4838_v35, %s6817_s24  ;;  %v4936_v58 = vrot.slane %v8963_v24, 2 }
 0x51d   : > { %v4994_v27 = vpop.permute.xlu1 %4993  ;;  %v4852_v13 = vpop.permute.xlu0 %4851 }
 0x51e   : > { %v5142_v29 = vsel %vm5130_vm2, %v5109_v9, %v4852_v13 }
 0x51f   : > { %4865 = vrot.lane.b32.xlu1 %v4837_v22, %s6817_s24  ;;  %4963 = vrot.lane.b32.xlu0 %v4934_v7, %s6818_s29  ;;  %v5175_v41 = vsel %vm5163_vm5, %v5142_v29, %v4900_v32 }
 0x521   : > { %v4850_v57 = vpop.permute.xlu1 %4849  ;;  %v4948_v17 = vpop.permute.xlu0 %4947 }
 0x522   : > { %v5140_v43 = vsel %vm5130_vm2, %v5107_v37, %v4850_v57  ;;  %v5208_v47 = vsel %vm5196_vm8, %v5175_v41, %v4948_v17 }
 0x523   : > { %4961 = vrot.lane.b32.xlu1 %v4933_v44, %s6818_s29  ;;  %5059 = vrot.lane.b32.xlu0 %v5030_v36, %s6819_s20  ;;  %v5173_v28 = vsel %vm5163_vm5, %v5140_v43, %v4898_v4  ;;  %v5241_v12 = vsel %vm5229_vm10, %v5208_v47, %v4996_v39  ;;  %v4839_v39 = vrot.slane %v8976_v33, 1 }
 0x525   : > { %v4946_v49 = vpop.permute.xlu1 %4945  ;;  %v5044_v30 = vpop.permute.xlu0 %5043 }
 0x526   : > { %v5206_v53 = vsel %vm5196_vm8, %v5173_v28, %v4946_v49  ;;  %v5279_v52 = vsel %vm5262_vm13, %v5241_v12, %v5044_v30 }
 0x527   : > { %v5330_v6 = vsel %vm8843_vm3, %v5279_v52, %v5329_v10  ;;  %5057 = vrot.lane.b32.xlu1 %v5029_v55, %s6819_s20  ;;  %4759 = vrot.lane.b32.xlu0 %v8963_v24, %s6813_s0  ;;  %v5239_v62 = vsel %vm5229_vm10, %v5206_v53, %v4994_v27 }
 0x528   : > { %5331 = vst [vmem:[%s8830_s23 + $0x5] sm:$0x1] %v5330_v6 }
 0x529   : > { %v5042_v46 = vpop.permute.xlu1 %5041  ;;  %v4744_v5 = vpop.permute.xlu0 %4743 }
 0x52a   : > { %v5276_v3 = vsel %vm5262_vm13, %v5239_v62, %v5042_v46  ;;  %v5080_v32 = vsel %vm817_vm0, %v8762_v60, %v4744_v5 }
 0x52b   : > { %v5327_v18 = vsel %vm8843_vm3, %v5276_v3, %v5326_v1  ;;  %4757 = vrot.lane.b32.xlu1 %v8976_v33, %s6813_s0  ;;  %4823 = vrot.lane.b32.xlu0 %v4792_v61, %s6814_s17 }
 0x52c   : > { %5328 = vst [vmem:[%s8830_s23 + $0x4] sm:$0x1] %v5327_v18 }
 0x52d   : > { %v4742_v8 = vpop.permute.xlu1 %4741  ;;  %v4808_v48 = vpop.permute.xlu0 %4807 }
 0x52e   : > { %v5113_v54 = vsel %vm5097_vm14, %v5080_v32, %v4808_v48 }
 0x52f   : > { %4821 = vrot.lane.b32.xlu1 %v4791_v31, %s6814_s17  ;;  %4919 = vrot.lane.b32.xlu0 %v4888_v42, %s6815_s18 }
 0x531   : > { %v4806_v19 = vpop.permute.xlu1 %4805  ;;  %v4904_v56 = vpop.permute.xlu0 %4903 }
 0x533   : > { %4917 = vrot.lane.b32.xlu1 %v4887_v63, %s6815_s18  ;;  %5015 = vrot.lane.b32.xlu0 %v4984_v26, %s6816_s16 }
 0x535   : > { %v4902_v25 = vpop.permute.xlu1 %4901  ;;  %v5000_v0 = vpop.permute.xlu0 %4999 }
 0x537   : > { %5013 = vrot.lane.b32.xlu1 %v4983_v50, %s6816_s16  ;;  %4871 = vrot.lane.b32.xlu0 %v4840_v21, %s6817_s24 }
 0x539   : > { %v4998_v11 = vpop.permute.xlu1 %4997  ;;  %v4856_v4 = vpop.permute.xlu0 %4855 }
 0x53a   : > { %v5146_v35 = vsel %vm5130_vm2, %v5113_v54, %v4856_v4 }
 0x53b   : > { %6727 = shalt.err (!%p6724_p2)
}
 0x53c   : > { %s6728_s15 = scalar_lea.hbm %s9006_s12, 16  ;;  %s6732_s0 = scalar_lea.hbm %s9182_s7, 128 }
 0x53d   : > { %p6729_p3 = scmp.ne.s32.totalorder %s9006_s12, %s6728_s15  ;;  %p6733_p6 = scmp.lt.s32.totalorder %s9006_s12, %s9182_s7 }
 0x53e   : > { %p6734_p8 = scmp.lt.s32.totalorder %s6732_s0, %s6728_s15 }
 0x53f   : > { %p6730_p4 = pnand %p6729_p3, %p6916_p9 }
 0x540   : > { %p6735_p13 = por %p6734_p8, %p6733_p6 }
 0x541   : > { %p6731_p5 = pneg %p6730_p4 }
 0x543   : > { %p6736_p0 = pnand %p6735_p13, %p6731_p5 }
 0x545   : > { %6739 = shalt.err (!%p6736_p0)
}
 0x546   : > { %6358 = dma.vmem_to_hbm [thread:$0]  (%p6916_p9), %s5525_s30, 16, %s9006_s12, %s5507_s27   ;;  %4869 = vrot.lane.b32.xlu1 %v4839_v39, %s6817_s24  ;;  %4967 = vrot.lane.b32.xlu0 %v4936_v58, %s6818_s29  ;;  %v5078_v60 = vsel %vm817_vm0, %v8768_v14, %v4742_v8  ;;  %v4854_v9 = vpop.permute.xlu1 %4853  ;;  %v5179_v27 = vsel %vm5163_vm5, %v5146_v35, %v4904_v56  ;;  %v4952_v13 = vpop.permute.xlu0 %4951  ;;  %v4935_v22 = vrot.slane %v8976_v33, 2  ;;  %v5032_v7 = vrot.slane %v8963_v24, 3  ;;  %v5335_v14 = vld [vmem:[%s8830_s23 + $0x7] sm:$0x1] }
 0x547   : > { %v5111_v2 = vsel %vm5097_vm14, %v5078_v60, %v4806_v19  ;;  %v5212_v15 = vsel %vm5196_vm8, %v5179_v27, %v4952_v13  ;;  %v5031_v17 = vrot.slane %v8976_v33, 3  ;;  %v5332_v10 = vld [vmem:[%s8830_s23 + $0x6] sm:$0x1]  ;;  %v5341_v56 = vld [vmem:[%s8830_s23 + $0x9] sm:$0x1] }
 0x548   : > { %v5144_v29 = vsel %vm5130_vm2, %v5111_v2, %v4854_v9  ;;  %v5245_v57 = vsel %vm5229_vm10, %v5212_v15, %v5000_v0  ;;  %v5338_v32 = vld [vmem:[%s8830_s23 + $0x8] sm:$0x1] }
 0x549   : > { %v5177_v44 = vsel %vm5163_vm5, %v5144_v29, %v4902_v25 }
 0x54a   : > { %4965 = vrot.lane.b32.xlu1 %v4935_v22, %s6818_s29  ;;  %5063 = vrot.lane.b32.xlu0 %v5032_v7, %s6819_s20  ;;  %v4950_v37 = vpop.permute.xlu1 %4949  ;;  %v5048_v41 = vpop.permute.xlu0 %5047 }
 0x54b   : > { %v5210_v36 = vsel %vm5196_vm8, %v5177_v44, %v4950_v37  ;;  %v5285_v43 = vsel %vm5262_vm13, %v5245_v57, %v5048_v41 }
 0x54c   : > { %v5336_v47 = vsel %vm8843_vm3, %v5285_v43, %v5335_v14  ;;  %v5243_v55 = vsel %vm5229_vm10, %v5210_v36, %v4998_v11  ;;  %v5347_v43 = vld [vmem:[%s8830_s23 + $0xb] sm:$0x1] }
 0x54d   : > { %5337 = vst [vmem:[%s8830_s23 + $0x7] sm:$0x1] %v5336_v47 }
 0x54e   : > { %5061 = vrot.lane.b32.xlu1 %v5031_v17, %s6819_s20  ;;  %v5046_v28 = vpop.permute.xlu1 %5045  ;;  %v4748_v49 = vpop.permute.xlu0 %4747 }
 0x54f   : > { %v5282_v12 = vsel %vm5262_vm13, %v5243_v55, %v5046_v28  ;;  %v5084_v46 = vsel %vm817_vm0, %v8792_v59, %v4748_v49 }
 0x550   : > { %v5333_v30 = vsel %vm8843_vm3, %v5282_v12, %v5332_v10 }
 0x551   : > { %5334 = vst [vmem:[%s8830_s23 + $0x6] sm:$0x1] %v5333_v30  ;;  %v5344_v30 = vld [vmem:[%s8830_s23 + $0xa] sm:$0x1] }
 0x552   : > { %v4746_v24 = vpop.permute.xlu1 %4745  ;;  %v4812_v53 = vpop.permute.xlu0 %4811 }
 0x553   : > { %v5117_v5 = vsel %vm5097_vm14, %v5084_v46, %v4812_v53  ;;  %v5082_v18 = vsel %vm817_vm0, %v8798_v23, %v4746_v24 }
 0x556   : > { %v4810_v52 = vpop.permute.xlu1 %4809  ;;  %v4908_v6 = vpop.permute.xlu0 %4907 }
 0x557   : > { %v5115_v8 = vsel %vm5097_vm14, %v5082_v18, %v4810_v52 }
 0x55a   : > { %v4906_v1 = vpop.permute.xlu1 %4905  ;;  %v5004_v62 = vpop.permute.xlu0 %5003 }
 0x55e   : > { %v5002_v33 = vpop.permute.xlu1 %5001  ;;  %v4860_v61 = vpop.permute.xlu0 %4859 }
 0x55f   : > { %v5150_v3 = vsel %vm5130_vm2, %v5117_v5, %v4860_v61 }
 0x560   : > { %v5183_v31 = vsel %vm5163_vm5, %v5150_v3, %v4908_v6 }
 0x562   : > { %v4858_v48 = vpop.permute.xlu1 %4857  ;;  %v4956_v42 = vpop.permute.xlu0 %4955 }
 0x563   : > { %v5148_v19 = vsel %vm5130_vm2, %v5115_v8, %v4858_v48  ;;  %v5216_v59 = vsel %vm5196_vm8, %v5183_v31, %v4956_v42 }
 0x564   : > { %v5181_v63 = vsel %vm5163_vm5, %v5148_v19, %v4906_v1  ;;  %v5249_v25 = vsel %vm5229_vm10, %v5216_v59, %v5004_v62 }
 0x566   : > { %v4954_v26 = vpop.permute.xlu1 %4953  ;;  %v5052_v0 = vpop.permute.xlu0 %5051 }
 0x567   : > { %v5214_v23 = vsel %vm5196_vm8, %v5181_v63, %v4954_v26  ;;  %v5291_v50 = vsel %vm5262_vm13, %v5249_v25, %v5052_v0  ;;  %v5353_v0 = vld [vmem:[%s8830_s23 + $0xd] sm:$0x1] }
 0x568   : > { %v5342_v21 = vsel %vm8843_vm3, %v5291_v50, %v5341_v56  ;;  %v5247_v54 = vsel %vm5229_vm10, %v5214_v23, %v5002_v33 }
 0x569   : > { %5343 = vst [vmem:[%s8830_s23 + $0x9] sm:$0x1] %v5342_v21 }
 0x56a   : > { %v5050_v11 = vpop.permute.xlu1 %5049  ;;  %v4752_v4 = vpop.permute.xlu0 %4751 }
 0x56b   : > { %v5288_v39 = vsel %vm5262_vm13, %v5247_v54, %v5050_v11  ;;  %v5088_v22 = vsel %vm817_vm0, %v8834_v45, %v4752_v4  ;;  %v5350_v4 = vld [vmem:[%s8830_s23 + $0xc] sm:$0x1] }
 0x56c   : > { %v5339_v58 = vsel %vm8843_vm3, %v5288_v39, %v5338_v32 }
 0x56d   : > { %5340 = vst [vmem:[%s8830_s23 + $0x8] sm:$0x1] %v5339_v58 }
 0x56e   : > { %v4750_v35 = vpop.permute.xlu1 %4749  ;;  %v4816_v60 = vpop.permute.xlu0 %4815 }
 0x56f   : > { %v5121_v7 = vsel %vm5097_vm14, %v5088_v22, %v4816_v60  ;;  %v5086_v44 = vsel %vm817_vm0, %v8850_v40, %v4750_v35 }
 0x572   : > { %v4814_v2 = vpop.permute.xlu1 %4813  ;;  %v4912_v9 = vpop.permute.xlu0 %4911 }
 0x573   : > { %v5119_v37 = vsel %vm5097_vm14, %v5086_v44, %v4814_v2 }
 0x576   : > { %v4910_v27 = vpop.permute.xlu1 %4909  ;;  %v5008_v13 = vpop.permute.xlu0 %5007 }
 0x57a   : > { %v5006_v29 = vpop.permute.xlu1 %5005  ;;  %v4864_v15 = vpop.permute.xlu0 %4863 }
 0x57b   : > { %v5154_v14 = vsel %vm5130_vm2, %v5121_v7, %v4864_v15 }
 0x57c   : > { %v5187_v41 = vsel %vm5163_vm5, %v5154_v14, %v4912_v9 }
 0x57e   : > { %v4862_v57 = vpop.permute.xlu1 %4861  ;;  %v4960_v17 = vpop.permute.xlu0 %4959 }
 0x57f   : > { %v5152_v36 = vsel %vm5130_vm2, %v5119_v37, %v4862_v57  ;;  %v5220_v45 = vsel %vm5196_vm8, %v5187_v41, %v4960_v17 }
 0x580   : > { %v5185_v47 = vsel %vm5163_vm5, %v5152_v36, %v4910_v27  ;;  %v5253_v55 = vsel %vm5229_vm10, %v5220_v45, %v5008_v13 }
 0x582   : > { %v4958_v10 = vpop.permute.xlu1 %4957  ;;  %v5056_v28 = vpop.permute.xlu0 %5055 }
 0x583   : > { %v5218_v40 = vsel %vm5196_vm8, %v5185_v47, %v4958_v10  ;;  %v5297_v49 = vsel %vm5262_vm13, %v5253_v55, %v5056_v28  ;;  %v5359_v10 = vld [vmem:[%s8830_s23 + $0xf] sm:$0x1] }
 0x584   : > { %v5348_v12 = vsel %vm8843_vm3, %v5297_v49, %v5347_v43  ;;  %v5251_v24 = vsel %vm5229_vm10, %v5218_v40, %v5006_v29 }
 0x585   : > { %5349 = vst [vmem:[%s8830_s23 + $0xb] sm:$0x1] %v5348_v12 }
 0x586   : > { %v5054_v53 = vpop.permute.xlu1 %5053  ;;  %v4756_v52 = vpop.permute.xlu0 %4755 }
 0x587   : > { %v5294_v6 = vsel %vm5262_vm13, %v5251_v24, %v5054_v53  ;;  %v5092_v18 = vsel %vm817_vm0, %v8893_v38, %v4756_v52  ;;  %v5356_v24 = vld [vmem:[%s8830_s23 + $0xe] sm:$0x1] }
 0x588   : > { %v5345_v1 = vsel %vm8843_vm3, %v5294_v6, %v5344_v30 }
 0x589   : > { %5346 = vst [vmem:[%s8830_s23 + $0xa] sm:$0x1] %v5345_v1 }
 0x58a   : > { %v4754_v62 = vpop.permute.xlu1 %4753  ;;  %v4820_v46 = vpop.permute.xlu0 %4819 }
 0x58b   : > { %v5125_v8 = vsel %vm5097_vm14, %v5092_v18, %v4820_v46  ;;  %v5090_v19 = vsel %vm817_vm0, %v8904_v51, %v4754_v62 }
 0x58e   : > { %v4818_v5 = vpop.permute.xlu1 %4817  ;;  %v4916_v33 = vpop.permute.xlu0 %4915 }
 0x58f   : > { %v5123_v59 = vsel %vm5097_vm14, %v5090_v19, %v4818_v5 }
 0x592   : > { %v4914_v61 = vpop.permute.xlu1 %4913  ;;  %v5012_v3 = vpop.permute.xlu0 %5011 }
 0x596   : > { %v5010_v48 = vpop.permute.xlu1 %5009  ;;  %v4868_v31 = vpop.permute.xlu0 %4867 }
 0x597   : > { %v5158_v42 = vsel %vm5130_vm2, %v5125_v8, %v4868_v31 }
 0x598   : > { %v5191_v63 = vsel %vm5163_vm5, %v5158_v42, %v4916_v33 }
 0x59a   : > { %v4866_v56 = vpop.permute.xlu1 %4865  ;;  %v4964_v26 = vpop.permute.xlu0 %4963 }
 0x59b   : > { %v5156_v25 = vsel %vm5130_vm2, %v5123_v59, %v4866_v56  ;;  %v5224_v38 = vsel %vm5196_vm8, %v5191_v63, %v4964_v26 }
 0x59c   : > { %v5189_v23 = vsel %vm5163_vm5, %v5156_v25, %v4914_v61  ;;  %v5257_v21 = vsel %vm5229_vm10, %v5224_v38, %v5012_v3 }
 0x59e   : > { %v4962_v50 = vpop.permute.xlu1 %4961  ;;  %v5060_v32 = vpop.permute.xlu0 %5059 }
 0x59f   : > { %v5222_v51 = vsel %vm5196_vm8, %v5189_v23, %v4962_v50  ;;  %v5303_v54 = vsel %vm5262_vm13, %v5257_v21, %v5060_v32 }
 0x5a0   : > { %v5354_v11 = vsel %vm8843_vm3, %v5303_v54, %v5353_v0  ;;  %v5255_v39 = vsel %vm5229_vm10, %v5222_v51, %v5010_v48 }
 0x5a1   : > { %5355 = vst [vmem:[%s8830_s23 + $0xd] sm:$0x1] %v5354_v11 }
 0x5a2   : > { %v5058_v58 = vpop.permute.xlu1 %5057  ;;  %v4760_v35 = vpop.permute.xlu0 %4759 }
 0x5a3   : > { %v5300_v60 = vsel %vm5262_vm13, %v5255_v39, %v5058_v58  ;;  %v5096_v15 = vsel %vm817_vm0, %v8947_v16, %v4760_v35 }
 0x5a4   : > { %v5351_v2 = vsel %vm8843_vm3, %v5300_v60, %v5350_v4 }
 0x5a5   : > { %5352 = vst [vmem:[%s8830_s23 + $0xc] sm:$0x1] %v5351_v2 }
 0x5a6   : > { %v4758_v9 = vpop.permute.xlu1 %4757  ;;  %v4824_v27 = vpop.permute.xlu0 %4823 }
 0x5a7   : > { %v5129_v14 = vsel %vm5097_vm14, %v5096_v15, %v4824_v27  ;;  %v5094_v41 = vsel %vm817_vm0, %v8958_v34, %v4758_v9 }
 0x5aa   : > { %v4822_v13 = vpop.permute.xlu1 %4821  ;;  %v4920_v22 = vpop.permute.xlu0 %4919 }
 0x5ab   : > { %v5127_v17 = vsel %vm5097_vm14, %v5094_v41, %v4822_v13 }
 0x5ae   : > { %v4918_v7 = vpop.permute.xlu1 %4917  ;;  %v5016_v29 = vpop.permute.xlu0 %5015 }
 0x5b2   : > { %v5014_v44 = vpop.permute.xlu1 %5013  ;;  %v4872_v37 = vpop.permute.xlu0 %4871 }
 0x5b3   : > { %v5162_v57 = vsel %vm5130_vm2, %v5129_v14, %v4872_v37 }
 0x5b4   : > { %v5195_v45 = vsel %vm5163_vm5, %v5162_v57, %v4920_v22 }
 0x5b8   : > { %v4870_v36 = vpop.permute.xlu1 %4869  ;;  %v4968_v43 = vpop.permute.xlu0 %4967 }
 0x5b9   : > { %v5160_v47 = vsel %vm5130_vm2, %v5127_v17, %v4870_v36  ;;  %v5228_v16 = vsel %vm5196_vm8, %v5195_v45, %v4968_v43 }
 0x5ba   : > { %v5193_v55 = vsel %vm5163_vm5, %v5160_v47, %v4918_v7  ;;  %v5261_v40 = vsel %vm5229_vm10, %v5228_v16, %v5016_v29 }
 0x5bc   : > { %v4966_v28 = vpop.permute.xlu1 %4965  ;;  %v5064_v49 = vpop.permute.xlu0 %5063 }
 0x5bd   : > { %v5226_v34 = vsel %vm5196_vm8, %v5193_v55, %v4966_v28  ;;  %v5309_v12 = vsel %vm5262_vm13, %v5261_v40, %v5064_v49 }
 0x5be   : > { %v5360_v30 = vsel %vm8843_vm3, %v5309_v12, %v5359_v10  ;;  %v5259_v53 = vsel %vm5229_vm10, %v5226_v34, %v5014_v44 }
 0x5bf   : > { %5361 = vst [vmem:[%s8830_s23 + $0xf] sm:$0x1] %v5360_v30 }
 0x5c0   : > { %v5062_v52 = vpop.permute.xlu1 %5061 }
 0x5c1   : > { %v5306_v6 = vsel %vm5262_vm13, %v5259_v53, %v5062_v52 }
 0x5c2   : > { %v5357_v1 = vsel %vm8843_vm3, %v5306_v6, %v5356_v24 }
 0x5c3   : > { %5358 = vst [vmem:[%s8830_s23 + $0xe] sm:$0x1] %v5357_v1 }
 0x5c4 PF: > { %s9383_s14 = sld [smem:[#allocation18_spill]] }
 0x5c5   : > { %s9384_s16 = sld [smem:[#allocation15_spill]] }
 0x5ca   : > { %p6378_p9 = scmp.ge.s32.totalorder %s9383_s14, 2 }
 0x5cb   : > { %s5547_s29 = sand.u32 1, %s9384_s16  }
 0x5cc   : > { %p6374_p1 = pnand %p6378_p9, %p6923_p11  ;;  %s5548_s20 = scalar_lea.sflag [#allocation4], %s5547_s29 }
 0x5ce   : > { %p6375_p7 = pneg %p6374_p1 }
 0x5d0   : > { %6777 = dma.done.wait (%p6375_p7), %s5548_s20, 16  }
 0x5d1   : > { %6779 = vsyncadd (%p6375_p7), %s5548_s20, 4294967280  ;;  %s30_s29 = sadd.s32 1, %s9383_s14   ;;  %s9386_s28 = sld [smem:[#allocation16_spill]] }
 0x5d2   : > { %p27_p10 = scmp.ge.s32.totalorder %s30_s29, 10   ;;  %s9387_s26 = sld [smem:[#allocation20_spill]] }
 0x5d3   : > { %s9388_s27 = sld [smem:[#allocation17_spill]]  ;;  %s9390_s24 = smov %s6786_s25 }
 0x5d4   : > { %s9389_s19 = sld [smem:[#allocation19_spill]] }
 0x5d6   :  { %29 = sbr.rel (!%p27_p10) target bundleno = 13 (0xd), region = 144 }
 0x5d7   : > { %s9391_s25 = smov %s9386_s28 }
 0x5da   : > { %s9392_s28 = smov %s9389_s19 }
 0x5db   :  { %5552 = vsyncpa [#allocation3], 1 }
 0x5dc   :  { %5554 = vsyncpa [#allocation3 + $0x1], 1 }
 0x5dd   :  { %5555 = vsyncpa [#allocation6], 1 }
 0x5de   :  { %5557 = vsyncpa [#allocation6 + $0x1], 1 }
 0x5df   :  { %5558 = vsyncpa [#allocation9], 1 }
 0x5e0   :  { %5560 = vsyncpa [#allocation9 + $0x1], 1 }
 0x5e1   :  { %5561 = vsyncpa [#allocation4], 1 }
 0x5e2   :  { %5563 = vsyncpa [#allocation4 + $0x1], 1 }

</bundles_post_ra>
